<compile_context>
chip_gen: v6e
topology: v6e:2x2x1
jax: 0.10.0
libtpu: 0.0.40
codegen_flags: <defaults>
</compile_context>

<pallas_src>
import functools
import math

import jax
import jax.numpy as jnp
from jax import lax
from jax.experimental import pallas as pl
from jax.experimental.pallas import tpu as pltpu


# --------------------------------------------------------------------------
# Single fused GPT forward kernel (one grid step, whole model in VMEM).
# --------------------------------------------------------------------------
def _gpt_kernel(tok_ref, tok_emb_ref, pos_emb_ref,
                wq_ref, wk_ref, wv_ref, wo_ref, bo_ref,
                g1_ref, be1_ref, w1_ref, b1_ref, w2_ref, b2_ref,
                g2_ref, be2_ref, wout_ref, bout_ref,
                o_ref, *, num_heads, num_layers, batch, seq, approx_softmax):
    B, T, H, L = batch, seq, num_heads, num_layers
    BT = B * T
    V, E = tok_emb_ref.shape
    hd = E // H
    scale = 1.0 / math.sqrt(hd)
    f32, bf16 = jnp.float32, jnp.bfloat16

    # ---- token + positional embedding (exact in-kernel one-hot gather) ----
    tok = tok_ref[...]                                        # (BT, 1) int32
    vocab_ids = lax.broadcasted_iota(jnp.int32, (BT, V), 1)
    one_hot = (tok == vocab_ids).astype(f32)
    x = jnp.dot(one_hot, tok_emb_ref[...], preferred_element_type=f32)
    pos = pos_emb_ref[...]                                    # (T, E) f32
    x = x + jnp.concatenate([pos] * B, axis=0)                # (BT, E) f32

    # ---- causal mask built once from small (T, T) iotas --------------------
    row = lax.broadcasted_iota(jnp.int32, (T, T), 0)
    col = lax.broadcasted_iota(jnp.int32, (T, T), 1)
    causal = (col <= row)[None]                               # (1, T, T)

    def layernorm(y, g, b):                                   # f32 throughout
        mu = jnp.mean(y, axis=-1, keepdims=True)
        var = jnp.mean(jnp.square(y - mu), axis=-1, keepdims=True)
        return (y - mu) * lax.rsqrt(var + 1e-5) * g + b

    def split_heads(a):                                       # (BT,E)->(H*B,T,hd)
        # Lane slices at multiples of hd are stacked along a NEW leading
        # (major) axis -- no lane-splitting reshape / transpose -- then a
        # sublane-only regroup (B*T -> T) gives one batched operand.
        a = jnp.stack([a[:, h * hd:(h + 1) * hd] for h in range(H)], axis=0)
        return a.reshape(H * B, T, hd)

    for l in range(L):                                        # static unroll
        xb = x.astype(bf16)
        # Fused QKV for all heads: lane-dense (BT, E) x (E, E), bf16 in / f32 acc.
        q = jnp.dot(xb, wq_ref[l], preferred_element_type=f32).astype(bf16)
        k = jnp.dot(xb, wk_ref[l], preferred_element_type=f32).astype(bf16)
        v = jnp.dot(xb, wv_ref[l], preferred_element_type=f32).astype(bf16)

        q3, k3, v3 = split_heads(q), split_heads(k), split_heads(v)

        # All heads & batches in ONE batched dot_general (no per-head MXU issue,
        # no materialized k.T).
        s = lax.dot_general(q3, k3, (((2,), (2,)), ((0,), (0,))),
                            preferred_element_type=f32) * scale   # (H*B, T, T)
        s = jnp.where(causal, s, -1e30)            # finite mask value
        m = jnp.max(s, axis=-1, keepdims=True)
        p = jnp.exp(s - m)
        denom = jnp.sum(p, axis=-1, keepdims=True)
        if approx_softmax:
            p = p * pl.reciprocal(denom, approx=True)   # EUP slot, ~1e-3 drift
        else:
            p = p / denom                               # exact (default)
        pv = lax.dot_general(p.astype(bf16), v3, (((2,), (1,)), ((0,), (0,))),
                             preferred_element_type=f32)          # (H*B, T, hd)
        pv = pv.reshape(H, BT, hd)

        # Output projection: fold the head concat into Wo -- accumulate
        # head_h @ Wo[h*hd:(h+1)*hd, :] (sublane-sliced, cheap) into an f32
        # (BT, E) buffer; stores stay 128-lane dense.
        wo = wo_ref[l]
        mh = jnp.zeros((BT, E), f32)
        for h in range(H):
            mh = mh + jnp.dot(pv[h].astype(bf16), wo[h * hd:(h + 1) * hd, :],
                              preferred_element_type=f32)
        mh = mh + bo_ref[l]

        h1 = jnp.maximum(layernorm(mh, g1_ref[l], be1_ref[l]) + x, 0.0)

        # ---- feed-forward --------------------------------------------------
        ff = jnp.dot(h1.astype(bf16), w1_ref[l],
                     preferred_element_type=f32) + b1_ref[l]
        ff = jnp.maximum(ff, 0.0)
        ff = jnp.dot(ff.astype(bf16), w2_ref[l],
                     preferred_element_type=f32) + b2_ref[l]

        x = jnp.maximum(layernorm(ff, g2_ref[l], be2_ref[l]) + h1, 0.0)

    # ---- final ReLU + lm head (lane-dense V >= 128 output) ------------------
    logits = jnp.dot(jnp.maximum(x, 0.0).astype(bf16), wout_ref[...],
                     preferred_element_type=f32) + bout_ref[...]
    o_ref[...] = logits.astype(o_ref.dtype)


def _full_spec(shape):
    ndim = len(shape)
    return pl.BlockSpec(tuple(shape), lambda i, _n=ndim: (0,) * _n)


@functools.partial(jax.jit, static_argnames=("num_heads", "approx_softmax"))
def gpt_forward(tokens, params, *, num_heads, approx_softmax=False):
    B, T = tokens.shape
    V, E = params["tok_emb"].shape
    L, _, F = params["w1"].shape
    BT = B * T
    bf16 = jnp.bfloat16

    tok = tokens.reshape(BT, 1).astype(jnp.int32)
    pos = params["pos_emb"][:T]

    # bf16 copies of the MXU weight operands (accumulation stays f32 in-kernel).
    wq, wk, wv, wo = (params[n].astype(bf16) for n in ("wq", "wk", "wv", "wo"))
    w1, w2, wout = (params[n].astype(bf16) for n in ("w1", "w2", "wout"))

    operands = (tok, params["tok_emb"], pos,
                wq, wk, wv, wo, params["bo"],
                params["g1"], params["be1"], w1, params["b1"],
                w2, params["b2"], params["g2"], params["be2"],
                wout, params["bout"])

    kernel = functools.partial(
        _gpt_kernel, num_heads=num_heads, num_layers=int(L), batch=B, seq=T,
        approx_softmax=approx_softmax)

    H = num_heads
    cost = pl.CostEstimate(
        flops=(2 * BT * V * E                            # embedding gather
               + L * (3 * 2 * BT * E * E                 # QKV
                      + 2 * 2 * BT * T * E               # scores + P@V
                      + 2 * BT * E * E                   # out-proj
                      + 2 * 2 * BT * E * F)              # FFN
               + 2 * BT * E * V),                        # lm head
        transcendentals=int(L * (H * BT * T + 2 * BT)),
        bytes_accessed=int(sum(math.prod(o.shape) * o.dtype.itemsize
                               for o in operands) + 4 * BT * V),
    )

    out = pl.pallas_call(
        kernel,
        out_shape=jax.ShapeDtypeStruct((BT, V), jnp.float32),
        grid_spec=pltpu.PrefetchScalarGridSpec(
            num_scalar_prefetch=0,
            grid=(1,),                     # single step: whole model fused
            in_specs=[_full_spec(o.shape) for o in operands],
            out_specs=_full_spec((BT, V)),
        ),
        compiler_params=pltpu.CompilerParams(
            dimension_semantics=("arbitrary",),
            # ~1 MB of weights + tiny activations; explicit limit with headroom
            # (re-derive / raise before reusing at large T, esp. on v7x 64 MiB).
            vmem_limit_bytes=32 * 1024 * 1024,
        ),
        cost_estimate=cost,
    )(*operands)
    return out.reshape(B, T, V)


# --------------------------------------------------------------------------
# Pure-JAX f32 reference (mirrors the PyTorch module exactly, eval mode).
# --------------------------------------------------------------------------
def _gpt_reference(tokens, params, *, num_heads):
    B, T = tokens.shape
    x = params["tok_emb"][tokens] + params["pos_emb"][:T][None]
    E = x.shape[-1]
    hd = E // num_heads
    L = params["wq"].shape[0]
    mask = jnp.tril(jnp.ones((T, T)))

    def ln(y, g, b):
        mu = jnp.mean(y, -1, keepdims=True)
        var = jnp.mean((y - mu) ** 2, -1, keepdims=True)
        return (y - mu) / jnp.sqrt(var + 1e-5) * g + b

    for l in range(L):
        q = x @ params["wq"][l]
        k = x @ params["wk"][l]
        v = x @ params["wv"][l]
        heads = []
        for h in range(num_heads):
            sl = slice(h * hd, (h + 1) * hd)
            s = (q[..., sl] @ jnp.swapaxes(k[..., sl], 1, 2)) / math.sqrt(hd)
            s = jnp.where(mask == 0, -jnp.inf, s)
            heads.append(jax.nn.softmax(s, axis=-1) @ v[..., sl])
        mh = jnp.concatenate(heads, axis=-1) @ params["wo"][l] + params["bo"][l][0]
        h1 = jax.nn.relu(ln(mh, params["g1"][l][0], params["be1"][l][0]) + x)
        f = jax.nn.relu(h1 @ params["w1"][l] + params["b1"][l][0])
        f = f @ params["w2"][l] + params["b2"][l][0]
        x = jax.nn.relu(ln(f, params["g2"][l][0], params["be2"][l][0]) + h1)
    return jax.nn.relu(x) @ params["wout"] + params["bout"][0]


# --------------------------------------------------------------------------
# Parameter init.  Linear weights stored pre-transposed as (in, out); all
# per-layer tensors stacked along a leading layer axis.
# --------------------------------------------------------------------------
def init_params(key, *, emb, dff, vocab, ctx, n_layers):
    ks = jax.random.split(key, 14)

    def u(k, shape, fan_in):
        b = 1.0 / math.sqrt(fan_in)
        return jax.random.uniform(k, shape, jnp.float32, -b, b)

    L = n_layers
    return dict(
        tok_emb=0.02 * jax.random.normal(ks[0], (vocab, emb), jnp.float32),
        pos_emb=0.02 * jax.random.normal(ks[1], (ctx, emb), jnp.float32),
        wq=u(ks[2], (L, emb, emb), emb),
        wk=u(ks[3], (L, emb, emb), emb),
        wv=u(ks[4], (L, emb, emb), emb),
        wo=u(ks[5], (L, emb, emb), emb),
        bo=u(ks[6], (L, 1, emb), emb),
        g1=jnp.ones((L, 1, emb), jnp.float32),
        be1=jnp.zeros((L, 1, emb), jnp.float32),
        w1=u(ks[7], (L, emb, dff), emb),
        b1=u(ks[8], (L, 1, dff), emb),
        w2=u(ks[9], (L, dff, emb), dff),
        b2=u(ks[10], (L, 1, emb), dff),
        g2=jnp.ones((L, 1, emb), jnp.float32),
        be2=jnp.zeros((L, 1, emb), jnp.float32),
        wout=u(ks[11], (emb, vocab), emb),
        bout=u(ks[12], (1, vocab), emb),
    )


if __name__ == "__main__":
    # GPT(emb_size=128, dff=256, num_heads=4, context_length=16, N=2,
    #     vocab_size=256, dropout=0.0) -- lane-dense feature dims.
    EMB, DFF, NUM_HEADS, CTX, NLAYERS, VOCAB = 128, 256, 4, 16, 2, 256
    B, T = 2, 16

    key = jax.random.PRNGKey(0)
    pkey, tkey = jax.random.split(key)
    params = init_params(pkey, emb=EMB, dff=DFF, vocab=VOCAB, ctx=CTX,
                         n_layers=NLAYERS)
    tokens = jax.random.randint(tkey, (B, T), 0, VOCAB, dtype=jnp.int32)

    out = gpt_forward(tokens, params, num_heads=NUM_HEADS)
    out = jax.block_until_ready(out)

    ref = _gpt_reference(tokens, params, num_heads=NUM_HEADS)
    assert out.shape == (B, T, VOCAB)
    max_err = float(jnp.max(jnp.abs(out - ref)))
    # Tolerance is dominated by the bf16 MXU operands requested by the perf
    # review (the reference is pure f32); with f32 matmuls max_err ~1e-6.
    assert jnp.allclose(out, ref, atol=5e-2, rtol=5e-2), max_err
    print("KERNEL_OK")
</pallas_src>

<mosaic_0001>
module attributes {stable_mosaic.version = 11 : i64} {
  func.func @_gpt_kernel(%arg0: i32, %arg1: memref<32x1xi32, #tpu.memory_space<vmem>>, %arg2: memref<256x128xf32, #tpu.memory_space<vmem>>, %arg3: memref<16x128xf32, #tpu.memory_space<vmem>>, %arg4: memref<2x128x128xbf16, #tpu.memory_space<vmem>>, %arg5: memref<2x128x128xbf16, #tpu.memory_space<vmem>>, %arg6: memref<2x128x128xbf16, #tpu.memory_space<vmem>>, %arg7: memref<2x128x128xbf16, #tpu.memory_space<vmem>>, %arg8: memref<2x1x128xf32, #tpu.memory_space<vmem>>, %arg9: memref<2x1x128xf32, #tpu.memory_space<vmem>>, %arg10: memref<2x1x128xf32, #tpu.memory_space<vmem>>, %arg11: memref<2x128x256xbf16, #tpu.memory_space<vmem>>, %arg12: memref<2x1x256xf32, #tpu.memory_space<vmem>>, %arg13: memref<2x256x128xbf16, #tpu.memory_space<vmem>>, %arg14: memref<2x1x128xf32, #tpu.memory_space<vmem>>, %arg15: memref<2x1x128xf32, #tpu.memory_space<vmem>>, %arg16: memref<2x1x128xf32, #tpu.memory_space<vmem>>, %arg17: memref<128x256xbf16, #tpu.memory_space<vmem>>, %arg18: memref<1x256xf32, #tpu.memory_space<vmem>>, %arg19: memref<32x256xf32, #tpu.memory_space<vmem>>) attributes {dimension_semantics = [#tpu.dimension_semantics<arbitrary>], iteration_bounds = array<i64: 1>, scalar_prefetch = 0 : i64, scratch_operands = 0 : i64, tpu.core_type = #tpu.core_type<tc>, window_params = [{pipeline_mode = #tpu.pipeline_mode<synchronous>, transform_indices = @transform_0, window_bounds = array<i64: 32, 1>}, {pipeline_mode = #tpu.pipeline_mode<synchronous>, transform_indices = @transform_1, window_bounds = array<i64: 256, 128>}, {pipeline_mode = #tpu.pipeline_mode<synchronous>, transform_indices = @transform_2, window_bounds = array<i64: 16, 128>}, {pipeline_mode = #tpu.pipeline_mode<synchronous>, transform_indices = @transform_3, window_bounds = array<i64: 2, 128, 128>}, {pipeline_mode = #tpu.pipeline_mode<synchronous>, transform_indices = @transform_4, window_bounds = array<i64: 2, 128, 128>}, {pipeline_mode = #tpu.pipeline_mode<synchronous>, transform_indices = @transform_5, window_bounds = array<i64: 2, 128, 128>}, {pipeline_mode = #tpu.pipeline_mode<synchronous>, transform_indices = @transform_6, window_bounds = array<i64: 2, 128, 128>}, {pipeline_mode = #tpu.pipeline_mode<synchronous>, transform_indices = @transform_7, window_bounds = array<i64: 2, 1, 128>}, {pipeline_mode = #tpu.pipeline_mode<synchronous>, transform_indices = @transform_8, window_bounds = array<i64: 2, 1, 128>}, {pipeline_mode = #tpu.pipeline_mode<synchronous>, transform_indices = @transform_9, window_bounds = array<i64: 2, 1, 128>}, {pipeline_mode = #tpu.pipeline_mode<synchronous>, transform_indices = @transform_10, window_bounds = array<i64: 2, 128, 256>}, {pipeline_mode = #tpu.pipeline_mode<synchronous>, transform_indices = @transform_11, window_bounds = array<i64: 2, 1, 256>}, {pipeline_mode = #tpu.pipeline_mode<synchronous>, transform_indices = @transform_12, window_bounds = array<i64: 2, 256, 128>}, {pipeline_mode = #tpu.pipeline_mode<synchronous>, transform_indices = @transform_13, window_bounds = array<i64: 2, 1, 128>}, {pipeline_mode = #tpu.pipeline_mode<synchronous>, transform_indices = @transform_14, window_bounds = array<i64: 2, 1, 128>}, {pipeline_mode = #tpu.pipeline_mode<synchronous>, transform_indices = @transform_15, window_bounds = array<i64: 2, 1, 128>}, {pipeline_mode = #tpu.pipeline_mode<synchronous>, transform_indices = @transform_16, window_bounds = array<i64: 128, 256>}, {pipeline_mode = #tpu.pipeline_mode<synchronous>, transform_indices = @transform_17, window_bounds = array<i64: 1, 256>}, {pipeline_mode = #tpu.pipeline_mode<synchronous>, transform_indices = @transform_18, window_bounds = array<i64: 32, 256>}]} {
    %c0 = arith.constant 0 : index
    %c0_0 = arith.constant 0 : index
    %0 = vector.load %arg1[%c0, %c0_0] : memref<32x1xi32, #tpu.memory_space<vmem>>, vector<32x1xi32>
    %1 = tpu.iota {dimensions = array<i32: 1>} : vector<32x256xi32>
    %2 = vector.broadcast %0 : vector<32x1xi32> to vector<32x256xi32>
    %3 = arith.cmpi eq, %2, %1 : vector<32x256xi32>
    %4 = arith.extui %3 : vector<32x256xi1> to vector<32x256xi32>
    %5 = arith.sitofp %4 : vector<32x256xi32> to vector<32x256xf32>
    %c0_1 = arith.constant 0 : index
    %c0_2 = arith.constant 0 : index
    %6 = vector.load %arg2[%c0_1, %c0_2] : memref<256x128xf32, #tpu.memory_space<vmem>>, vector<256x128xf32>
    %cst = arith.constant dense<0.000000e+00> : vector<32x128xf32>
    %7 = tpu.matmul %5, %6, %cst {dimension_numbers = #tpu.dot_dimension_numbers<[1], [0], [0], [1], [0, 0, 1, 1], [], []>} : vector<32x256xf32>, vector<256x128xf32>, vector<32x128xf32> -> vector<32x128xf32>
    %c0_3 = arith.constant 0 : index
    %c0_4 = arith.constant 0 : index
    %8 = vector.load %arg3[%c0_3, %c0_4] : memref<16x128xf32, #tpu.memory_space<vmem>>, vector<16x128xf32>
    %9 = tpu.concatenate %8, %8 in 0 : vector<16x128xf32>, vector<16x128xf32> -> vector<32x128xf32>
    %10 = arith.addf %7, %9 : vector<32x128xf32>
    %11 = tpu.iota {dimensions = array<i32: 0>} : vector<16x16xi32>
    %12 = tpu.iota {dimensions = array<i32: 1>} : vector<16x16xi32>
    %13 = arith.cmpi sle, %12, %11 : vector<16x16xi32>
    %14 = vector.shape_cast %13 : vector<16x16xi1> to vector<1x16x16xi1>
    %15 = arith.truncf %10 : vector<32x128xf32> to vector<32x128xbf16>
    %c0_5 = arith.constant 0 : index
    %c0_6 = arith.constant 0 : index
    %c0_7 = arith.constant 0 : index
    %16 = vector.load %arg4[%c0_5, %c0_6, %c0_7] : memref<2x128x128xbf16, #tpu.memory_space<vmem>>, vector<1x128x128xbf16>
    %17 = vector.shape_cast %16 : vector<1x128x128xbf16> to vector<128x128xbf16>
    %cst_8 = arith.constant dense<0.000000e+00> : vector<32x128xf32>
    %18 = tpu.matmul %15, %17, %cst_8 {dimension_numbers = #tpu.dot_dimension_numbers<[1], [0], [0], [1], [0, 0, 1, 1], [], []>} : vector<32x128xbf16>, vector<128x128xbf16>, vector<32x128xf32> -> vector<32x128xf32>
    %19 = arith.truncf %18 : vector<32x128xf32> to vector<32x128xbf16>
    %c0_9 = arith.constant 0 : index
    %c0_10 = arith.constant 0 : index
    %c0_11 = arith.constant 0 : index
    %20 = vector.load %arg5[%c0_9, %c0_10, %c0_11] : memref<2x128x128xbf16, #tpu.memory_space<vmem>>, vector<1x128x128xbf16>
    %21 = vector.shape_cast %20 : vector<1x128x128xbf16> to vector<128x128xbf16>
    %cst_12 = arith.constant dense<0.000000e+00> : vector<32x128xf32>
    %22 = tpu.matmul %15, %21, %cst_12 {dimension_numbers = #tpu.dot_dimension_numbers<[1], [0], [0], [1], [0, 0, 1, 1], [], []>} : vector<32x128xbf16>, vector<128x128xbf16>, vector<32x128xf32> -> vector<32x128xf32>
    %23 = arith.truncf %22 : vector<32x128xf32> to vector<32x128xbf16>
    %c0_13 = arith.constant 0 : index
    %c0_14 = arith.constant 0 : index
    %c0_15 = arith.constant 0 : index
    %24 = vector.load %arg6[%c0_13, %c0_14, %c0_15] : memref<2x128x128xbf16, #tpu.memory_space<vmem>>, vector<1x128x128xbf16>
    %25 = vector.shape_cast %24 : vector<1x128x128xbf16> to vector<128x128xbf16>
    %cst_16 = arith.constant dense<0.000000e+00> : vector<32x128xf32>
    %26 = tpu.matmul %15, %25, %cst_16 {dimension_numbers = #tpu.dot_dimension_numbers<[1], [0], [0], [1], [0, 0, 1, 1], [], []>} : vector<32x128xbf16>, vector<128x128xbf16>, vector<32x128xf32> -> vector<32x128xf32>
    %27 = arith.truncf %26 : vector<32x128xf32> to vector<32x128xbf16>
    %28 = vector.extract_strided_slice %19 {offsets = [0, 0], sizes = [32, 32], strides = [1, 1]} : vector<32x128xbf16> to vector<32x32xbf16>
    %29 = vector.extract_strided_slice %19 {offsets = [0, 32], sizes = [32, 32], strides = [1, 1]} : vector<32x128xbf16> to vector<32x32xbf16>
    %30 = vector.extract_strided_slice %19 {offsets = [0, 64], sizes = [32, 32], strides = [1, 1]} : vector<32x128xbf16> to vector<32x32xbf16>
    %31 = vector.extract_strided_slice %19 {offsets = [0, 96], sizes = [32, 32], strides = [1, 1]} : vector<32x128xbf16> to vector<32x32xbf16>
    %32 = vector.shape_cast %28 : vector<32x32xbf16> to vector<1x32x32xbf16>
    %33 = vector.shape_cast %29 : vector<32x32xbf16> to vector<1x32x32xbf16>
    %34 = vector.shape_cast %30 : vector<32x32xbf16> to vector<1x32x32xbf16>
    %35 = vector.shape_cast %31 : vector<32x32xbf16> to vector<1x32x32xbf16>
    %36 = tpu.concatenate %32, %33, %34, %35 in 0 : vector<1x32x32xbf16>, vector<1x32x32xbf16>, vector<1x32x32xbf16>, vector<1x32x32xbf16> -> vector<4x32x32xbf16>
    %37 = vector.shape_cast %36 : vector<4x32x32xbf16> to vector<8x16x32xbf16>
    %38 = vector.extract_strided_slice %23 {offsets = [0, 0], sizes = [32, 32], strides = [1, 1]} : vector<32x128xbf16> to vector<32x32xbf16>
    %39 = vector.extract_strided_slice %23 {offsets = [0, 32], sizes = [32, 32], strides = [1, 1]} : vector<32x128xbf16> to vector<32x32xbf16>
    %40 = vector.extract_strided_slice %23 {offsets = [0, 64], sizes = [32, 32], strides = [1, 1]} : vector<32x128xbf16> to vector<32x32xbf16>
    %41 = vector.extract_strided_slice %23 {offsets = [0, 96], sizes = [32, 32], strides = [1, 1]} : vector<32x128xbf16> to vector<32x32xbf16>
    %42 = vector.shape_cast %38 : vector<32x32xbf16> to vector<1x32x32xbf16>
    %43 = vector.shape_cast %39 : vector<32x32xbf16> to vector<1x32x32xbf16>
    %44 = vector.shape_cast %40 : vector<32x32xbf16> to vector<1x32x32xbf16>
    %45 = vector.shape_cast %41 : vector<32x32xbf16> to vector<1x32x32xbf16>
    %46 = tpu.concatenate %42, %43, %44, %45 in 0 : vector<1x32x32xbf16>, vector<1x32x32xbf16>, vector<1x32x32xbf16>, vector<1x32x32xbf16> -> vector<4x32x32xbf16>
    %47 = vector.shape_cast %46 : vector<4x32x32xbf16> to vector<8x16x32xbf16>
    %48 = vector.extract_strided_slice %27 {offsets = [0, 0], sizes = [32, 32], strides = [1, 1]} : vector<32x128xbf16> to vector<32x32xbf16>
    %49 = vector.extract_strided_slice %27 {offsets = [0, 32], sizes = [32, 32], strides = [1, 1]} : vector<32x128xbf16> to vector<32x32xbf16>
    %50 = vector.extract_strided_slice %27 {offsets = [0, 64], sizes = [32, 32], strides = [1, 1]} : vector<32x128xbf16> to vector<32x32xbf16>
    %51 = vector.extract_strided_slice %27 {offsets = [0, 96], sizes = [32, 32], strides = [1, 1]} : vector<32x128xbf16> to vector<32x32xbf16>
    %52 = vector.shape_cast %48 : vector<32x32xbf16> to vector<1x32x32xbf16>
    %53 = vector.shape_cast %49 : vector<32x32xbf16> to vector<1x32x32xbf16>
    %54 = vector.shape_cast %50 : vector<32x32xbf16> to vector<1x32x32xbf16>
    %55 = vector.shape_cast %51 : vector<32x32xbf16> to vector<1x32x32xbf16>
    %56 = tpu.concatenate %52, %53, %54, %55 in 0 : vector<1x32x32xbf16>, vector<1x32x32xbf16>, vector<1x32x32xbf16>, vector<1x32x32xbf16> -> vector<4x32x32xbf16>
    %57 = vector.shape_cast %56 : vector<4x32x32xbf16> to vector<8x16x32xbf16>
    %cst_17 = arith.constant dense<0.000000e+00> : vector<8x16x16xf32>
    %58 = tpu.matmul %37, %47, %cst_17 {dimension_numbers = #tpu.dot_dimension_numbers<[2], [2], [1], [1], [0, 0, 0, 1, 1, 1], [0], [0]>} : vector<8x16x32xbf16>, vector<8x16x32xbf16>, vector<8x16x16xf32> -> vector<8x16x16xf32>
    %cst_18 = arith.constant 0.176776692 : f32
    %59 = vector.broadcast %cst_18 : f32 to vector<8x16x16xf32>
    %60 = arith.mulf %58, %59 : vector<8x16x16xf32>
    %cst_19 = arith.constant -1.000000e+30 : f32
    %61 = vector.shape_cast %14 : vector<1x16x16xi1> to vector<1x16x16xi1>
    %62 = vector.broadcast %61 : vector<1x16x16xi1> to vector<8x16x16xi1>
    %63 = vector.broadcast %cst_19 : f32 to vector<8x16x16xf32>
    %64 = arith.select %62, %60, %63 : vector<8x16x16xi1>, vector<8x16x16xf32>
    %cst_20 = arith.constant dense<0xFF800000> : vector<8x16xf32>
    %65 = vector.multi_reduction <maximumf>, %64, %cst_20 [2] : vector<8x16x16xf32> to vector<8x16xf32>
    %66 = vector.shape_cast %65 : vector<8x16xf32> to vector<8x16x1xf32>
    %67 = vector.broadcast %66 : vector<8x16x1xf32> to vector<8x16x16xf32>
    %68 = arith.subf %64, %67 : vector<8x16x16xf32>
    %69 = math.exp %68 : vector<8x16x16xf32>
    %cst_21 = arith.constant dense<0.000000e+00> : vector<8x16xf32>
    %70 = vector.multi_reduction <add>, %69, %cst_21 [2] : vector<8x16x16xf32> to vector<8x16xf32>
    %71 = vector.shape_cast %70 : vector<8x16xf32> to vector<8x16x1xf32>
    %72 = vector.broadcast %71 : vector<8x16x1xf32> to vector<8x16x16xf32>
    %73 = arith.divf %69, %72 : vector<8x16x16xf32>
    %74 = arith.truncf %73 : vector<8x16x16xf32> to vector<8x16x16xbf16>
    %cst_22 = arith.constant dense<0.000000e+00> : vector<8x16x32xf32>
    %75 = tpu.matmul %74, %57, %cst_22 {dimension_numbers = #tpu.dot_dimension_numbers<[2], [1], [1], [2], [0, 0, 0, 1, 1, 2], [0], [0]>} : vector<8x16x16xbf16>, vector<8x16x32xbf16>, vector<8x16x32xf32> -> vector<8x16x32xf32>
    %76 = vector.shape_cast %75 : vector<8x16x32xf32> to vector<4x32x32xf32>
    %c0_23 = arith.constant 0 : index
    %c0_24 = arith.constant 0 : index
    %c0_25 = arith.constant 0 : index
    %77 = vector.load %arg7[%c0_23, %c0_24, %c0_25] : memref<2x128x128xbf16, #tpu.memory_space<vmem>>, vector<1x128x128xbf16>
    %78 = vector.shape_cast %77 : vector<1x128x128xbf16> to vector<128x128xbf16>
    %cst_26 = arith.constant 0.000000e+00 : f32
    %79 = vector.broadcast %cst_26 : f32 to vector<32x128xf32>
    %80 = vector.extract_strided_slice %76 {offsets = [0, 0, 0], sizes = [1, 32, 32], strides = [1, 1, 1]} : vector<4x32x32xf32> to vector<1x32x32xf32>
    %81 = vector.shape_cast %80 : vector<1x32x32xf32> to vector<32x32xf32>
    %82 = arith.truncf %81 : vector<32x32xf32> to vector<32x32xbf16>
    %83 = vector.extract_strided_slice %78 {offsets = [0, 0], sizes = [32, 128], strides = [1, 1]} : vector<128x128xbf16> to vector<32x128xbf16>
    %cst_27 = arith.constant dense<0.000000e+00> : vector<32x128xf32>
    %84 = tpu.matmul %82, %83, %cst_27 {dimension_numbers = #tpu.dot_dimension_numbers<[1], [0], [0], [1], [0, 0, 1, 1], [], []>} : vector<32x32xbf16>, vector<32x128xbf16>, vector<32x128xf32> -> vector<32x128xf32>
    %85 = arith.addf %79, %84 : vector<32x128xf32>
    %86 = vector.extract_strided_slice %76 {offsets = [1, 0, 0], sizes = [1, 32, 32], strides = [1, 1, 1]} : vector<4x32x32xf32> to vector<1x32x32xf32>
    %87 = vector.shape_cast %86 : vector<1x32x32xf32> to vector<32x32xf32>
    %88 = arith.truncf %87 : vector<32x32xf32> to vector<32x32xbf16>
    %89 = vector.extract_strided_slice %78 {offsets = [32, 0], sizes = [32, 128], strides = [1, 1]} : vector<128x128xbf16> to vector<32x128xbf16>
    %cst_28 = arith.constant dense<0.000000e+00> : vector<32x128xf32>
    %90 = tpu.matmul %88, %89, %cst_28 {dimension_numbers = #tpu.dot_dimension_numbers<[1], [0], [0], [1], [0, 0, 1, 1], [], []>} : vector<32x32xbf16>, vector<32x128xbf16>, vector<32x128xf32> -> vector<32x128xf32>
    %91 = arith.addf %85, %90 : vector<32x128xf32>
    %92 = vector.extract_strided_slice %76 {offsets = [2, 0, 0], sizes = [1, 32, 32], strides = [1, 1, 1]} : vector<4x32x32xf32> to vector<1x32x32xf32>
    %93 = vector.shape_cast %92 : vector<1x32x32xf32> to vector<32x32xf32>
    %94 = arith.truncf %93 : vector<32x32xf32> to vector<32x32xbf16>
    %95 = vector.extract_strided_slice %78 {offsets = [64, 0], sizes = [32, 128], strides = [1, 1]} : vector<128x128xbf16> to vector<32x128xbf16>
    %cst_29 = arith.constant dense<0.000000e+00> : vector<32x128xf32>
    %96 = tpu.matmul %94, %95, %cst_29 {dimension_numbers = #tpu.dot_dimension_numbers<[1], [0], [0], [1], [0, 0, 1, 1], [], []>} : vector<32x32xbf16>, vector<32x128xbf16>, vector<32x128xf32> -> vector<32x128xf32>
    %97 = arith.addf %91, %96 : vector<32x128xf32>
    %98 = vector.extract_strided_slice %76 {offsets = [3, 0, 0], sizes = [1, 32, 32], strides = [1, 1, 1]} : vector<4x32x32xf32> to vector<1x32x32xf32>
    %99 = vector.shape_cast %98 : vector<1x32x32xf32> to vector<32x32xf32>
    %100 = arith.truncf %99 : vector<32x32xf32> to vector<32x32xbf16>
    %101 = vector.extract_strided_slice %78 {offsets = [96, 0], sizes = [32, 128], strides = [1, 1]} : vector<128x128xbf16> to vector<32x128xbf16>
    %cst_30 = arith.constant dense<0.000000e+00> : vector<32x128xf32>
    %102 = tpu.matmul %100, %101, %cst_30 {dimension_numbers = #tpu.dot_dimension_numbers<[1], [0], [0], [1], [0, 0, 1, 1], [], []>} : vector<32x32xbf16>, vector<32x128xbf16>, vector<32x128xf32> -> vector<32x128xf32>
    %103 = arith.addf %97, %102 : vector<32x128xf32>
    %c0_31 = arith.constant 0 : index
    %c0_32 = arith.constant 0 : index
    %c0_33 = arith.constant 0 : index
    %104 = vector.load %arg8[%c0_31, %c0_32, %c0_33] : memref<2x1x128xf32, #tpu.memory_space<vmem>>, vector<1x1x128xf32>
    %105 = vector.shape_cast %104 : vector<1x1x128xf32> to vector<1x128xf32>
    %106 = vector.broadcast %105 : vector<1x128xf32> to vector<32x128xf32>
    %107 = arith.addf %103, %106 : vector<32x128xf32>
    %c0_34 = arith.constant 0 : index
    %c0_35 = arith.constant 0 : index
    %c0_36 = arith.constant 0 : index
    %108 = vector.load %arg9[%c0_34, %c0_35, %c0_36] : memref<2x1x128xf32, #tpu.memory_space<vmem>>, vector<1x1x128xf32>
    %109 = vector.shape_cast %108 : vector<1x1x128xf32> to vector<1x128xf32>
    %c0_37 = arith.constant 0 : index
    %c0_38 = arith.constant 0 : index
    %c0_39 = arith.constant 0 : index
    %110 = vector.load %arg10[%c0_37, %c0_38, %c0_39] : memref<2x1x128xf32, #tpu.memory_space<vmem>>, vector<1x1x128xf32>
    %111 = vector.shape_cast %110 : vector<1x1x128xf32> to vector<1x128xf32>
    %cst_40 = arith.constant dense<0.000000e+00> : vector<32xf32>
    %112 = vector.multi_reduction <add>, %107, %cst_40 [1] : vector<32x128xf32> to vector<32xf32>
    %113 = vector.shape_cast %112 : vector<32xf32> to vector<32x1xf32>
    %cst_41 = arith.constant 1.280000e+02 : f32
    %114 = vector.broadcast %cst_41 : f32 to vector<32x1xf32>
    %115 = arith.divf %113, %114 : vector<32x1xf32>
    %116 = vector.broadcast %115 : vector<32x1xf32> to vector<32x128xf32>
    %117 = arith.subf %107, %116 : vector<32x128xf32>
    %118 = arith.mulf %117, %117 : vector<32x128xf32>
    %cst_42 = arith.constant dense<0.000000e+00> : vector<32xf32>
    %119 = vector.multi_reduction <add>, %118, %cst_42 [1] : vector<32x128xf32> to vector<32xf32>
    %120 = vector.shape_cast %119 : vector<32xf32> to vector<32x1xf32>
    %cst_43 = arith.constant 1.280000e+02 : f32
    %121 = vector.broadcast %cst_43 : f32 to vector<32x1xf32>
    %122 = arith.divf %120, %121 : vector<32x1xf32>
    %123 = vector.broadcast %115 : vector<32x1xf32> to vector<32x128xf32>
    %124 = arith.subf %107, %123 : vector<32x128xf32>
    %cst_44 = arith.constant 9.99999974E-6 : f32
    %125 = vector.broadcast %cst_44 : f32 to vector<32x1xf32>
    %126 = arith.addf %122, %125 : vector<32x1xf32>
    %127 = math.rsqrt %126 : vector<32x1xf32>
    %128 = vector.broadcast %127 : vector<32x1xf32> to vector<32x128xf32>
    %129 = arith.mulf %124, %128 : vector<32x128xf32>
    %130 = vector.broadcast %109 : vector<1x128xf32> to vector<32x128xf32>
    %131 = arith.mulf %129, %130 : vector<32x128xf32>
    %132 = vector.broadcast %111 : vector<1x128xf32> to vector<32x128xf32>
    %133 = arith.addf %131, %132 : vector<32x128xf32>
    %134 = arith.addf %133, %10 : vector<32x128xf32>
    %cst_45 = arith.constant 0.000000e+00 : f32
    %135 = vector.broadcast %cst_45 : f32 to vector<32x128xf32>
    %136 = arith.maximumf %134, %135 : vector<32x128xf32>
    %137 = arith.truncf %136 : vector<32x128xf32> to vector<32x128xbf16>
    %c0_46 = arith.constant 0 : index
    %c0_47 = arith.constant 0 : index
    %c0_48 = arith.constant 0 : index
    %138 = vector.load %arg11[%c0_46, %c0_47, %c0_48] : memref<2x128x256xbf16, #tpu.memory_space<vmem>>, vector<1x128x256xbf16>
    %139 = vector.shape_cast %138 : vector<1x128x256xbf16> to vector<128x256xbf16>
    %cst_49 = arith.constant dense<0.000000e+00> : vector<32x256xf32>
    %140 = tpu.matmul %137, %139, %cst_49 {dimension_numbers = #tpu.dot_dimension_numbers<[1], [0], [0], [1], [0, 0, 1, 1], [], []>} : vector<32x128xbf16>, vector<128x256xbf16>, vector<32x256xf32> -> vector<32x256xf32>
    %c0_50 = arith.constant 0 : index
    %c0_51 = arith.constant 0 : index
    %c0_52 = arith.constant 0 : index
    %141 = vector.load %arg12[%c0_50, %c0_51, %c0_52] : memref<2x1x256xf32, #tpu.memory_space<vmem>>, vector<1x1x256xf32>
    %142 = vector.shape_cast %141 : vector<1x1x256xf32> to vector<1x256xf32>
    %143 = vector.broadcast %142 : vector<1x256xf32> to vector<32x256xf32>
    %144 = arith.addf %140, %143 : vector<32x256xf32>
    %cst_53 = arith.constant 0.000000e+00 : f32
    %145 = vector.broadcast %cst_53 : f32 to vector<32x256xf32>
    %146 = arith.maximumf %144, %145 : vector<32x256xf32>
    %147 = arith.truncf %146 : vector<32x256xf32> to vector<32x256xbf16>
    %c0_54 = arith.constant 0 : index
    %c0_55 = arith.constant 0 : index
    %c0_56 = arith.constant 0 : index
    %148 = vector.load %arg13[%c0_54, %c0_55, %c0_56] : memref<2x256x128xbf16, #tpu.memory_space<vmem>>, vector<1x256x128xbf16>
    %149 = vector.shape_cast %148 : vector<1x256x128xbf16> to vector<256x128xbf16>
    %cst_57 = arith.constant dense<0.000000e+00> : vector<32x128xf32>
    %150 = tpu.matmul %147, %149, %cst_57 {dimension_numbers = #tpu.dot_dimension_numbers<[1], [0], [0], [1], [0, 0, 1, 1], [], []>} : vector<32x256xbf16>, vector<256x128xbf16>, vector<32x128xf32> -> vector<32x128xf32>
    %c0_58 = arith.constant 0 : index
    %c0_59 = arith.constant 0 : index
    %c0_60 = arith.constant 0 : index
    %151 = vector.load %arg14[%c0_58, %c0_59, %c0_60] : memref<2x1x128xf32, #tpu.memory_space<vmem>>, vector<1x1x128xf32>
    %152 = vector.shape_cast %151 : vector<1x1x128xf32> to vector<1x128xf32>
    %153 = vector.broadcast %152 : vector<1x128xf32> to vector<32x128xf32>
    %154 = arith.addf %150, %153 : vector<32x128xf32>
    %c0_61 = arith.constant 0 : index
    %c0_62 = arith.constant 0 : index
    %c0_63 = arith.constant 0 : index
    %155 = vector.load %arg15[%c0_61, %c0_62, %c0_63] : memref<2x1x128xf32, #tpu.memory_space<vmem>>, vector<1x1x128xf32>
    %156 = vector.shape_cast %155 : vector<1x1x128xf32> to vector<1x128xf32>
    %c0_64 = arith.constant 0 : index
    %c0_65 = arith.constant 0 : index
    %c0_66 = arith.constant 0 : index
    %157 = vector.load %arg16[%c0_64, %c0_65, %c0_66] : memref<2x1x128xf32, #tpu.memory_space<vmem>>, vector<1x1x128xf32>
    %158 = vector.shape_cast %157 : vector<1x1x128xf32> to vector<1x128xf32>
    %cst_67 = arith.constant dense<0.000000e+00> : vector<32xf32>
    %159 = vector.multi_reduction <add>, %154, %cst_67 [1] : vector<32x128xf32> to vector<32xf32>
    %160 = vector.shape_cast %159 : vector<32xf32> to vector<32x1xf32>
    %cst_68 = arith.constant 1.280000e+02 : f32
    %161 = vector.broadcast %cst_68 : f32 to vector<32x1xf32>
    %162 = arith.divf %160, %161 : vector<32x1xf32>
    %163 = vector.broadcast %162 : vector<32x1xf32> to vector<32x128xf32>
    %164 = arith.subf %154, %163 : vector<32x128xf32>
    %165 = arith.mulf %164, %164 : vector<32x128xf32>
    %cst_69 = arith.constant dense<0.000000e+00> : vector<32xf32>
    %166 = vector.multi_reduction <add>, %165, %cst_69 [1] : vector<32x128xf32> to vector<32xf32>
    %167 = vector.shape_cast %166 : vector<32xf32> to vector<32x1xf32>
    %cst_70 = arith.constant 1.280000e+02 : f32
    %168 = vector.broadcast %cst_70 : f32 to vector<32x1xf32>
    %169 = arith.divf %167, %168 : vector<32x1xf32>
    %170 = vector.broadcast %162 : vector<32x1xf32> to vector<32x128xf32>
    %171 = arith.subf %154, %170 : vector<32x128xf32>
    %cst_71 = arith.constant 9.99999974E-6 : f32
    %172 = vector.broadcast %cst_71 : f32 to vector<32x1xf32>
    %173 = arith.addf %169, %172 : vector<32x1xf32>
    %174 = math.rsqrt %173 : vector<32x1xf32>
    %175 = vector.broadcast %174 : vector<32x1xf32> to vector<32x128xf32>
    %176 = arith.mulf %171, %175 : vector<32x128xf32>
    %177 = vector.broadcast %156 : vector<1x128xf32> to vector<32x128xf32>
    %178 = arith.mulf %176, %177 : vector<32x128xf32>
    %179 = vector.broadcast %158 : vector<1x128xf32> to vector<32x128xf32>
    %180 = arith.addf %178, %179 : vector<32x128xf32>
    %181 = arith.addf %180, %136 : vector<32x128xf32>
    %cst_72 = arith.constant 0.000000e+00 : f32
    %182 = vector.broadcast %cst_72 : f32 to vector<32x128xf32>
    %183 = arith.maximumf %181, %182 : vector<32x128xf32>
    %184 = arith.truncf %183 : vector<32x128xf32> to vector<32x128xbf16>
    %c1 = arith.constant 1 : index
    %c0_73 = arith.constant 0 : index
    %c0_74 = arith.constant 0 : index
    %185 = vector.load %arg4[%c1, %c0_73, %c0_74] : memref<2x128x128xbf16, #tpu.memory_space<vmem>>, vector<1x128x128xbf16>
    %186 = vector.shape_cast %185 : vector<1x128x128xbf16> to vector<128x128xbf16>
    %cst_75 = arith.constant dense<0.000000e+00> : vector<32x128xf32>
    %187 = tpu.matmul %184, %186, %cst_75 {dimension_numbers = #tpu.dot_dimension_numbers<[1], [0], [0], [1], [0, 0, 1, 1], [], []>} : vector<32x128xbf16>, vector<128x128xbf16>, vector<32x128xf32> -> vector<32x128xf32>
    %188 = arith.truncf %187 : vector<32x128xf32> to vector<32x128xbf16>
    %c1_76 = arith.constant 1 : index
    %c0_77 = arith.constant 0 : index
    %c0_78 = arith.constant 0 : index
    %189 = vector.load %arg5[%c1_76, %c0_77, %c0_78] : memref<2x128x128xbf16, #tpu.memory_space<vmem>>, vector<1x128x128xbf16>
    %190 = vector.shape_cast %189 : vector<1x128x128xbf16> to vector<128x128xbf16>
    %cst_79 = arith.constant dense<0.000000e+00> : vector<32x128xf32>
    %191 = tpu.matmul %184, %190, %cst_79 {dimension_numbers = #tpu.dot_dimension_numbers<[1], [0], [0], [1], [0, 0, 1, 1], [], []>} : vector<32x128xbf16>, vector<128x128xbf16>, vector<32x128xf32> -> vector<32x128xf32>
    %192 = arith.truncf %191 : vector<32x128xf32> to vector<32x128xbf16>
    %c1_80 = arith.constant 1 : index
    %c0_81 = arith.constant 0 : index
    %c0_82 = arith.constant 0 : index
    %193 = vector.load %arg6[%c1_80, %c0_81, %c0_82] : memref<2x128x128xbf16, #tpu.memory_space<vmem>>, vector<1x128x128xbf16>
    %194 = vector.shape_cast %193 : vector<1x128x128xbf16> to vector<128x128xbf16>
    %cst_83 = arith.constant dense<0.000000e+00> : vector<32x128xf32>
    %195 = tpu.matmul %184, %194, %cst_83 {dimension_numbers = #tpu.dot_dimension_numbers<[1], [0], [0], [1], [0, 0, 1, 1], [], []>} : vector<32x128xbf16>, vector<128x128xbf16>, vector<32x128xf32> -> vector<32x128xf32>
    %196 = arith.truncf %195 : vector<32x128xf32> to vector<32x128xbf16>
    %197 = vector.extract_strided_slice %188 {offsets = [0, 0], sizes = [32, 32], strides = [1, 1]} : vector<32x128xbf16> to vector<32x32xbf16>
    %198 = vector.extract_strided_slice %188 {offsets = [0, 32], sizes = [32, 32], strides = [1, 1]} : vector<32x128xbf16> to vector<32x32xbf16>
    %199 = vector.extract_strided_slice %188 {offsets = [0, 64], sizes = [32, 32], strides = [1, 1]} : vector<32x128xbf16> to vector<32x32xbf16>
    %200 = vector.extract_strided_slice %188 {offsets = [0, 96], sizes = [32, 32], strides = [1, 1]} : vector<32x128xbf16> to vector<32x32xbf16>
    %201 = vector.shape_cast %197 : vector<32x32xbf16> to vector<1x32x32xbf16>
    %202 = vector.shape_cast %198 : vector<32x32xbf16> to vector<1x32x32xbf16>
    %203 = vector.shape_cast %199 : vector<32x32xbf16> to vector<1x32x32xbf16>
    %204 = vector.shape_cast %200 : vector<32x32xbf16> to vector<1x32x32xbf16>
    %205 = tpu.concatenate %201, %202, %203, %204 in 0 : vector<1x32x32xbf16>, vector<1x32x32xbf16>, vector<1x32x32xbf16>, vector<1x32x32xbf16> -> vector<4x32x32xbf16>
    %206 = vector.shape_cast %205 : vector<4x32x32xbf16> to vector<8x16x32xbf16>
    %207 = vector.extract_strided_slice %192 {offsets = [0, 0], sizes = [32, 32], strides = [1, 1]} : vector<32x128xbf16> to vector<32x32xbf16>
    %208 = vector.extract_strided_slice %192 {offsets = [0, 32], sizes = [32, 32], strides = [1, 1]} : vector<32x128xbf16> to vector<32x32xbf16>
    %209 = vector.extract_strided_slice %192 {offsets = [0, 64], sizes = [32, 32], strides = [1, 1]} : vector<32x128xbf16> to vector<32x32xbf16>
    %210 = vector.extract_strided_slice %192 {offsets = [0, 96], sizes = [32, 32], strides = [1, 1]} : vector<32x128xbf16> to vector<32x32xbf16>
    %211 = vector.shape_cast %207 : vector<32x32xbf16> to vector<1x32x32xbf16>
    %212 = vector.shape_cast %208 : vector<32x32xbf16> to vector<1x32x32xbf16>
    %213 = vector.shape_cast %209 : vector<32x32xbf16> to vector<1x32x32xbf16>
    %214 = vector.shape_cast %210 : vector<32x32xbf16> to vector<1x32x32xbf16>
    %215 = tpu.concatenate %211, %212, %213, %214 in 0 : vector<1x32x32xbf16>, vector<1x32x32xbf16>, vector<1x32x32xbf16>, vector<1x32x32xbf16> -> vector<4x32x32xbf16>
    %216 = vector.shape_cast %215 : vector<4x32x32xbf16> to vector<8x16x32xbf16>
    %217 = vector.extract_strided_slice %196 {offsets = [0, 0], sizes = [32, 32], strides = [1, 1]} : vector<32x128xbf16> to vector<32x32xbf16>
    %218 = vector.extract_strided_slice %196 {offsets = [0, 32], sizes = [32, 32], strides = [1, 1]} : vector<32x128xbf16> to vector<32x32xbf16>
    %219 = vector.extract_strided_slice %196 {offsets = [0, 64], sizes = [32, 32], strides = [1, 1]} : vector<32x128xbf16> to vector<32x32xbf16>
    %220 = vector.extract_strided_slice %196 {offsets = [0, 96], sizes = [32, 32], strides = [1, 1]} : vector<32x128xbf16> to vector<32x32xbf16>
    %221 = vector.shape_cast %217 : vector<32x32xbf16> to vector<1x32x32xbf16>
    %222 = vector.shape_cast %218 : vector<32x32xbf16> to vector<1x32x32xbf16>
    %223 = vector.shape_cast %219 : vector<32x32xbf16> to vector<1x32x32xbf16>
    %224 = vector.shape_cast %220 : vector<32x32xbf16> to vector<1x32x32xbf16>
    %225 = tpu.concatenate %221, %222, %223, %224 in 0 : vector<1x32x32xbf16>, vector<1x32x32xbf16>, vector<1x32x32xbf16>, vector<1x32x32xbf16> -> vector<4x32x32xbf16>
    %226 = vector.shape_cast %225 : vector<4x32x32xbf16> to vector<8x16x32xbf16>
    %cst_84 = arith.constant dense<0.000000e+00> : vector<8x16x16xf32>
    %227 = tpu.matmul %206, %216, %cst_84 {dimension_numbers = #tpu.dot_dimension_numbers<[2], [2], [1], [1], [0, 0, 0, 1, 1, 1], [0], [0]>} : vector<8x16x32xbf16>, vector<8x16x32xbf16>, vector<8x16x16xf32> -> vector<8x16x16xf32>
    %cst_85 = arith.constant 0.176776692 : f32
    %228 = vector.broadcast %cst_85 : f32 to vector<8x16x16xf32>
    %229 = arith.mulf %227, %228 : vector<8x16x16xf32>
    %cst_86 = arith.constant -1.000000e+30 : f32
    %230 = vector.shape_cast %14 : vector<1x16x16xi1> to vector<1x16x16xi1>
    %231 = vector.broadcast %230 : vector<1x16x16xi1> to vector<8x16x16xi1>
    %232 = vector.broadcast %cst_86 : f32 to vector<8x16x16xf32>
    %233 = arith.select %231, %229, %232 : vector<8x16x16xi1>, vector<8x16x16xf32>
    %cst_87 = arith.constant dense<0xFF800000> : vector<8x16xf32>
    %234 = vector.multi_reduction <maximumf>, %233, %cst_87 [2] : vector<8x16x16xf32> to vector<8x16xf32>
    %235 = vector.shape_cast %234 : vector<8x16xf32> to vector<8x16x1xf32>
    %236 = vector.broadcast %235 : vector<8x16x1xf32> to vector<8x16x16xf32>
    %237 = arith.subf %233, %236 : vector<8x16x16xf32>
    %238 = math.exp %237 : vector<8x16x16xf32>
    %cst_88 = arith.constant dense<0.000000e+00> : vector<8x16xf32>
    %239 = vector.multi_reduction <add>, %238, %cst_88 [2] : vector<8x16x16xf32> to vector<8x16xf32>
    %240 = vector.shape_cast %239 : vector<8x16xf32> to vector<8x16x1xf32>
    %241 = vector.broadcast %240 : vector<8x16x1xf32> to vector<8x16x16xf32>
    %242 = arith.divf %238, %241 : vector<8x16x16xf32>
    %243 = arith.truncf %242 : vector<8x16x16xf32> to vector<8x16x16xbf16>
    %cst_89 = arith.constant dense<0.000000e+00> : vector<8x16x32xf32>
    %244 = tpu.matmul %243, %226, %cst_89 {dimension_numbers = #tpu.dot_dimension_numbers<[2], [1], [1], [2], [0, 0, 0, 1, 1, 2], [0], [0]>} : vector<8x16x16xbf16>, vector<8x16x32xbf16>, vector<8x16x32xf32> -> vector<8x16x32xf32>
    %245 = vector.shape_cast %244 : vector<8x16x32xf32> to vector<4x32x32xf32>
    %c1_90 = arith.constant 1 : index
    %c0_91 = arith.constant 0 : index
    %c0_92 = arith.constant 0 : index
    %246 = vector.load %arg7[%c1_90, %c0_91, %c0_92] : memref<2x128x128xbf16, #tpu.memory_space<vmem>>, vector<1x128x128xbf16>
    %247 = vector.shape_cast %246 : vector<1x128x128xbf16> to vector<128x128xbf16>
    %cst_93 = arith.constant 0.000000e+00 : f32
    %248 = vector.broadcast %cst_93 : f32 to vector<32x128xf32>
    %249 = vector.extract_strided_slice %245 {offsets = [0, 0, 0], sizes = [1, 32, 32], strides = [1, 1, 1]} : vector<4x32x32xf32> to vector<1x32x32xf32>
    %250 = vector.shape_cast %249 : vector<1x32x32xf32> to vector<32x32xf32>
    %251 = arith.truncf %250 : vector<32x32xf32> to vector<32x32xbf16>
    %252 = vector.extract_strided_slice %247 {offsets = [0, 0], sizes = [32, 128], strides = [1, 1]} : vector<128x128xbf16> to vector<32x128xbf16>
    %cst_94 = arith.constant dense<0.000000e+00> : vector<32x128xf32>
    %253 = tpu.matmul %251, %252, %cst_94 {dimension_numbers = #tpu.dot_dimension_numbers<[1], [0], [0], [1], [0, 0, 1, 1], [], []>} : vector<32x32xbf16>, vector<32x128xbf16>, vector<32x128xf32> -> vector<32x128xf32>
    %254 = arith.addf %248, %253 : vector<32x128xf32>
    %255 = vector.extract_strided_slice %245 {offsets = [1, 0, 0], sizes = [1, 32, 32], strides = [1, 1, 1]} : vector<4x32x32xf32> to vector<1x32x32xf32>
    %256 = vector.shape_cast %255 : vector<1x32x32xf32> to vector<32x32xf32>
    %257 = arith.truncf %256 : vector<32x32xf32> to vector<32x32xbf16>
    %258 = vector.extract_strided_slice %247 {offsets = [32, 0], sizes = [32, 128], strides = [1, 1]} : vector<128x128xbf16> to vector<32x128xbf16>
    %cst_95 = arith.constant dense<0.000000e+00> : vector<32x128xf32>
    %259 = tpu.matmul %257, %258, %cst_95 {dimension_numbers = #tpu.dot_dimension_numbers<[1], [0], [0], [1], [0, 0, 1, 1], [], []>} : vector<32x32xbf16>, vector<32x128xbf16>, vector<32x128xf32> -> vector<32x128xf32>
    %260 = arith.addf %254, %259 : vector<32x128xf32>
    %261 = vector.extract_strided_slice %245 {offsets = [2, 0, 0], sizes = [1, 32, 32], strides = [1, 1, 1]} : vector<4x32x32xf32> to vector<1x32x32xf32>
    %262 = vector.shape_cast %261 : vector<1x32x32xf32> to vector<32x32xf32>
    %263 = arith.truncf %262 : vector<32x32xf32> to vector<32x32xbf16>
    %264 = vector.extract_strided_slice %247 {offsets = [64, 0], sizes = [32, 128], strides = [1, 1]} : vector<128x128xbf16> to vector<32x128xbf16>
    %cst_96 = arith.constant dense<0.000000e+00> : vector<32x128xf32>
    %265 = tpu.matmul %263, %264, %cst_96 {dimension_numbers = #tpu.dot_dimension_numbers<[1], [0], [0], [1], [0, 0, 1, 1], [], []>} : vector<32x32xbf16>, vector<32x128xbf16>, vector<32x128xf32> -> vector<32x128xf32>
    %266 = arith.addf %260, %265 : vector<32x128xf32>
    %267 = vector.extract_strided_slice %245 {offsets = [3, 0, 0], sizes = [1, 32, 32], strides = [1, 1, 1]} : vector<4x32x32xf32> to vector<1x32x32xf32>
    %268 = vector.shape_cast %267 : vector<1x32x32xf32> to vector<32x32xf32>
    %269 = arith.truncf %268 : vector<32x32xf32> to vector<32x32xbf16>
    %270 = vector.extract_strided_slice %247 {offsets = [96, 0], sizes = [32, 128], strides = [1, 1]} : vector<128x128xbf16> to vector<32x128xbf16>
    %cst_97 = arith.constant dense<0.000000e+00> : vector<32x128xf32>
    %271 = tpu.matmul %269, %270, %cst_97 {dimension_numbers = #tpu.dot_dimension_numbers<[1], [0], [0], [1], [0, 0, 1, 1], [], []>} : vector<32x32xbf16>, vector<32x128xbf16>, vector<32x128xf32> -> vector<32x128xf32>
    %272 = arith.addf %266, %271 : vector<32x128xf32>
    %c1_98 = arith.constant 1 : index
    %c0_99 = arith.constant 0 : index
    %c0_100 = arith.constant 0 : index
    %273 = vector.load %arg8[%c1_98, %c0_99, %c0_100] : memref<2x1x128xf32, #tpu.memory_space<vmem>>, vector<1x1x128xf32>
    %274 = vector.shape_cast %273 : vector<1x1x128xf32> to vector<1x128xf32>
    %275 = vector.broadcast %274 : vector<1x128xf32> to vector<32x128xf32>
    %276 = arith.addf %272, %275 : vector<32x128xf32>
    %c1_101 = arith.constant 1 : index
    %c0_102 = arith.constant 0 : index
    %c0_103 = arith.constant 0 : index
    %277 = vector.load %arg9[%c1_101, %c0_102, %c0_103] : memref<2x1x128xf32, #tpu.memory_space<vmem>>, vector<1x1x128xf32>
    %278 = vector.shape_cast %277 : vector<1x1x128xf32> to vector<1x128xf32>
    %c1_104 = arith.constant 1 : index
    %c0_105 = arith.constant 0 : index
    %c0_106 = arith.constant 0 : index
    %279 = vector.load %arg10[%c1_104, %c0_105, %c0_106] : memref<2x1x128xf32, #tpu.memory_space<vmem>>, vector<1x1x128xf32>
    %280 = vector.shape_cast %279 : vector<1x1x128xf32> to vector<1x128xf32>
    %cst_107 = arith.constant dense<0.000000e+00> : vector<32xf32>
    %281 = vector.multi_reduction <add>, %276, %cst_107 [1] : vector<32x128xf32> to vector<32xf32>
    %282 = vector.shape_cast %281 : vector<32xf32> to vector<32x1xf32>
    %cst_108 = arith.constant 1.280000e+02 : f32
    %283 = vector.broadcast %cst_108 : f32 to vector<32x1xf32>
    %284 = arith.divf %282, %283 : vector<32x1xf32>
    %285 = vector.broadcast %284 : vector<32x1xf32> to vector<32x128xf32>
    %286 = arith.subf %276, %285 : vector<32x128xf32>
    %287 = arith.mulf %286, %286 : vector<32x128xf32>
    %cst_109 = arith.constant dense<0.000000e+00> : vector<32xf32>
    %288 = vector.multi_reduction <add>, %287, %cst_109 [1] : vector<32x128xf32> to vector<32xf32>
    %289 = vector.shape_cast %288 : vector<32xf32> to vector<32x1xf32>
    %cst_110 = arith.constant 1.280000e+02 : f32
    %290 = vector.broadcast %cst_110 : f32 to vector<32x1xf32>
    %291 = arith.divf %289, %290 : vector<32x1xf32>
    %292 = vector.broadcast %284 : vector<32x1xf32> to vector<32x128xf32>
    %293 = arith.subf %276, %292 : vector<32x128xf32>
    %cst_111 = arith.constant 9.99999974E-6 : f32
    %294 = vector.broadcast %cst_111 : f32 to vector<32x1xf32>
    %295 = arith.addf %291, %294 : vector<32x1xf32>
    %296 = math.rsqrt %295 : vector<32x1xf32>
    %297 = vector.broadcast %296 : vector<32x1xf32> to vector<32x128xf32>
    %298 = arith.mulf %293, %297 : vector<32x128xf32>
    %299 = vector.broadcast %278 : vector<1x128xf32> to vector<32x128xf32>
    %300 = arith.mulf %298, %299 : vector<32x128xf32>
    %301 = vector.broadcast %280 : vector<1x128xf32> to vector<32x128xf32>
    %302 = arith.addf %300, %301 : vector<32x128xf32>
    %303 = arith.addf %302, %183 : vector<32x128xf32>
    %cst_112 = arith.constant 0.000000e+00 : f32
    %304 = vector.broadcast %cst_112 : f32 to vector<32x128xf32>
    %305 = arith.maximumf %303, %304 : vector<32x128xf32>
    %306 = arith.truncf %305 : vector<32x128xf32> to vector<32x128xbf16>
    %c1_113 = arith.constant 1 : index
    %c0_114 = arith.constant 0 : index
    %c0_115 = arith.constant 0 : index
    %307 = vector.load %arg11[%c1_113, %c0_114, %c0_115] : memref<2x128x256xbf16, #tpu.memory_space<vmem>>, vector<1x128x256xbf16>
    %308 = vector.shape_cast %307 : vector<1x128x256xbf16> to vector<128x256xbf16>
    %cst_116 = arith.constant dense<0.000000e+00> : vector<32x256xf32>
    %309 = tpu.matmul %306, %308, %cst_116 {dimension_numbers = #tpu.dot_dimension_numbers<[1], [0], [0], [1], [0, 0, 1, 1], [], []>} : vector<32x128xbf16>, vector<128x256xbf16>, vector<32x256xf32> -> vector<32x256xf32>
    %c1_117 = arith.constant 1 : index
    %c0_118 = arith.constant 0 : index
    %c0_119 = arith.constant 0 : index
    %310 = vector.load %arg12[%c1_117, %c0_118, %c0_119] : memref<2x1x256xf32, #tpu.memory_space<vmem>>, vector<1x1x256xf32>
    %311 = vector.shape_cast %310 : vector<1x1x256xf32> to vector<1x256xf32>
    %312 = vector.broadcast %311 : vector<1x256xf32> to vector<32x256xf32>
    %313 = arith.addf %309, %312 : vector<32x256xf32>
    %cst_120 = arith.constant 0.000000e+00 : f32
    %314 = vector.broadcast %cst_120 : f32 to vector<32x256xf32>
    %315 = arith.maximumf %313, %314 : vector<32x256xf32>
    %316 = arith.truncf %315 : vector<32x256xf32> to vector<32x256xbf16>
    %c1_121 = arith.constant 1 : index
    %c0_122 = arith.constant 0 : index
    %c0_123 = arith.constant 0 : index
    %317 = vector.load %arg13[%c1_121, %c0_122, %c0_123] : memref<2x256x128xbf16, #tpu.memory_space<vmem>>, vector<1x256x128xbf16>
    %318 = vector.shape_cast %317 : vector<1x256x128xbf16> to vector<256x128xbf16>
    %cst_124 = arith.constant dense<0.000000e+00> : vector<32x128xf32>
    %319 = tpu.matmul %316, %318, %cst_124 {dimension_numbers = #tpu.dot_dimension_numbers<[1], [0], [0], [1], [0, 0, 1, 1], [], []>} : vector<32x256xbf16>, vector<256x128xbf16>, vector<32x128xf32> -> vector<32x128xf32>
    %c1_125 = arith.constant 1 : index
    %c0_126 = arith.constant 0 : index
    %c0_127 = arith.constant 0 : index
    %320 = vector.load %arg14[%c1_125, %c0_126, %c0_127] : memref<2x1x128xf32, #tpu.memory_space<vmem>>, vector<1x1x128xf32>
    %321 = vector.shape_cast %320 : vector<1x1x128xf32> to vector<1x128xf32>
    %322 = vector.broadcast %321 : vector<1x128xf32> to vector<32x128xf32>
    %323 = arith.addf %319, %322 : vector<32x128xf32>
    %c1_128 = arith.constant 1 : index
    %c0_129 = arith.constant 0 : index
    %c0_130 = arith.constant 0 : index
    %324 = vector.load %arg15[%c1_128, %c0_129, %c0_130] : memref<2x1x128xf32, #tpu.memory_space<vmem>>, vector<1x1x128xf32>
    %325 = vector.shape_cast %324 : vector<1x1x128xf32> to vector<1x128xf32>
    %c1_131 = arith.constant 1 : index
    %c0_132 = arith.constant 0 : index
    %c0_133 = arith.constant 0 : index
    %326 = vector.load %arg16[%c1_131, %c0_132, %c0_133] : memref<2x1x128xf32, #tpu.memory_space<vmem>>, vector<1x1x128xf32>
    %327 = vector.shape_cast %326 : vector<1x1x128xf32> to vector<1x128xf32>
    %cst_134 = arith.constant dense<0.000000e+00> : vector<32xf32>
    %328 = vector.multi_reduction <add>, %323, %cst_134 [1] : vector<32x128xf32> to vector<32xf32>
    %329 = vector.shape_cast %328 : vector<32xf32> to vector<32x1xf32>
    %cst_135 = arith.constant 1.280000e+02 : f32
    %330 = vector.broadcast %cst_135 : f32 to vector<32x1xf32>
    %331 = arith.divf %329, %330 : vector<32x1xf32>
    %332 = vector.broadcast %331 : vector<32x1xf32> to vector<32x128xf32>
    %333 = arith.subf %323, %332 : vector<32x128xf32>
    %334 = arith.mulf %333, %333 : vector<32x128xf32>
    %cst_136 = arith.constant dense<0.000000e+00> : vector<32xf32>
    %335 = vector.multi_reduction <add>, %334, %cst_136 [1] : vector<32x128xf32> to vector<32xf32>
    %336 = vector.shape_cast %335 : vector<32xf32> to vector<32x1xf32>
    %cst_137 = arith.constant 1.280000e+02 : f32
    %337 = vector.broadcast %cst_137 : f32 to vector<32x1xf32>
    %338 = arith.divf %336, %337 : vector<32x1xf32>
    %339 = vector.broadcast %331 : vector<32x1xf32> to vector<32x128xf32>
    %340 = arith.subf %323, %339 : vector<32x128xf32>
    %cst_138 = arith.constant 9.99999974E-6 : f32
    %341 = vector.broadcast %cst_138 : f32 to vector<32x1xf32>
    %342 = arith.addf %338, %341 : vector<32x1xf32>
    %343 = math.rsqrt %342 : vector<32x1xf32>
    %344 = vector.broadcast %343 : vector<32x1xf32> to vector<32x128xf32>
    %345 = arith.mulf %340, %344 : vector<32x128xf32>
    %346 = vector.broadcast %325 : vector<1x128xf32> to vector<32x128xf32>
    %347 = arith.mulf %345, %346 : vector<32x128xf32>
    %348 = vector.broadcast %327 : vector<1x128xf32> to vector<32x128xf32>
    %349 = arith.addf %347, %348 : vector<32x128xf32>
    %350 = arith.addf %349, %305 : vector<32x128xf32>
    %cst_139 = arith.constant 0.000000e+00 : f32
    %351 = vector.broadcast %cst_139 : f32 to vector<32x128xf32>
    %352 = arith.maximumf %350, %351 : vector<32x128xf32>
    %cst_140 = arith.constant 0.000000e+00 : f32
    %353 = vector.broadcast %cst_140 : f32 to vector<32x128xf32>
    %354 = arith.maximumf %352, %353 : vector<32x128xf32>
    %355 = arith.truncf %354 : vector<32x128xf32> to vector<32x128xbf16>
    %c0_141 = arith.constant 0 : index
    %c0_142 = arith.constant 0 : index
    %356 = vector.load %arg17[%c0_141, %c0_142] : memref<128x256xbf16, #tpu.memory_space<vmem>>, vector<128x256xbf16>
    %cst_143 = arith.constant dense<0.000000e+00> : vector<32x256xf32>
    %357 = tpu.matmul %355, %356, %cst_143 {dimension_numbers = #tpu.dot_dimension_numbers<[1], [0], [0], [1], [0, 0, 1, 1], [], []>} : vector<32x128xbf16>, vector<128x256xbf16>, vector<32x256xf32> -> vector<32x256xf32>
    %c0_144 = arith.constant 0 : index
    %c0_145 = arith.constant 0 : index
    %358 = vector.load %arg18[%c0_144, %c0_145] : memref<1x256xf32, #tpu.memory_space<vmem>>, vector<1x256xf32>
    %359 = vector.broadcast %358 : vector<1x256xf32> to vector<32x256xf32>
    %360 = arith.addf %357, %359 : vector<32x256xf32>
    %c0_146 = arith.constant 0 : index
    %c0_147 = arith.constant 0 : index
    %361 = vector.load %arg19[%c0_146, %c0_147] : memref<32x256xf32, #tpu.memory_space<vmem>>, vector<32x256xf32>
    tpu.vector_store %arg19[%c0_146, %c0_147], %360 {strides = array<i32>} : memref<32x256xf32, #tpu.memory_space<vmem>>, vector<32x256xf32>,
    return
  }
  func.func @transform_0(%arg0: i32) -> (i32, i32) {
    %c0_i32 = arith.constant 0 : i32
    %c0_i32_0 = arith.constant 0 : i32
    %c0_i32_1 = arith.constant 0 : i32
    return %c0_i32, %c0_i32_0 : i32, i32
  }
  func.func @transform_1(%arg0: i32) -> (i32, i32) {
    %c0_i32 = arith.constant 0 : i32
    %c0_i32_0 = arith.constant 0 : i32
    %c0_i32_1 = arith.constant 0 : i32
    return %c0_i32, %c0_i32_0 : i32, i32
  }
  func.func @transform_2(%arg0: i32) -> (i32, i32) {
    %c0_i32 = arith.constant 0 : i32
    %c0_i32_0 = arith.constant 0 : i32
    %c0_i32_1 = arith.constant 0 : i32
    return %c0_i32, %c0_i32_0 : i32, i32
  }
  func.func @transform_3(%arg0: i32) -> (i32, i32, i32) {
    %c0_i32 = arith.constant 0 : i32
    %c0_i32_0 = arith.constant 0 : i32
    %c0_i32_1 = arith.constant 0 : i32
    %c0_i32_2 = arith.constant 0 : i32
    return %c0_i32, %c0_i32_0, %c0_i32_1 : i32, i32, i32
  }
  func.func @transform_4(%arg0: i32) -> (i32, i32, i32) {
    %c0_i32 = arith.constant 0 : i32
    %c0_i32_0 = arith.constant 0 : i32
    %c0_i32_1 = arith.constant 0 : i32
    %c0_i32_2 = arith.constant 0 : i32
    return %c0_i32, %c0_i32_0, %c0_i32_1 : i32, i32, i32
  }
  func.func @transform_5(%arg0: i32) -> (i32, i32, i32) {
    %c0_i32 = arith.constant 0 : i32
    %c0_i32_0 = arith.constant 0 : i32
    %c0_i32_1 = arith.constant 0 : i32
    %c0_i32_2 = arith.constant 0 : i32
    return %c0_i32, %c0_i32_0, %c0_i32_1 : i32, i32, i32
  }
  func.func @transform_6(%arg0: i32) -> (i32, i32, i32) {
    %c0_i32 = arith.constant 0 : i32
    %c0_i32_0 = arith.constant 0 : i32
    %c0_i32_1 = arith.constant 0 : i32
    %c0_i32_2 = arith.constant 0 : i32
    return %c0_i32, %c0_i32_0, %c0_i32_1 : i32, i32, i32
  }
  func.func @transform_7(%arg0: i32) -> (i32, i32, i32) {
    %c0_i32 = arith.constant 0 : i32
    %c0_i32_0 = arith.constant 0 : i32
    %c0_i32_1 = arith.constant 0 : i32
    %c0_i32_2 = arith.constant 0 : i32
    return %c0_i32, %c0_i32_0, %c0_i32_1 : i32, i32, i32
  }
  func.func @transform_8(%arg0: i32) -> (i32, i32, i32) {
    %c0_i32 = arith.constant 0 : i32
    %c0_i32_0 = arith.constant 0 : i32
    %c0_i32_1 = arith.constant 0 : i32
    %c0_i32_2 = arith.constant 0 : i32
    return %c0_i32, %c0_i32_0, %c0_i32_1 : i32, i32, i32
  }
  func.func @transform_9(%arg0: i32) -> (i32, i32, i32) {
    %c0_i32 = arith.constant 0 : i32
    %c0_i32_0 = arith.constant 0 : i32
    %c0_i32_1 = arith.constant 0 : i32
    %c0_i32_2 = arith.constant 0 : i32
    return %c0_i32, %c0_i32_0, %c0_i32_1 : i32, i32, i32
  }
  func.func @transform_10(%arg0: i32) -> (i32, i32, i32) {
    %c0_i32 = arith.constant 0 : i32
    %c0_i32_0 = arith.constant 0 : i32
    %c0_i32_1 = arith.constant 0 : i32
    %c0_i32_2 = arith.constant 0 : i32
    return %c0_i32, %c0_i32_0, %c0_i32_1 : i32, i32, i32
  }
  func.func @transform_11(%arg0: i32) -> (i32, i32, i32) {
    %c0_i32 = arith.constant 0 : i32
    %c0_i32_0 = arith.constant 0 : i32
    %c0_i32_1 = arith.constant 0 : i32
    %c0_i32_2 = arith.constant 0 : i32
    return %c0_i32, %c0_i32_0, %c0_i32_1 : i32, i32, i32
  }
  func.func @transform_12(%arg0: i32) -> (i32, i32, i32) {
    %c0_i32 = arith.constant 0 : i32
    %c0_i32_0 = arith.constant 0 : i32
    %c0_i32_1 = arith.constant 0 : i32
    %c0_i32_2 = arith.constant 0 : i32
    return %c0_i32, %c0_i32_0, %c0_i32_1 : i32, i32, i32
  }
  func.func @transform_13(%arg0: i32) -> (i32, i32, i32) {
    %c0_i32 = arith.constant 0 : i32
    %c0_i32_0 = arith.constant 0 : i32
    %c0_i32_1 = arith.constant 0 : i32
    %c0_i32_2 = arith.constant 0 : i32
    return %c0_i32, %c0_i32_0, %c0_i32_1 : i32, i32, i32
  }
  func.func @transform_14(%arg0: i32) -> (i32, i32, i32) {
    %c0_i32 = arith.constant 0 : i32
    %c0_i32_0 = arith.constant 0 : i32
    %c0_i32_1 = arith.constant 0 : i32
    %c0_i32_2 = arith.constant 0 : i32
    return %c0_i32, %c0_i32_0, %c0_i32_1 : i32, i32, i32
  }
  func.func @transform_15(%arg0: i32) -> (i32, i32, i32) {
    %c0_i32 = arith.constant 0 : i32
    %c0_i32_0 = arith.constant 0 : i32
    %c0_i32_1 = arith.constant 0 : i32
    %c0_i32_2 = arith.constant 0 : i32
    return %c0_i32, %c0_i32_0, %c0_i32_1 : i32, i32, i32
  }
  func.func @transform_16(%arg0: i32) -> (i32, i32) {
    %c0_i32 = arith.constant 0 : i32
    %c0_i32_0 = arith.constant 0 : i32
    %c0_i32_1 = arith.constant 0 : i32
    return %c0_i32, %c0_i32_0 : i32, i32
  }
  func.func @transform_17(%arg0: i32) -> (i32, i32) {
    %c0_i32 = arith.constant 0 : i32
    %c0_i32_0 = arith.constant 0 : i32
    %c0_i32_1 = arith.constant 0 : i32
    return %c0_i32, %c0_i32_0 : i32, i32
  }
  func.func @transform_18(%arg0: i32) -> (i32, i32) {
    %c0_i32 = arith.constant 0 : i32
    %c0_i32_0 = arith.constant 0 : i32
    %c0_i32_1 = arith.constant 0 : i32
    return %c0_i32, %c0_i32_0 : i32, i32
  }
}

</mosaic_0001>

<bundles_post_ra>
// kernel: gpt_forward.1
= control target key start
LH: loop header
LB: loop body
LE: loop exit
PB: predicated region body
PF: predicated region fallthrough
CT: control target
= control target key end

     0   :  { %s7618_s0 = inlined_call_operand.vmem [shape: s32[32,1], index: 0, kind: input, shape index: {}]   ;;  %s7619_s1 = inlined_call_operand.vmem [shape: f32[256,128], index: 1, kind: input, shape index: {}]   ;;  %s7620_s2 = inlined_call_operand.vmem [shape: f32[16,128], index: 2, kind: input, shape index: {}]   ;;  %s7621_s3 = inlined_call_operand.vmem [shape: bf16[2,128,128], index: 3, kind: input, shape index: {}]   ;;  %s7622_s4 = inlined_call_operand.vmem [shape: bf16[2,128,128], index: 4, kind: input, shape index: {}]   ;;  %s7623_s5 = inlined_call_operand.vmem [shape: bf16[2,128,128], index: 5, kind: input, shape index: {}]   ;;  %s7624_s6 = inlined_call_operand.vmem [shape: bf16[2,128,128], index: 6, kind: input, shape index: {}]   ;;  %s7625_s7 = inlined_call_operand.vmem [shape: f32[2,1,128], index: 7, kind: input, shape index: {}]   ;;  %s7626_s8 = inlined_call_operand.vmem [shape: f32[2,1,128], index: 8, kind: input, shape index: {}]   ;;  %s7627_s9 = inlined_call_operand.vmem [shape: f32[2,1,128], index: 9, kind: input, shape index: {}]   ;;  %s7628_s10 = inlined_call_operand.vmem [shape: bf16[2,128,256], index: 10, kind: input, shape index: {}]   ;;  %s7629_s11 = inlined_call_operand.vmem [shape: f32[2,1,256], index: 11, kind: input, shape index: {}]   ;;  %s7630_s12 = inlined_call_operand.vmem [shape: bf16[2,256,128], index: 12, kind: input, shape index: {}]   ;;  %s7631_s13 = inlined_call_operand.vmem [shape: f32[2,1,128], index: 13, kind: input, shape index: {}]   ;;  %s7632_s14 = inlined_call_operand.vmem [shape: f32[2,1,128], index: 14, kind: input, shape index: {}]   ;;  %s7633_s15 = inlined_call_operand.vmem [shape: f32[2,1,128], index: 15, kind: input, shape index: {}]   ;;  %s7634_s16 = inlined_call_operand.vmem [shape: bf16[128,256], index: 16, kind: input, shape index: {}]   ;;  %s7635_s17 = inlined_call_operand.vmem [shape: f32[1,256], index: 17, kind: input, shape index: {}]   ;;  %s7636_s18 = inlined_call_operand.hbm [shape: f32[32,256], index: 18, kind: output, shape index: {}]  }
   0x1   :  { %7640 = sst [smem:[#allocation5_spill]] %s7618_s0 }
   0x2   :  { %7641 = sst [smem:[#allocation6_spill]] %s7619_s1 }
   0x3   :  { %7642 = sst [smem:[#allocation7_spill]] %s7620_s2 }
   0x4   :  { %s7643_s29 = sld [smem:[#allocation5_spill]]  ;;  %v6086_v2 = vmov 0   ;;  %v5736_v19 = vld [vmem:[%s7621_s3 + $0x38] sm:$0xff]   ;;  %v5738_v22 = vld [vmem:[%s7621_s3 + $0x30] sm:$0xff]   ;;  %v5740_v25 = vld [vmem:[%s7621_s3 + $0x28] sm:$0xff]  }
   0x5   :  { %5734 = vset.pattern.permute.xlu0 %v6086_v2  ;;  %5735 = vset.pattern.permute.xlu1 %v6086_v2  ;;  %s7644_s20 = sld [smem:[#allocation6_spill]]  ;;  %v5737_v40 = vld [vmem:[%s7622_s4 + $0x38] sm:$0xff]  }
   0x6   :  { %5348 = vmatprep.subr.bf16.mxu1 %v5736_v19 }
   0x7   :  { %5349 = vmatpush3.bf16.msra.mxu1 %v5736_v19 }
   0x8   :  { %5350 = vmatprep.subr.bf16.mxu1 %v5738_v22 }
   0xa   :  { %v61_v0 = vld [vmem:[%s7643_s29] sm:$0xff]  ;;  %v63_v1 = vld [vmem:[%s7643_s29 + $0x10] sm:$0xff]  ;;  %v62_v6 = vld [vmem:[%s7643_s29 + $0x8] sm:$0xff] }
   0xb   :  { %v135_v3 = vld [vmem:[%s7644_s20 + $0xf8] sm:$0xff]  ;;  %69 = vperm.xlu0 %5734, %v61_v0   ;;  %75 = vperm.xlu1 %5735, %v63_v1   ;;  %v134_v5 = vld [vmem:[%s7644_s20 + $0xf0] sm:$0xff]  ;;  %v133_v9 = vld [vmem:[%s7644_s20 + $0xe8] sm:$0xff] }
   0xc   :  { %v119_v4 = vld [vmem:[%s7644_s20 + $0x78] sm:$0xff]  ;;  %5092 = vmatprep.subr.mxu0 %v135_v3  ;;  %v118_v8 = vld [vmem:[%s7644_s20 + $0x70] sm:$0xff]  ;;  %v117_v10 = vld [vmem:[%s7644_s20 + $0x68] sm:$0xff]  ;;  %5351 = vmatpush3.bf16.msra.mxu1 %v5738_v22 }
   0xd   :  { %v64_v7 = vld [vmem:[%s7643_s29 + $0x18] sm:$0xff]  ;;  %5093 = vmatpush3.msra.mxu0 %v119_v4  ;;  %v132_v11 = vld [vmem:[%s7644_s20 + $0xe0] sm:$0xff]  ;;  %v130_v15 = vld [vmem:[%s7644_s20 + $0xd0] sm:$0xff]  ;;  %5352 = vmatprep.subr.bf16.mxu1 %v5740_v25 }
   0xe   :  { %5094 = vmatprep.subr.mxu0 %v134_v5  ;;  %v116_v12 = vld [vmem:[%s7644_s20 + $0x60] sm:$0xff]  ;;  %v131_v13 = vld [vmem:[%s7644_s20 + $0xd8] sm:$0xff]  ;;  %v114_v16 = vld [vmem:[%s7644_s20 + $0x50] sm:$0xff] }
   0xf   :  { %72 = vperm.xlu0 %5734, %v62_v6   ;;  %78 = vperm.xlu1 %5735, %v64_v7   ;;  %v115_v14 = vld [vmem:[%s7644_s20 + $0x58] sm:$0xff]  ;;  %v129_v17 = vld [vmem:[%s7644_s20 + $0xc8] sm:$0xff]  ;;  %v128_v20 = vld [vmem:[%s7644_s20 + $0xc0] sm:$0xff] }
  0x10   :  { %5095 = vmatpush3.msra.mxu0 %v118_v8  ;;  %v113_v18 = vld [vmem:[%s7644_s20 + $0x48] sm:$0xff]  ;;  %v112_v21 = vld [vmem:[%s7644_s20 + $0x40] sm:$0xff]  ;;  %v127_v23 = vld [vmem:[%s7644_s20 + $0xb8] sm:$0xff]  ;;  %5353 = vmatpush3.bf16.msra.mxu1 %v5740_v25 }
  0x11   :  { %5096 = vmatprep.subr.mxu0 %v133_v9  ;;  %v111_v24 = vld [vmem:[%s7644_s20 + $0x38] sm:$0xff]  ;;  %v126_v26 = vld [vmem:[%s7644_s20 + $0xb0] sm:$0xff]  ;;  %v125_v28 = vld [vmem:[%s7644_s20 + $0xa8] sm:$0xff] }
  0x12   :  { %5097 = vmatpush3.msra.mxu0 %v117_v10  ;;  %v110_v27 = vld [vmem:[%s7644_s20 + $0x30] sm:$0xff]  ;;  %v109_v29 = vld [vmem:[%s7644_s20 + $0x28] sm:$0xff]  ;;  %v124_v30 = vld [vmem:[%s7644_s20 + $0xa0] sm:$0xff] }
  0x13   :  { %5098 = vmatprep.subr.mxu0 %v132_v11  ;;  %v108_v31 = vld [vmem:[%s7644_s20 + $0x20] sm:$0xff]  ;;  %v123_v32 = vld [vmem:[%s7644_s20 + $0x98] sm:$0xff]  ;;  %v122_v34 = vld [vmem:[%s7644_s20 + $0x90] sm:$0xff] }
  0x14   :  { %5099 = vmatpush3.msra.mxu0 %v116_v12  ;;  %v107_v33 = vld [vmem:[%s7644_s20 + $0x18] sm:$0xff]  ;;  %v106_v35 = vld [vmem:[%s7644_s20 + $0x10] sm:$0xff]  ;;  %v121_v36 = vld [vmem:[%s7644_s20 + $0x88] sm:$0xff] }
  0x15   :  { %5100 = vmatprep.subr.mxu0 %v131_v13  ;;  %v105_v37 = vld [vmem:[%s7644_s20 + $0x8] sm:$0xff]  ;;  %v120_v38 = vld [vmem:[%s7644_s20 + $0x80] sm:$0xff] }
  0x16   :  { %5101 = vmatpush3.msra.mxu0 %v115_v14  ;;  %v104_v39 = vld [vmem:[%s7644_s20] sm:$0xff] }
  0x17   :  { %5102 = vmatprep.subr.mxu0 %v130_v15 }
  0x18   :  { %5103 = vmatpush3.msra.mxu0 %v114_v16 }
  0x19   :  { %5104 = vmatprep.subr.mxu0 %v129_v17 }
  0x1a   :  { %5105 = vmatpush3.msra.mxu0 %v113_v18 }
  0x1b   :  { %5106 = vmatprep.subr.mxu0 %v128_v20 }
  0x1c   :  { %5107 = vmatpush3.msra.mxu0 %v112_v21 }
  0x1d   :  { %5108 = vmatprep.subr.mxu0 %v127_v23 }
  0x1e   :  { %5109 = vmatpush3.msra.mxu0 %v111_v24 }
  0x1f   :  { %5110 = vmatprep.subr.mxu0 %v126_v26 }
  0x20   :  { %5111 = vmatpush3.msra.mxu0 %v110_v27 }
  0x21   :  { %5112 = vmatprep.subr.mxu0 %v125_v28 }
  0x22   :  { %5113 = vmatpush3.msra.mxu0 %v109_v29 }
  0x23   :  { %5114 = vmatprep.subr.mxu0 %v124_v30 }
  0x24   :  { %5115 = vmatpush3.msra.mxu0 %v108_v31 }
  0x25   :  { %5116 = vmatprep.subr.mxu0 %v123_v32 }
  0x26   :  { %5117 = vmatpush3.msra.mxu0 %v107_v33 }
  0x27   :  { %5118 = vmatprep.subr.mxu0 %v122_v34 }
  0x28   :  { %5119 = vmatpush3.msra.mxu0 %v106_v35 }
  0x29   :  { %5120 = vmatprep.subr.mxu0 %v121_v36 }
  0x2a   :  { %5121 = vmatpush3.msra.mxu0 %v105_v37 }
  0x2b   :  { %5122 = vmatprep.subr.mxu0 %v120_v38 }
  0x2c   :  { %5123 = vmatpush3.msra.mxu0 %v104_v39 }
  0x2d   :  { %5368 = vmatprep.subr.bf16.mxu0 %v5737_v40 }
  0x2e   :  { %23 = vsyncpa [#allocation3], 0  ;;  %v65_v41 = vlaneseq  ;;  %v5739_v45 = vld [vmem:[%s7622_s4 + $0x30] sm:$0xff]   ;;  %v6087_v46 = vmov 1.0   ;;  %v5741_v49 = vld [vmem:[%s7622_s4 + $0x28] sm:$0xff]   ;;  %s7645_s2 = sld [smem:[#allocation7_spill]] }
  0x2f   :  { %v5742_v51 = vld [vmem:[%s7621_s3 + $0x20] sm:$0xff]   ;;  %v5744_v53 = vld [vmem:[%s7621_s3 + $0x18] sm:$0xff]   ;;  %v5746_v55 = vld [vmem:[%s7621_s3 + $0x10] sm:$0xff]   ;;  %v6088_v26 = vmov 0.0   ;;  %vm6089_vm8 = vmmov 0   ;;  %vm623_vm9 = vcmask 261120  }
  0x30   :  { %v6314_v42 = vand.u32 127, %v65_v41  ;;  %v5743_v52 = vld [vmem:[%s7622_s4 + $0x20] sm:$0xff]   ;;  %5354 = vmatprep.subr.bf16.mxu1 %v5742_v51  ;;  %v5745_v54 = vld [vmem:[%s7622_s4 + $0x18] sm:$0xff]   ;;  %v5747_v56 = vld [vmem:[%s7622_s4 + $0x10] sm:$0xff]   ;;  %s6090_s20 = smov 96   ;;  %s6091_s24 = smov 64  }
  0x31   :  { %5355 = vmatpush3.bf16.msra.mxu1 %v5742_v51  ;;  %v5748_v57 = vld [vmem:[%s7621_s3 + $0x8] sm:$0xff]   ;;  %v5750_v59 = vld [vmem:[%s7621_s3] sm:$0xff]   ;;  %v5752_v61 = vld [vmem:[%s7623_s5 + $0x38] sm:$0xff]   ;;  %s6092_s25 = smov 32   ;;  %vm1036_vm11 = vcmask 130048  }
  0x32   :  { %v67_v43 = vadd.s32 128, %v6314_v42  ;;  %5356 = vmatprep.subr.bf16.mxu1 %v5744_v53  ;;  %v5749_v58 = vld [vmem:[%s7622_s4 + $0x8] sm:$0xff]   ;;  %v5751_v60 = vld [vmem:[%s7622_s4] sm:$0xff]   ;;  %v5753_v19 = vld [vmem:[%s7623_s5 + $0x30] sm:$0xff]  }
  0x33   :  { %v5754_v20 = vld [vmem:[%s7623_s5 + $0x28] sm:$0xff]   ;;  %v5755_v21 = vld [vmem:[%s7623_s5 + $0x20] sm:$0xff]   ;;  %v5756_v22 = vld [vmem:[%s7623_s5 + $0x18] sm:$0xff]  }
  0x34   :  { %v136_v3 = vld [vmem:[%s7645_s2] sm:$0xff]  ;;  %v137_v4 = vld [vmem:[%s7645_s2 + $0x8] sm:$0xff]  ;;  %v5757_v23 = vld [vmem:[%s7623_s5 + $0x10] sm:$0xff]  }
  0x35   :  { %5357 = vmatpush3.bf16.msra.mxu1 %v5744_v53  ;;  %v5758_v24 = vld [vmem:[%s7623_s5 + $0x8] sm:$0xff]   ;;  %v5759_v25 = vld [vmem:[%s7623_s5] sm:$0xff]  }
  0x36   :  { %5358 = vmatprep.subr.bf16.mxu1 %v5746_v55 }
  0x39   :  { %5359 = vmatpush3.bf16.msra.mxu1 %v5746_v55 }
  0x3a   :  { %5360 = vmatprep.subr.bf16.mxu1 %v5748_v57 }
  0x3d   :  { %5361 = vmatpush3.bf16.msra.mxu1 %v5748_v57 }
  0x3e   :  { %5362 = vmatprep.subr.bf16.mxu1 %v5750_v59 }
  0x41   :  { %5363 = vmatpush3.bf16.msra.mxu1 %v5750_v59 }
  0x42   :  { %5388 = vmatprep.subr.bf16.mxu1 %v5752_v61 }
  0x86   :  { %v70_v44 = vpop.permute.xlu0 %69  ;;  %v76_v47 = vpop.permute.xlu1 %75 }
  0x87   :  { %vm81_vm0 = vcmp.eq.s32.totalorder %v70_v44, %v67_v43  ;;  %vm80_vm1 = vcmp.eq.s32.totalorder %v70_v44, %v6314_v42  ;;  %vm85_vm4 = vcmp.eq.s32.totalorder %v76_v47, %v67_v43  ;;  %vm84_vm5 = vcmp.eq.s32.totalorder %v76_v47, %v6314_v42 }
  0x88   :  { %4761 = vmatprep.mubr.msk.f32.mxu0 %vm81_vm0, %v6087_v46 }
  0x89   :  { %4762 = vmatmul.mubr.msk.f32.vlgmr.msra.gmra.mxu0 %vm80_vm1, %v6087_v46 }
  0x8a   :  { %v73_v48 = vpop.permute.xlu0 %72  ;;  %5369 = vmatpush3.bf16.msra.mxu0 %v5737_v40  ;;  %v79_v50 = vpop.permute.xlu1 %78 }
  0x8b   :  { %vm83_vm2 = vcmp.eq.s32.totalorder %v73_v48, %v67_v43  ;;  %vm82_vm3 = vcmp.eq.s32.totalorder %v73_v48, %v6314_v42  ;;  %5370 = vmatprep.subr.bf16.mxu0 %v5739_v45  ;;  %vm87_vm6 = vcmp.eq.s32.totalorder %v79_v50, %v67_v43  ;;  %vm86_vm7 = vcmp.eq.s32.totalorder %v79_v50, %v6314_v42 }
  0x8c   :  { %4763 = vmatprep.mubr.msk.f32.mxu0 %vm83_vm2, %v6087_v46 }
  0x8d   :  { %4764 = vmatmul.mubr.msk.f32.gmra.mxu0 %vm82_vm3, %v6087_v46 }
  0x8e   :  { %4765 = vmatprep.mubr.msk.f32.mxu0 %vm85_vm4, %v6087_v46  ;;  %5371 = vmatpush3.bf16.msra.mxu0 %v5739_v45 }
  0x8f   :  { %5372 = vmatprep.subr.bf16.mxu0 %v5741_v49 }
  0x91   :  { %4766 = vmatmul.mubr.msk.f32.gmra.mxu0 %vm84_vm5, %v6087_v46 }
  0x92   :  { %4767 = vmatprep.mubr.msk.f32.mxu0 %vm87_vm6, %v6087_v46  ;;  %5373 = vmatpush3.bf16.msra.mxu0 %v5741_v49 }
  0x93   :  { %5374 = vmatprep.subr.bf16.mxu0 %v5743_v52 }
  0x95   :  { %4768 = vmatmul.mubr.msk.f32.gmra.mxu0 %vm86_vm7, %v6087_v46 }
  0x96   :  { %5375 = vmatpush3.bf16.msra.mxu0 %v5743_v52 }
  0x97   :  { %5376 = vmatprep.subr.bf16.mxu0 %v5745_v54 }
  0x9a   :  { %5377 = vmatpush3.bf16.msra.mxu0 %v5745_v54 }
  0x9b   :  { %5378 = vmatprep.subr.bf16.mxu0 %v5747_v56 }
  0x9e   :  { %5379 = vmatpush3.bf16.msra.mxu0 %v5747_v56 }
  0x9f   :  { %5380 = vmatprep.subr.bf16.mxu0 %v5749_v58 }
  0xa2   :  { %5381 = vmatpush3.bf16.msra.mxu0 %v5749_v58 }
  0xa3   :  { %5382 = vmatprep.subr.bf16.mxu0 %v5751_v60 }
  0xa6   :  { %5383 = vmatpush3.bf16.msra.mxu0 %v5751_v60 }
  0xa7   :  { %5432 = vmatprep.subr.bf16.mxu0 %v6088_v26 }
 0x149   :  { %v5124_v62 = vpop.f32.mrf.mxu0 }
 0x14b   :  { %v5125_v63 = vpop.f32.mrf.mxu0 }
 0x14c   :  { %v5126_v1 = vadd.f32 %v5125_v63, %v5124_v62 }
 0x14d   :  { %v5127_v0 = vpop.f32.mrf.mxu0 }
 0x14e   :  { %v6366_v8 = vadd.f32 %v5126_v1, %v136_v3 }
 0x14f   :  { %v5128_v5 = vpop.f32.mrf.mxu0 }
 0x150   :  { %v5129_v6 = vadd.f32 %v5128_v5, %v5127_v0 }
 0x151   :  { %v5130_v7 = vpop.f32.mrf.mxu0 }
 0x152   :  { %v6368_v9 = vadd.f32 %v5129_v6, %v137_v4 }
 0x153   :  { %v5131_v10 = vpop.f32.mrf.mxu0 }
 0x154   :  { %v228_v11 = vpack.c.bf16 %v6368_v9, %v6366_v8  ;;  %v5132_v13 = vadd.f32 %v5131_v10, %v5130_v7 }
 0x155   :  { %v5133_v12 = vpop.f32.mrf.mxu0 }
 0x156   :  { %5364 = vmatprep.mubr.bf16.mxu1 %v228_v11  ;;  %5384 = vmatprep.mubr.bf16.mxu0 %v228_v11  ;;  %v6372_v16 = vadd.f32 %v5132_v13, %v136_v3 }
 0x157   :  { %v5134_v14 = vpop.f32.mrf.mxu0 }
 0x158   :  { %v5135_v15 = vadd.f32 %v5134_v14, %v5133_v12 }
 0x15a   :  { %v6374_v17 = vadd.f32 %v5135_v15, %v137_v4  ;;  %v6466_v4 = vshrl.u32 %v65_v41, 7 }
 0x15c   :  { %v229_v18 = vpack.c.bf16 %v6374_v17, %v6372_v16  ;;  %v225_v5 = vadd.s32 8, %v6466_v4  ;;  %vm6471_vm10 = vcmp.le.s32.totalorder %v6314_v42, %v6466_v4 }
 0x15e   :  { %5365 = vmatmul.mubr.bf16.vlgmr.msra.gmra.mxu1 %v229_v18  ;;  %5385 = vmatmul.mubr.bf16.vlgmr.msra.gmra.mxu0 %v229_v18  ;;  %vm6480_vm12 = vcmp.le.s32.totalorder %v6314_v42, %v225_v5 }
 0x15f   :  { %5389 = vmatpush3.bf16.msra.mxu1 %v5752_v61  ;;  %5404 = vmatprep.mubr.bf16.mxu1 %v228_v11 }
 0x160   :  { %5390 = vmatprep.subr.bf16.mxu1 %v5753_v19  ;;  %5434 = vmatprep.mubr.msk.bf16.mxu0 %vm6089_vm8, %v6088_v26 }
 0x163   :  { %5391 = vmatpush3.bf16.msra.mxu1 %v5753_v19 }
 0x164   :  { %5392 = vmatprep.subr.bf16.mxu1 %v5754_v20 }
 0x167   :  { %5393 = vmatpush3.bf16.msra.mxu1 %v5754_v20 }
 0x168   :  { %5394 = vmatprep.subr.bf16.mxu1 %v5755_v21 }
 0x16b   :  { %5395 = vmatpush3.bf16.msra.mxu1 %v5755_v21 }
 0x16c   :  { %5396 = vmatprep.subr.bf16.mxu1 %v5756_v22 }
 0x16f   :  { %5397 = vmatpush3.bf16.msra.mxu1 %v5756_v22 }
 0x170   :  { %5398 = vmatprep.subr.bf16.mxu1 %v5757_v23 }
 0x173   :  { %5399 = vmatpush3.bf16.msra.mxu1 %v5757_v23 }
 0x174   :  { %5400 = vmatprep.subr.bf16.mxu1 %v5758_v24 }
 0x177   :  { %5401 = vmatpush3.bf16.msra.mxu1 %v5758_v24 }
 0x178   :  { %5402 = vmatprep.subr.bf16.mxu1 %v5759_v25 }
 0x17b   :  { %5403 = vmatpush3.bf16.msra.mxu1 %v5759_v25 }
 0x17c   :  { %5408 = vmatprep.subr.bf16.mxu1 %v6088_v26 }
 0x17e   :  { %5405 = vmatmul.mubr.bf16.vlgmr.msra.gmra.mxu1 %v229_v18 }
 0x17f   :  { %5410 = vmatprep.mubr.msk.bf16.mxu1 %vm6089_vm8, %v6088_v26 }
 0x21e   :  { %v5366_v27 = vpop.f32.mrf.mxu1  ;;  %v5386_v28 = vpop.f32.mrf.mxu0 }
 0x220   :  { %v328_v29 = vpop.f32.mrf.mxu1  ;;  %v443_v30 = vpop.f32.mrf.mxu0 }
 0x222   :  { %v5367_v31 = vpop.f32.mrf.mxu1  ;;  %v5387_v32 = vpop.f32.mrf.mxu0 }
 0x223   :  { %v459_v38 = vpack.c.bf16 %v5387_v32, %v5386_v28  ;;  %v344_v39 = vpack.c.bf16 %v5367_v31, %v5366_v27 }
 0x224   :  { %v331_v33 = vpop.f32.mrf.mxu1  ;;  %v446_v34 = vpop.f32.mrf.mxu0 }
 0x225   :  { %v343_v35 = vpack.c.bf16 %v331_v33, %v328_v29  ;;  %v458_v36 = vpack.c.bf16 %v446_v34, %v443_v30  ;;  %v675_v40 = vsel %vm623_vm9, %v459_v38, 0 }
 0x227   :  { %591 = vrot.lane.b32.xlu0 %v458_v36, %s6090_s20  ;;  %577 = vrot.lane.b32.xlu1 %v343_v35, %s6090_s20  ;;  %v628_v37 = vsel %vm623_vm9, %v458_v36, 0 }
 0x228   :  { %5409 = vmatpush3.bf16.xpose.msra.mxu1 %v628_v37 }
 0x229   :  { %5414 = vmatprep.subr.bf16.mxu1 %v6088_v26 }
 0x22b   :  { %593 = vrot.lane.b32.xlu0 %v459_v38, %s6090_s20  ;;  %595 = vrot.lane.b32.xlu1 %v458_v36, %s6091_s24 }
 0x22f   :  { %579 = vrot.lane.b32.xlu0 %v344_v39, %s6090_s20  ;;  %597 = vrot.lane.b32.xlu1 %v459_v38, %s6091_s24 }
 0x230   :  { %5411 = vmatmul.mubr.msk.bf16.vlgmr.msra.gmra.mxu1 %vm623_vm9, %v343_v35 }
 0x231   :  { %5415 = vmatpush3.bf16.xpose.msra.mxu1 %v675_v40  ;;  %5416 = vmatprep.mubr.msk.bf16.mxu1 %vm6089_vm8, %v6088_v26 }
 0x232   :  { %5420 = vmatprep.subr.bf16.mxu1 %v6088_v26 }
 0x233   :  { %581 = vrot.lane.b32.xlu0 %v343_v35, %s6091_s24  ;;  %599 = vrot.lane.b32.xlu1 %v458_v36, %s6092_s25 }
 0x237   :  { %583 = vrot.lane.b32.xlu0 %v344_v39, %s6091_s24  ;;  %601 = vrot.lane.b32.xlu1 %v459_v38, %s6092_s25 }
 0x238   :  { %5417 = vmatmul.mubr.msk.bf16.vlgmr.msra.gmra.mxu1 %vm623_vm9, %v344_v39 }
 0x239   :  { %5422 = vmatprep.mubr.msk.bf16.mxu1 %vm6089_vm8, %v6088_v26 }
 0x23b   :  { %585 = vrot.lane.b32.xlu0 %v343_v35, %s6092_s25  ;;  %587 = vrot.lane.b32.xlu1 %v344_v39, %s6092_s25 }
 0x23e   :  { %v5406_v48 = vpop.f32.mrf.mxu1 }
 0x240   :  { %v558_v52 = vpop.f32.mrf.mxu1 }
 0x242   :  { %v5407_v56 = vpop.f32.mrf.mxu1 }
 0x243   :  { %v6458_v1 = vpack.c.bf16 %v5407_v56, %v5406_v48 }
 0x244   :  { %v561_v59 = vpop.f32.mrf.mxu1 }
 0x245   :  { %v6446_v61 = vpack.c.bf16 %v561_v59, %v558_v52 }
 0x299   :  { %v592_v43 = vpop.permute.xlu0 %591  ;;  %v578_v44 = vpop.permute.xlu1 %577 }
 0x29a   :  { %v722_v45 = vsel %vm623_vm9, %v592_v43, 0 }
 0x29b   :  { %5421 = vmatpush3.bf16.xpose.msra.mxu1 %v722_v45 }
 0x29c   :  { %5426 = vmatprep.subr.bf16.mxu1 %v6088_v26 }
 0x29d   :  { %v594_v46 = vpop.permute.xlu0 %593  ;;  %v596_v47 = vpop.permute.xlu1 %595 }
 0x29e   :  { %v816_v49 = vsel %vm623_vm9, %v596_v47, 0  ;;  %v769_v53 = vsel %vm623_vm9, %v594_v46, 0 }
 0x29f   :  { %5433 = vmatpush3.bf16.xpose.msra.mxu0 %v816_v49 }
 0x2a0   :  { %5444 = vmatprep.subr.bf16.mxu0 %v6088_v26 }
 0x2a1   :  { %v580_v50 = vpop.permute.xlu0 %579  ;;  %v598_v51 = vpop.permute.xlu1 %597 }
 0x2a2   :  { %5423 = vmatmul.mubr.msk.bf16.vlgmr.msra.gmra.mxu1 %vm623_vm9, %v578_v44  ;;  %v863_v60 = vsel %vm623_vm9, %v598_v51, 0 }
 0x2a3   :  { %5427 = vmatpush3.bf16.xpose.msra.mxu1 %v769_v53  ;;  %5428 = vmatprep.mubr.msk.bf16.mxu1 %vm6089_vm8, %v6088_v26 }
 0x2a4   :  { %5438 = vmatprep.subr.bf16.mxu1 %v6088_v26 }
 0x2a5   :  { %v582_v54 = vpop.permute.xlu0 %581  ;;  %v600_v55 = vpop.permute.xlu1 %599 }
 0x2a6   :  { %v910_v57 = vsel %vm623_vm9, %v600_v55, 0  ;;  %5435 = vmatmul.mubr.msk.bf16.vlgmr.msra.gmra.mxu0 %vm623_vm9, %v582_v54 }
 0x2a7   :  { %5445 = vmatpush3.bf16.xpose.msra.mxu0 %v910_v57  ;;  %5446 = vmatprep.mubr.msk.bf16.mxu0 %vm6089_vm8, %v6088_v26 }
 0x2a8   :  { %5456 = vmatprep.subr.bf16.mxu0 %v6088_v26 }
 0x2a9   :  { %v584_v58 = vpop.permute.xlu0 %583  ;;  %v602_v63 = vpop.permute.xlu1 %601 }
 0x2aa   :  { %5429 = vmatmul.mubr.msk.bf16.vlgmr.msra.gmra.mxu1 %vm623_vm9, %v580_v50  ;;  %v957_v0 = vsel %vm623_vm9, %v602_v63, 0 }
 0x2ab   :  { %5439 = vmatpush3.bf16.xpose.msra.mxu1 %v863_v60  ;;  %5440 = vmatprep.mubr.msk.bf16.mxu1 %vm6089_vm8, %v6088_v26 }
 0x2ac   :  { %5450 = vmatprep.subr.bf16.mxu1 %v6088_v26 }
 0x2ad   :  { %v586_v62 = vpop.permute.xlu0 %585  ;;  %v588_v3 = vpop.permute.xlu1 %587 }
 0x2ae   :  { %5447 = vmatmul.mubr.msk.bf16.vlgmr.msra.gmra.mxu0 %vm623_vm9, %v586_v62 }
 0x2af   :  { %5457 = vmatpush3.bf16.msra.mxu0 %v6446_v61  ;;  %5458 = vmatprep.mubr.msk.bf16.mxu0 %vm6089_vm8, %v6088_v26 }
 0x2b0   :  { %5468 = vmatprep.subr.bf16.mxu0 %v6088_v26 }
 0x2b2   :  { %5441 = vmatmul.mubr.msk.bf16.vlgmr.msra.gmra.mxu1 %vm623_vm9, %v584_v58 }
 0x2b3   :  { %5451 = vmatpush3.bf16.xpose.msra.mxu1 %v957_v0  ;;  %5452 = vmatprep.mubr.msk.bf16.mxu1 %vm6089_vm8, %v6088_v26 }
 0x2b4   :  { %5462 = vmatprep.subr.bf16.mxu1 %v6088_v26 }
 0x2ba   :  { %5453 = vmatmul.mubr.msk.bf16.vlgmr.msra.gmra.mxu1 %vm623_vm9, %v588_v3 }
 0x2bb   :  { %5463 = vmatpush3.bf16.msra.mxu1 %v6458_v1  ;;  %5464 = vmatprep.mubr.msk.bf16.mxu1 %vm6089_vm8, %v6088_v26 }
 0x2bc   :  { %5474 = vmatprep.subr.bf16.mxu1 %v6088_v26 }
 0x2f0   :  { %v664_v7 = vpop.f32.mrf.mxu1 }
 0x2f1   :  { %v1000_v10 = vmul.f32 0.17677669, %v664_v7 }
 0x2f2   :  { %v5412_v11 = vpop.f32.mrf.mxu1 }
 0x2f3   :  { %v6477_v12 = vsel %vm6471_vm10, %v1000_v10, -1e+30 }
 0x2f4   :  { %v667_v13 = vpop.f32.mrf.mxu1  ;;  %v1037_v14 = vsel %vm1036_vm11, %v6477_v12, -inf }
 0x2f5   :  { %v1001_v15 = vmul.f32 0.17677669, %v667_v13  ;;  %1038 = vmax.xlane.f32.xlu0 %v1037_v14 }
 0x2f6   :  { %v5413_v18 = vpop.f32.mrf.mxu1 }
 0x2f7   :  { %v6488_v19 = vsel %vm6480_vm12, %v1001_v15, -1e+30 }
 0x2f8   :  { %v711_v20 = vpop.f32.mrf.mxu1  ;;  %v1040_v21 = vsel %vm1036_vm11, %v6488_v19, -inf }
 0x2f9   :  { %v1002_v22 = vmul.f32 0.17677669, %v711_v20  ;;  %1041 = vmax.xlane.f32.xlu1 %v1040_v21 }
 0x2fa   :  { %v5418_v42 = vpop.f32.mrf.mxu1 }
 0x2fb   :  { %v6494_v23 = vsel %vm6471_vm10, %v1002_v22, -1e+30 }
 0x2fc   :  { %v714_v24 = vpop.f32.mrf.mxu1  ;;  %v1043_v25 = vsel %vm1036_vm11, %v6494_v23, -inf }
 0x2fd   :  { %v1003_v27 = vmul.f32 0.17677669, %v714_v24  ;;  %1044 = vmax.xlane.f32.xlu0 %v1043_v25 }
 0x2fe   :  { %v5419_v28 = vpop.f32.mrf.mxu1 }
 0x2ff   :  { %v6500_v29 = vsel %vm6480_vm12, %v1003_v27, -1e+30 }
 0x300   :  { %v1046_v30 = vsel %vm1036_vm11, %v6500_v29, -inf }
 0x301   :  { %1047 = vmax.xlane.f32.xlu0 %v1046_v30 }
 0x362   :  { %v758_v31 = vpop.f32.mrf.mxu1 }
 0x363   :  { %v1004_v32 = vmul.f32 0.17677669, %v758_v31 }
 0x364   :  { %v5424_v33 = vpop.f32.mrf.mxu1 }
 0x365   :  { %v6506_v34 = vsel %vm6471_vm10, %v1004_v32, -1e+30 }
 0x366   :  { %v761_v35 = vpop.f32.mrf.mxu1  ;;  %v852_v36 = vpop.f32.mrf.mxu0  ;;  %v1049_v37 = vsel %vm1036_vm11, %v6506_v34, -inf }
 0x367   :  { %v1005_v38 = vmul.f32 0.17677669, %v761_v35  ;;  %v1008_v39 = vmul.f32 0.17677669, %v852_v36  ;;  %1050 = vmax.xlane.f32.xlu1 %v1049_v37 }
 0x368   :  { %v5425_v40 = vpop.f32.mrf.mxu1  ;;  %v5436_v43 = vpop.f32.mrf.mxu0 }
 0x369   :  { %v6512_v44 = vsel %vm6471_vm10, %v1008_v39, -1e+30  ;;  %v6516_v45 = vsel %vm6480_vm12, %v1005_v38, -1e+30 }
 0x36a   :  { %v805_v46 = vpop.f32.mrf.mxu1  ;;  %v855_v47 = vpop.f32.mrf.mxu0  ;;  %v1061_v48 = vsel %vm1036_vm11, %v6512_v44, -inf  ;;  %v1052_v49 = vsel %vm1036_vm11, %v6516_v45, -inf }
 0x36b   :  { %v1006_v50 = vmul.f32 0.17677669, %v805_v46  ;;  %1062 = vmax.xlane.f32.xlu1 %v1061_v48  ;;  %1053 = vmax.xlane.f32.xlu0 %v1052_v49  ;;  %v1009_v57 = vmul.f32 0.17677669, %v855_v47 }
 0x36c   :  { %v5430_v51 = vpop.f32.mrf.mxu1  ;;  %v5437_v52 = vpop.f32.mrf.mxu0 }
 0x36d   :  { %v6524_v53 = vsel %vm6471_vm10, %v1006_v50, -1e+30  ;;  %v6542_v13 = vsel %vm6480_vm12, %v1009_v57, -1e+30 }
 0x36e   :  { %v808_v54 = vpop.f32.mrf.mxu1  ;;  %v946_v55 = vpop.f32.mrf.mxu0  ;;  %v1055_v56 = vsel %vm1036_vm11, %v6524_v53, -inf  ;;  %v1064_v21 = vsel %vm1036_vm11, %v6542_v13, -inf }
 0x36f   :  { %v1007_v58 = vmul.f32 0.17677669, %v808_v54  ;;  %v1012_v59 = vmul.f32 0.17677669, %v946_v55  ;;  %1056 = vmax.xlane.f32.xlu1 %v1055_v56 }
 0x370   :  { %v5431_v60 = vpop.f32.mrf.mxu1  ;;  %v5448_v62 = vpop.f32.mrf.mxu0 }
 0x371   :  { %v6530_v63 = vsel %vm6471_vm10, %v1012_v59, -1e+30  ;;  %v6534_v0 = vsel %vm6480_vm12, %v1007_v58, -1e+30 }
 0x372   :  { %v899_v3 = vpop.f32.mrf.mxu1  ;;  %v949_v5 = vpop.f32.mrf.mxu0  ;;  %v1073_v7 = vsel %vm1036_vm11, %v6530_v63, -inf  ;;  %v1058_v10 = vsel %vm1036_vm11, %v6534_v0, -inf }
 0x373   :  { %v1010_v11 = vmul.f32 0.17677669, %v899_v3  ;;  %1074 = vmax.xlane.f32.xlu1 %v1073_v7  ;;  %1059 = vmax.xlane.f32.xlu0 %v1058_v10  ;;  %v1013_v42 = vmul.f32 0.17677669, %v949_v5 }
 0x374   :  { %v5442_v14 = vpop.f32.mrf.mxu1  ;;  %v5449_v15 = vpop.f32.mrf.mxu0 }
 0x375   :  { %v6546_v18 = vsel %vm6471_vm10, %v1010_v11, -1e+30  ;;  %v6560_v32 = vsel %vm6480_vm12, %v1013_v42, -1e+30 }
 0x376   :  { %v902_v20 = vpop.f32.mrf.mxu1  ;;  %v1067_v22 = vsel %vm1036_vm11, %v6546_v18, -inf  ;;  %v1076_v37 = vsel %vm1036_vm11, %v6560_v32, -inf }
 0x377   :  { %v1011_v24 = vmul.f32 0.17677669, %v902_v20  ;;  %1065 = vmax.xlane.f32.xlu0 %v1064_v21  ;;  %1068 = vmax.xlane.f32.xlu1 %v1067_v22 }
 0x378   :  { %v5443_v25 = vpop.f32.mrf.mxu1 }
 0x379   :  { %v6554_v27 = vsel %vm6480_vm12, %v1011_v24, -1e+30 }
 0x37a   :  { %v993_v28 = vpop.f32.mrf.mxu1  ;;  %v1070_v30 = vsel %vm1036_vm11, %v6554_v27, -inf }
 0x37b   :  { %v1014_v31 = vmul.f32 0.17677669, %v993_v28  ;;  %1071 = vmax.xlane.f32.xlu0 %v1070_v30 }
 0x37c   :  { %v5454_v33 = vpop.f32.mrf.mxu1 }
 0x37d   :  { %v6564_v35 = vsel %vm6471_vm10, %v1014_v31, -1e+30 }
 0x37e   :  { %v996_v36 = vpop.f32.mrf.mxu1  ;;  %v1079_v38 = vsel %vm1036_vm11, %v6564_v35, -inf  ;;  %v1039_v47 = vpop.xlane.xlu0 %1038 }
 0x37f   :  { %v1015_v39 = vmul.f32 0.17677669, %v996_v36  ;;  %1077 = vmax.xlane.f32.xlu0 %v1076_v37  ;;  %1080 = vmax.xlane.f32.xlu1 %v1079_v38  ;;  %v1085_v52 = vsub.f32 %v6477_v12, %v1039_v47 }
 0x380   :  { %v5455_v40 = vpop.f32.mrf.mxu1 }
 0x381   :  { %v6572_v43 = vsel %vm6480_vm12, %v1015_v39, -1e+30  ;;  %v1101_v56 = vmul.f32 1.442695, %v1085_v52 }
 0x382   :  { %v1082_v46 = vsel %vm1036_vm11, %v6572_v43, -inf  ;;  %v1042_v49 = vpop.xlane.xlu1 %1041 }
 0x383   :  { %1083 = vmax.xlane.f32.xlu0 %v1082_v46  ;;  %v1086_v50 = vsub.f32 %v6488_v19, %v1042_v49 }
 0x385   :  { %v1103_v54 = vmul.f32 1.442695, %v1086_v50 }
 0x386   :  { %v1045_v48 = vpop.xlane.xlu0 %1044 }
 0x387   :  { %5904 = vpow2.f32 %v1103_v54  ;;  %v1087_v57 = vsub.f32 %v6494_v23, %v1045_v48 }
 0x388   :  { %5906 = vpow2.f32 %v1101_v56 }
 0x389   :  { %v1105_v59 = vmul.f32 1.442695, %v1087_v57 }
 0x38a   :  { %v1048_v51 = vpop.xlane.xlu0 %1047 }
 0x38b   :  { %v1088_v55 = vsub.f32 %v6500_v29, %v1048_v51 }
 0x38d   :  { %v1107_v58 = vmul.f32 1.442695, %v1088_v55 }
 0x38f   :  { %5908 = vpow2.f32 %v1107_v58 }
 0x390   :  { %605 = vrot.lane.b32.xlu1 %v6446_v61, %s6090_s20  ;;  %5910 = vpow2.f32 %v1105_v59 }
 0x394   :  { %611 = vrot.lane.b32.xlu1 %v6446_v61, %s6091_s24  ;;  %v6588_v60 = vpop.eup %5904 }
 0x395   :  { %v6590_v62 = vpop.eup %5906  ;;  %v1136_v19 = vsel %vm1036_vm11, %v6588_v60, 0.0 }
 0x396   :  { %v1133_v29 = vsel %vm1036_vm11, %v6590_v62, 0.0 }
 0x398   :  { %613 = vrot.lane.b32.xlu1 %v6458_v1, %s6091_s24 }
 0x399   :  { %607 = vrot.lane.b32.xlu0 %v6458_v1, %s6090_s20 }
 0x39c   :  { %v6594_v12 = vpop.eup %5908 }
 0x39d   :  { %v1142_v23 = vsel %vm1036_vm11, %v6594_v12, 0.0  ;;  %v6600_v3 = vpop.eup %5910 }
 0x39e   :  { %v1139_v5 = vsel %vm1036_vm11, %v6600_v3, 0.0 }
 0x3b8   :  { %1137 = vadd.xlane.f32.xlu0 %v1136_v19 }
 0x3bc   :  { %1134 = vadd.xlane.f32.xlu1 %v1133_v29  ;;  %1143 = vadd.xlane.f32.xlu0 %v1142_v23 }
 0x3c0   :  { %1140 = vadd.xlane.f32.xlu1 %v1139_v5 }
 0x3f0   :  { %v1051_v7 = vpop.xlane.xlu1 %1050 }
 0x3f1   :  { %v1089_v10 = vsub.f32 %v6506_v34, %v1051_v7 }
 0x3f3   :  { %v1109_v11 = vmul.f32 1.442695, %v1089_v10 }
 0x3f4   :  { %v1063_v14 = vpop.xlane.xlu1 %1062  ;;  %v1054_v15 = vpop.xlane.xlu0 %1053 }
 0x3f5   :  { %5912 = vpow2.f32 %v1109_v11  ;;  %v1093_v20 = vsub.f32 %v6512_v44, %v1063_v14  ;;  %v1090_v21 = vsub.f32 %v6516_v45, %v1054_v15 }
 0x3f7   :  { %v1117_v22 = vmul.f32 1.442695, %v1093_v20  ;;  %v1111_v42 = vmul.f32 1.442695, %v1090_v21 }
 0x3f8   :  { %v1057_v24 = vpop.xlane.xlu1 %1056 }
 0x3f9   :  { %5914 = vpow2.f32 %v1117_v22  ;;  %v1091_v25 = vsub.f32 %v6524_v53, %v1057_v24 }
 0x3fa   :  { %5916 = vpow2.f32 %v1111_v42 }
 0x3fb   :  { %v1113_v28 = vmul.f32 1.442695, %v1091_v25 }
 0x3fc   :  { %v1075_v30 = vpop.xlane.xlu1 %1074  ;;  %v1060_v31 = vpop.xlane.xlu0 %1059 }
 0x3fd   :  { %5918 = vpow2.f32 %v1113_v28  ;;  %v1097_v34 = vsub.f32 %v6530_v63, %v1075_v30  ;;  %v1092_v33 = vsub.f32 %v6534_v0, %v1060_v31 }
 0x3ff   :  { %v1125_v36 = vmul.f32 1.442695, %v1097_v34  ;;  %v1115_v53 = vmul.f32 1.442695, %v1092_v33 }
 0x400   :  { %v1066_v37 = vpop.xlane.xlu0 %1065  ;;  %v1069_v44 = vpop.xlane.xlu1 %1068 }
 0x401   :  { %5920 = vpow2.f32 %v1125_v36  ;;  %v1094_v45 = vsub.f32 %v6542_v13, %v1066_v37  ;;  %v1095_v38 = vsub.f32 %v6546_v18, %v1069_v44 }
 0x402   :  { %v6612_v39 = vpop.eup %5912 }
 0x403   :  { %v1119_v40 = vmul.f32 1.442695, %v1094_v45  ;;  %v1121_v46 = vmul.f32 1.442695, %v1095_v38  ;;  %v1145_v47 = vsel %vm1036_vm11, %v6612_v39, 0.0 }
 0x404   :  { %v1072_v48 = vpop.xlane.xlu0 %1071  ;;  %1146 = vadd.xlane.f32.xlu1 %v1145_v47 }
 0x405   :  { %5922 = vpow2.f32 %v1119_v40  ;;  %v1096_v0 = vsub.f32 %v6554_v27, %v1072_v48 }
 0x406   :  { %v6616_v63 = vpop.eup %5914  ;;  %5924 = vpow2.f32 %v1121_v46 }
 0x407   :  { %v6619_v49 = vpop.eup %5916  ;;  %5926 = vpow2.f32 %v1115_v53  ;;  %v1157_v13 = vsel %vm1036_vm11, %v6616_v63, 0.0  ;;  %v1123_v27 = vmul.f32 1.442695, %v1096_v0 }
 0x408   :  { %v1078_v18 = vpop.xlane.xlu0 %1077  ;;  %1158 = vadd.xlane.f32.xlu1 %v1157_v13  ;;  %v1081_v50 = vpop.xlane.xlu1 %1080  ;;  %v1148_v51 = vsel %vm1036_vm11, %v6619_v49, 0.0 }
 0x409   :  { %v1098_v52 = vsub.f32 %v6560_v32, %v1078_v18  ;;  %v1099_v54 = vsub.f32 %v6564_v35, %v1081_v50  ;;  %1149 = vadd.xlane.f32.xlu0 %v1148_v51 }
 0x40a   :  { %v6627_v55 = vpop.eup %5918 }
 0x40b   :  { %v1127_v56 = vmul.f32 1.442695, %v1098_v52  ;;  %v1129_v57 = vmul.f32 1.442695, %v1099_v54  ;;  %v1151_v58 = vsel %vm1036_vm11, %v6627_v55, 0.0 }
 0x40c   :  { %1152 = vadd.xlane.f32.xlu1 %v1151_v58  ;;  %v1084_v59 = vpop.xlane.xlu0 %1083  ;;  %v606_v28 = vpop.permute.xlu1 %605 }
 0x40d   :  { %5928 = vpow2.f32 %v1127_v56  ;;  %v1100_v19 = vsub.f32 %v6572_v43, %v1084_v59 }
 0x40e   :  { %v6632_v29 = vpop.eup %5920  ;;  %5930 = vpow2.f32 %v1129_v57 }
 0x40f   :  { %5932 = vpow2.f32 %v1123_v27  ;;  %v1131_v32 = vmul.f32 1.442695, %v1100_v19  ;;  %v1169_v35 = vsel %vm1036_vm11, %v6632_v29, 0.0 }
 0x410   :  { %1170 = vadd.xlane.f32.xlu1 %v1169_v35  ;;  %v612_v30 = vpop.permute.xlu1 %611  ;;  %v608_v31 = vpop.permute.xlu0 %607 }
 0x411   :  { %5934 = vpow2.f32 %v1131_v32 }
 0x412   :  { %v6636_v23 = vpop.eup %5922 }
 0x413   :  { %v6638_v5 = vpop.eup %5924  ;;  %v1160_v7 = vsel %vm1036_vm11, %v6636_v23, 0.0 }
 0x414   :  { %v6642_v10 = vpop.eup %5926  ;;  %v1163_v43 = vsel %vm1036_vm11, %v6638_v5, 0.0  ;;  %1161 = vadd.xlane.f32.xlu0 %v1160_v7  ;;  %v6668_v34 = vpop.permute.xlu1 %613 }
 0x415   :  { %1164 = vadd.xlane.f32.xlu1 %v1163_v43  ;;  %v1154_v11 = vsel %vm1036_vm11, %v6642_v10, 0.0 }
 0x418   :  { %1155 = vadd.xlane.f32.xlu0 %v1154_v11 }
 0x41a   :  { %v6648_v14 = vpop.eup %5928 }
 0x41b   :  { %v6650_v15 = vpop.eup %5930  ;;  %v1172_v20 = vsel %vm1036_vm11, %v6648_v14, 0.0 }
 0x41c   :  { %v6654_v21 = vpop.eup %5932  ;;  %v1175_v22 = vsel %vm1036_vm11, %v6650_v15, 0.0  ;;  %1173 = vadd.xlane.f32.xlu0 %v1172_v20 }
 0x41d   :  { %1176 = vadd.xlane.f32.xlu1 %v1175_v22  ;;  %v1166_v42 = vsel %vm1036_vm11, %v6654_v21, 0.0 }
 0x41e   :  { %v6660_v24 = vpop.eup %5934 }
 0x41f   :  { %v1178_v25 = vsel %vm1036_vm11, %v6660_v24, 0.0 }
 0x420   :  { %1167 = vadd.xlane.f32.xlu0 %v1166_v42 }
 0x424   :  { %1179 = vadd.xlane.f32.xlu0 %v1178_v25 }
 0x42e   :  { %619 = vrot.lane.b32.xlu1 %v6458_v1, %s6092_s25 }
 0x43a   :  { %617 = vrot.lane.b32.xlu0 %v6446_v61, %s6092_s25 }
 0x441   :  { %v1138_v33 = vpop.xlane.xlu0 %1137 }
 0x442   :  { %5936 = vrcp.f32 %v1138_v33 }
 0x445   :  { %v1135_v36 = vpop.xlane.xlu1 %1134  ;;  %v1144_v37 = vpop.xlane.xlu0 %1143 }
 0x446   :  { %5938 = vrcp.f32 %v1135_v36 }
 0x447   :  { %5940 = vrcp.f32 %v1144_v37 }
 0x449   :  { %v1141_v44 = vpop.xlane.xlu1 %1140 }
 0x44a   :  { %5942 = vrcp.f32 %v1141_v44 }
 0x44f   :  { %v5937_v45 = vpop.eup %5936 }
 0x450   :  { %v1184_v53 = vmul.f32 %v5937_v45, %v6588_v60 }
 0x453   :  { %v5939_v38 = vpop.eup %5938 }
 0x454   :  { %v1182_v1 = vmul.f32 %v5939_v38, %v6590_v62  ;;  %v5941_v40 = vpop.eup %5940 }
 0x455   :  { %v1188_v48 = vmul.f32 %v5941_v40, %v6594_v12  ;;  %v5766_v40 = vld [vmem:[%s7624_s6 + $0x38] sm:$0xff]  }
 0x456   :  { %v1213_v61 = vpack.c.bf16 %v1184_v53, %v1182_v1  ;;  %v5761_v1 = vld [vmem:[%s7624_s6] sm:$0xff]   ;;  %v5762_v53 = vld [vmem:[%s7624_s6 + $0x18] sm:$0xff]  }
 0x457   :  { %v5943_v46 = vpop.eup %5942 }
 0x458   :  { %5459 = vmatmul.mubr.msk.bf16.vlgmr.msra.gmra.mxu0 %vm1036_vm11, %v1213_v61  ;;  %v1186_v47 = vmul.f32 %v5943_v46, %v6600_v3 }
 0x459   :  { %5469 = vmatpush3.bf16.msra.mxu0 %v606_v28  ;;  %5470 = vmatprep.mubr.msk.bf16.mxu0 %vm6089_vm8, %v6088_v26 }
 0x45a   :  { %v1214_v0 = vpack.c.bf16 %v1188_v48, %v1186_v47  ;;  %5480 = vmatprep.subr.bf16.mxu0 %v6088_v26 }
 0x45c   :  { %5465 = vmatmul.mubr.msk.bf16.vlgmr.msra.gmra.mxu1 %vm1036_vm11, %v1214_v0 }
 0x45d   :  { %5475 = vmatpush3.bf16.msra.mxu1 %v608_v31  ;;  %5476 = vmatprep.mubr.msk.bf16.mxu1 %vm6089_vm8, %v6088_v26 }
 0x45e   :  { %5486 = vmatprep.subr.bf16.mxu1 %v6088_v26 }
 0x48d   :  { %v1147_v60 = vpop.xlane.xlu1 %1146 }
 0x48e   :  { %5944 = vrcp.f32 %v1147_v60 }
 0x491   :  { %v1159_v3 = vpop.xlane.xlu1 %1158 }
 0x492   :  { %v1150_v62 = vpop.xlane.xlu0 %1149 }
 0x493   :  { %5946 = vrcp.f32 %v1150_v62 }
 0x494   :  { %5948 = vrcp.f32 %v1159_v3 }
 0x495   :  { %v1153_v12 = vpop.xlane.xlu1 %1152 }
 0x499   :  { %v1171_v50 = vpop.xlane.xlu1 %1170 }
 0x49b   :  { %v5945_v18 = vpop.eup %5944 }
 0x49c   :  { %v1190_v54 = vmul.f32 %v5945_v18, %v6612_v39 }
 0x49d   :  { %v1162_v13 = vpop.xlane.xlu0 %1161 }
 0x49e   :  { %5950 = vrcp.f32 %v1162_v13  ;;  %v1165_v57 = vpop.xlane.xlu1 %1164  ;;  %v5767_v13 = vld [vmem:[%s7624_s6 + $0x30] sm:$0xff]  }
 0x49f   :  { %5952 = vrcp.f32 %v1153_v12 }
 0x4a0   :  { %v5947_v51 = vpop.eup %5946 }
 0x4a1   :  { %v1156_v52 = vpop.xlane.xlu0 %1155  ;;  %v1192_v27 = vmul.f32 %v5947_v51, %v6619_v49  ;;  %v5949_v59 = vpop.eup %5948 }
 0x4a2   :  { %5954 = vrcp.f32 %v1156_v52  ;;  %v1198_v49 = vmul.f32 %v5949_v59, %v6616_v63 }
 0x4a3   :  { %v1215_v56 = vpack.c.bf16 %v1192_v27, %v1190_v54  ;;  %5956 = vrcp.f32 %v1171_v50 }
 0x4a5   :  { %5471 = vmatmul.mubr.msk.bf16.vlgmr.msra.gmra.mxu0 %vm1036_vm11, %v1215_v56  ;;  %v1174_v58 = vpop.xlane.xlu0 %1173 }
 0x4a6   :  { %5481 = vmatpush3.bf16.msra.mxu0 %v612_v30  ;;  %5958 = vrcp.f32 %v1174_v58  ;;  %5482 = vmatprep.mubr.msk.bf16.mxu0 %vm6089_vm8, %v6088_v26  ;;  %v1177_v7 = vpop.xlane.xlu1 %1176 }
 0x4a7   :  { %5492 = vmatprep.subr.bf16.mxu0 %v6088_v26  ;;  %5960 = vrcp.f32 %v1165_v57 }
 0x4a9   :  { %v1168_v19 = vpop.xlane.xlu0 %1167 }
 0x4aa   :  { %5962 = vrcp.f32 %v1168_v19 }
 0x4ab   :  { %v5951_v39 = vpop.eup %5950 }
 0x4ac   :  { %v1200_v32 = vmul.f32 %v5951_v39, %v6636_v23  ;;  %v5953_v35 = vpop.eup %5952 }
 0x4ad   :  { %v1180_v43 = vpop.xlane.xlu0 %1179  ;;  %v1194_v22 = vmul.f32 %v5953_v35, %v6627_v55 }
 0x4ae   :  { %5964 = vrcp.f32 %v1180_v43  ;;  %v1217_v11 = vpack.c.bf16 %v1200_v32, %v1198_v49 }
 0x4af   :  { %v5955_v20 = vpop.eup %5954  ;;  %5966 = vrcp.f32 %v1177_v7  ;;  %v5765_v7 = vld [vmem:[%s7624_s6 + $0x20] sm:$0xff]  }
 0x4b0   :  { %5483 = vmatmul.mubr.msk.bf16.vlgmr.msra.gmra.mxu0 %vm1036_vm11, %v1217_v11  ;;  %v1196_v42 = vmul.f32 %v5955_v20, %v6642_v10  ;;  %v5957_v25 = vpop.eup %5956 }
 0x4b1   :  { %v618_v28 = vpop.permute.xlu0 %617  ;;  %5494 = vmatprep.mubr.msk.bf16.mxu0 %vm6089_vm8, %v6088_v26  ;;  %v1206_v30 = vmul.f32 %v5957_v25, %v6632_v29  ;;  %v5760_v29 = vld [vmem:[%s7624_s6 + $0x8] sm:$0xff]  }
 0x4b2   :  { %5493 = vmatpush3.bf16.msra.mxu0 %v618_v28  ;;  %v1216_v63 = vpack.c.bf16 %v1196_v42, %v1194_v22 }
 0x4b3   :  { %v5959_v23 = vpop.eup %5958  ;;  %5504 = vmatprep.subr.bf16.mxu0 %v5762_v53 }
 0x4b4   :  { %5477 = vmatmul.mubr.msk.bf16.vlgmr.msra.gmra.mxu1 %vm1036_vm11, %v1216_v63  ;;  %v1208_v31 = vmul.f32 %v5959_v23, %v6648_v14  ;;  %v5961_v33 = vpop.eup %5960 }
 0x4b5   :  { %5487 = vmatpush3.bf16.msra.mxu1 %v6668_v34  ;;  %5488 = vmatprep.mubr.msk.bf16.mxu1 %vm6089_vm8, %v6088_v26  ;;  %v1202_v36 = vmul.f32 %v5961_v33, %v6638_v5  ;;  %v620_v34 = vpop.permute.xlu1 %619 }
 0x4b6   :  { %v1219_v55 = vpack.c.bf16 %v1208_v31, %v1206_v30  ;;  %5498 = vmatprep.subr.bf16.mxu1 %v6088_v26 }
 0x4b7   :  { %v5963_v10 = vpop.eup %5962 }
 0x4b8   :  { %5495 = vmatmul.mubr.msk.bf16.vlgmr.msra.gmra.mxu0 %vm1036_vm11, %v1219_v55  ;;  %v1204_v37 = vmul.f32 %v5963_v10, %v6654_v21 }
 0x4b9   :  { %5505 = vmatpush3.bf16.msra.mxu0 %v5762_v53 }
 0x4ba   :  { %v1218_v44 = vpack.c.bf16 %v1204_v37, %v1202_v36 }
 0x4bb   :  { %v5965_v14 = vpop.eup %5964 }
 0x4bc   :  { %5489 = vmatmul.mubr.msk.bf16.vlgmr.msra.gmra.mxu1 %vm1036_vm11, %v1218_v44  ;;  %v5967_v45 = vpop.eup %5966  ;;  %v1212_v38 = vmul.f32 %v5965_v14, %v6660_v24  ;;  %v5764_v24 = vld [vmem:[%s7624_s6 + $0x28] sm:$0xff]  }
 0x4bd   :  { %5499 = vmatpush3.bf16.msra.mxu1 %v620_v34  ;;  %5500 = vmatprep.mubr.msk.bf16.mxu1 %vm6089_vm8, %v6088_v26  ;;  %v1210_v5 = vmul.f32 %v5967_v45, %v6650_v15  ;;  %v5763_v15 = vld [vmem:[%s7624_s6 + $0x10] sm:$0xff]  }
 0x4be   :  { %5512 = vmatprep.subr.bf16.mxu1 %v5760_v29  ;;  %5506 = vmatprep.subr.bf16.mxu0 %v5763_v15 }
 0x4bf   :  { %v1220_v21 = vpack.c.bf16 %v1212_v38, %v1210_v5  ;;  %5507 = vmatpush3.bf16.msra.mxu0 %v5763_v15 }
 0x4c0   :  { %5520 = vmatprep.subr.bf16.mxu0 %v5764_v24 }
 0x4c4   :  { %5501 = vmatmul.mubr.msk.bf16.vlgmr.msra.gmra.mxu1 %vm1036_vm11, %v1220_v21 }
 0x4c5   :  { %5513 = vmatpush3.bf16.msra.mxu1 %v5760_v29 }
 0x4c6   :  { %5514 = vmatprep.subr.bf16.mxu1 %v5761_v1 }
 0x4c9   :  { %5515 = vmatpush3.bf16.msra.mxu1 %v5761_v1 }
 0x4ca   :  { %5528 = vmatprep.subr.bf16.mxu1 %v5766_v40 }
 0x518   :  { %v1258_v61 = vpop.f32.mrf.mxu0 }
 0x51a   :  { %v5460_v46 = vpop.f32.mrf.mxu0 }
 0x51c   :  { %v1261_v47 = vpop.f32.mrf.mxu0  ;;  %v1302_v48 = vpop.f32.mrf.mxu1 }
 0x51d   :  { %v1589_v0 = vpack.c.bf16 %v1261_v47, %v1258_v61 }
 0x51e   :  { %v5461_v60 = vpop.f32.mrf.mxu0  ;;  %v5466_v62 = vpop.f32.mrf.mxu1 }
 0x51f   :  { %5516 = vmatprep.mubr.msk.bf16.mxu1 %vm623_vm9, %v1589_v0 }
 0x520   :  { %v1305_v3 = vpop.f32.mrf.mxu1 }
 0x521   :  { %v1590_v12 = vpack.c.bf16 %v1305_v3, %v1302_v48 }
 0x522   :  { %v5467_v18 = vpop.f32.mrf.mxu1 }
 0x523   :  { %5517 = vmatmul.mubr.msk.bf16.vlgmr.msra.gmra.mxu1 %vm623_vm9, %v1590_v12  ;;  %v4825_v12 = vld [vmem:[%s7625_s7] ss:$0 sm:$0xff] }
 0x524   :  { %5529 = vmatpush3.bf16.msra.mxu1 %v5766_v40 }
 0x525   :  { %5530 = vmatprep.subr.bf16.mxu1 %v5767_v13 }
 0x528   :  { %5531 = vmatpush3.bf16.msra.mxu1 %v5767_v13 }
 0x565   :  { %v1346_v50 = vpop.f32.mrf.mxu0 }
 0x567   :  { %v5472_v51 = vpop.f32.mrf.mxu0 }
 0x569   :  { %v1349_v52 = vpop.f32.mrf.mxu0 }
 0x56a   :  { %v1591_v54 = vpack.c.bf16 %v1349_v52, %v1346_v50 }
 0x56b   :  { %v5473_v27 = vpop.f32.mrf.mxu0 }
 0x56c   :  { %5508 = vmatprep.mubr.msk.bf16.mxu0 %vm623_vm9, %v1591_v54 }
 0x570   :  { %v1434_v56 = vpop.f32.mrf.mxu0 }
 0x572   :  { %v5484_v57 = vpop.f32.mrf.mxu0 }
 0x574   :  { %v1390_v58 = vpop.f32.mrf.mxu1  ;;  %v1437_v59 = vpop.f32.mrf.mxu0 }
 0x575   :  { %v1727_v43 = vpack.c.bf16 %v1437_v59, %v1434_v56 }
 0x576   :  { %v5478_v19 = vpop.f32.mrf.mxu1  ;;  %v5485_v39 = vpop.f32.mrf.mxu0 }
 0x578   :  { %v1393_v49 = vpop.f32.mrf.mxu1  ;;  %v1522_v32 = vpop.f32.mrf.mxu0 }
 0x579   :  { %v1592_v35 = vpack.c.bf16 %v1393_v49, %v1390_v58 }
 0x57a   :  { %v5479_v11 = vpop.f32.mrf.mxu1  ;;  %v5496_v20 = vpop.f32.mrf.mxu0 }
 0x57b   :  { %5509 = vmatmul.mubr.msk.bf16.vlgmr.msra.gmra.mxu0 %vm623_vm9, %v1592_v35 }
 0x57c   :  { %v1478_v22 = vpop.f32.mrf.mxu1  ;;  %v1525_v42 = vpop.f32.mrf.mxu0  ;;  %5521 = vmatpush3.bf16.msra.mxu0 %v5764_v24  ;;  %5524 = vmatprep.mubr.msk.bf16.mxu0 %vm623_vm9, %v1727_v43 }
 0x57d   :  { %v1800_v25 = vpack.c.bf16 %v1525_v42, %v1522_v32  ;;  %5522 = vmatprep.subr.bf16.mxu0 %v5765_v7 }
 0x57e   :  { %v5490_v28 = vpop.f32.mrf.mxu1  ;;  %v5497_v63 = vpop.f32.mrf.mxu0 }
 0x57f   :  { %5532 = vmatprep.mubr.msk.bf16.mxu1 %vm623_vm9, %v1800_v25 }
 0x580   :  { %v1481_v23 = vpop.f32.mrf.mxu1  ;;  %5523 = vmatpush3.bf16.msra.mxu0 %v5765_v7 }
 0x581   :  { %v1728_v30 = vpack.c.bf16 %v1481_v23, %v1478_v22 }
 0x582   :  { %v5491_v31 = vpop.f32.mrf.mxu1 }
 0x583   :  { %5525 = vmatmul.mubr.msk.bf16.vlgmr.msra.gmra.mxu0 %vm623_vm9, %v1728_v30  ;;  %v5770_v31 = vld [vmem:[%s7628_s10 + $0x74] ss:$8 sps:$4 sm:$0xff]  }
 0x584   :  { %v1566_v33 = vpop.f32.mrf.mxu1  ;;  %2101 = vmatprep.mubr.bf16.mxu0 %v6086_v2  ;;  %2069 = vmatprep.subr.bf16.mxu0 %v5770_v31 }
 0x586   :  { %v5502_v55 = vpop.f32.mrf.mxu1 }
 0x587   :  { %v5773_v55 = vld [vmem:[%s7628_s10 + $0x64] ss:$8 sps:$4 sm:$0xff]  }
 0x588   :  { %v1569_v10 = vpop.f32.mrf.mxu1 }
 0x589   :  { %v1801_v36 = vpack.c.bf16 %v1569_v10, %v1566_v33  ;;  %v5768_v33 = vld [vmem:[%s7628_s10 + $0x70] ss:$8 sps:$4 sm:$0xff]   ;;  %v5771_v10 = vld [vmem:[%s7628_s10 + $0x60] ss:$8 sps:$4 sm:$0xff]  }
 0x58a   :  { %v5503_v37 = vpop.f32.mrf.mxu1  ;;  %2070 = vmatpush1.bf16.msra.mxu0 %v5768_v33 }
 0x58b   :  { %5533 = vmatmul.mubr.msk.bf16.vlgmr.msra.gmra.mxu1 %vm623_vm9, %v1801_v36  ;;  %2071 = vmatprep.subr.bf16.mxu0 %v5773_v55  ;;  %v5776_v36 = vld [vmem:[%s7628_s10 + $0x54] ss:$8 sps:$4 sm:$0xff]   ;;  %v5774_v37 = vld [vmem:[%s7628_s10 + $0x50] ss:$8 sps:$4 sm:$0xff]  }
 0x58e   :  { %2072 = vmatpush1.bf16.msra.mxu0 %v5771_v10 }
 0x58f   :  { %2073 = vmatprep.subr.bf16.mxu0 %v5776_v36 }
 0x592   :  { %2074 = vmatpush1.bf16.msra.mxu0 %v5774_v37 }
 0x5e3   :  { %v5518_v29 = vpop.f32.mrf.mxu1 }
 0x5e5   :  { %v1712_v45 = vpop.f32.mrf.mxu1 }
 0x5e7   :  { %v5519_v21 = vpop.f32.mrf.mxu1 }
 0x5e9   :  { %v1715_v53 = vpop.f32.mrf.mxu1 }
 0x63b   :  { %v5510_v44 = vpop.f32.mrf.mxu0 }
 0x63c   :  { %v1721_v61 = vadd.f32 %v5518_v29, %v5510_v44  ;;  %v5779_v44 = vld [vmem:[%s7628_s10 + $0x44] ss:$8 sps:$4 sm:$0xff]   ;;  %v5777_v29 = vld [vmem:[%s7628_s10 + $0x40] ss:$8 sps:$4 sm:$0xff]  }
 0x63d   :  { %v1645_v14 = vpop.f32.mrf.mxu0  ;;  %2075 = vmatprep.subr.bf16.mxu0 %v5779_v44 }
 0x63e   :  { %v1713_v24 = vadd.f32 %v1712_v45, %v1645_v14  ;;  %2076 = vmatpush1.bf16.msra.mxu0 %v5777_v29  ;;  %v5782_v14 = vld [vmem:[%s7628_s10 + $0x34] ss:$8 sps:$4 sm:$0xff]   ;;  %v5785_v45 = vld [vmem:[%s7628_s10 + $0x24] ss:$8 sps:$4 sm:$0xff]  }
 0x63f   :  { %v5511_v34 = vpop.f32.mrf.mxu0  ;;  %2077 = vmatprep.subr.bf16.mxu0 %v5782_v14 }
 0x640   :  { %v1724_v13 = vadd.f32 %v5519_v21, %v5511_v34  ;;  %v5780_v34 = vld [vmem:[%s7628_s10 + $0x30] ss:$8 sps:$4 sm:$0xff]  }
 0x641   :  { %v1648_v38 = vpop.f32.mrf.mxu0  ;;  %v5786_v21 = vld [vmem:[%s7628_s10 + $0x10] ss:$8 sps:$4 sm:$0xff]  }
 0x642   :  { %v1716_v0 = vadd.f32 %v1715_v53, %v1648_v38  ;;  %2078 = vmatpush1.bf16.msra.mxu0 %v5780_v34  ;;  %v5783_v38 = vld [vmem:[%s7628_s10 + $0x20] ss:$8 sps:$4 sm:$0xff]  }
 0x643   :  { %v5526_v5 = vpop.f32.mrf.mxu0  ;;  %2079 = vmatprep.subr.bf16.mxu0 %v5785_v45  ;;  %v5789_v53 = vld [vmem:[%s7628_s10] ss:$8 sps:$4 sm:$0xff]  }
 0x644   :  { %v1798_v60 = vadd.f32 %v5526_v5, %v1721_v61  ;;  %v5788_v5 = vld [vmem:[%s7628_s10 + $0x14] ss:$8 sps:$4 sm:$0xff]   ;;  %v5804_v34 = vld [vmem:[%s7630_s12 + $0x48] sm:$0xff]  }
 0x645   :  { %v1781_v1 = vpop.f32.mrf.mxu0  ;;  %v5795_v61 = vld [vmem:[%s7630_s12 + $0x30] sm:$0xff]   ;;  %v5805_v45 = vld [vmem:[%s7630_s12 + $0x8] sm:$0xff]  }
 0x646   :  { %v1796_v46 = vadd.f32 %v1781_v1, %v1713_v24  ;;  %2080 = vmatpush1.bf16.msra.mxu0 %v5783_v38  ;;  %v5791_v1 = vld [vmem:[%s7628_s10 + $0x4] ss:$8 sps:$4 sm:$0xff]   ;;  %v5793_v24 = vld [vmem:[%s7630_s12 + $0x38] sm:$0xff]  }
 0x647   :  { %v5527_v15 = vpop.f32.mrf.mxu0  ;;  %2081 = vmatprep.subr.bf16.mxu0 %v5788_v5  ;;  %v5806_v38 = vld [vmem:[%s7630_s12 + $0x40] sm:$0xff]  }
 0x648   :  { %v1799_v54 = vadd.f32 %v5527_v15, %v1724_v13  ;;  %v5792_v15 = vld [vmem:[%s7630_s12 + $0x78] sm:$0xff]   ;;  %v5807_v5 = vld [vmem:[%s7630_s12] sm:$0xff]  }
 0x649   :  { %v1784_v47 = vpop.f32.mrf.mxu0  ;;  %5214 = vmatprep.subr.bf16.mxu1 %v5792_v15 }
 0x64a   :  { %v1797_v18 = vadd.f32 %v1784_v47, %v1716_v0  ;;  %2082 = vmatpush1.bf16.msra.mxu0 %v5786_v21  ;;  %5215 = vmatpush3.bf16.msra.mxu1 %v5793_v24  ;;  %v5797_v47 = vld [vmem:[%s7630_s12 + $0x28] sm:$0xff]   ;;  %v5799_v0 = vld [vmem:[%s7630_s12 + $0x20] sm:$0xff]   ;;  %v6895_v21 = vsub.s32 1, %v6466_v4 }
 0x64b   :  { %v5534_v40 = vpop.f32.mrf.mxu1  ;;  %2083 = vmatprep.subr.bf16.mxu0 %v5791_v1  ;;  %v6898_v1 = vsub.s32 0, %v6466_v4 }
 0x64c   :  { %v1871_v50 = vadd.f32 %v5534_v40, %v1798_v60  ;;  %v5794_v40 = vld [vmem:[%s7630_s12 + $0x70] sm:$0xff]   ;;  %v5800_v60 = vld [vmem:[%s7630_s12 + $0x58] sm:$0xff]  }
 0x64d   :  { %v1854_v48 = vpop.f32.mrf.mxu1  ;;  %5216 = vmatprep.subr.bf16.mxu1 %v5794_v40 }
 0x64e   :  { %v1869_v62 = vadd.f32 %v1854_v48, %v1796_v46  ;;  %v1882_v58 = vadd.f32 %v4825_v12, %v1871_v50  ;;  %2084 = vmatpush1.bf16.msra.mxu0 %v5789_v53  ;;  %v5796_v46 = vld [vmem:[%s7630_s12 + $0x68] sm:$0xff]   ;;  %5217 = vmatpush3.bf16.msra.mxu1 %v5795_v61  ;;  %v5798_v48 = vld [vmem:[%s7630_s12 + $0x60] sm:$0xff]  }
 0x64f   :  { %v5535_v3 = vpop.f32.mrf.mxu1  ;;  %5218 = vmatprep.subr.bf16.mxu1 %v5796_v46  ;;  %v1977_v53 = vld [vmem:[%s7629_s11] sm:$0x3] }
 0x650   :  { %v1880_v51 = vadd.f32 %v4825_v12, %v1869_v62  ;;  %v1872_v56 = vadd.f32 %v5535_v3, %v1799_v54  ;;  %v5801_v62 = vld [vmem:[%s7630_s12 + $0x18] sm:$0xff]   ;;  %v1986_v24 = vrot.slane %v1977_v53, %v6895_v21  ;;  %v1982_v40 = vrot.slane %v1977_v53, %v6898_v1 }
 0x651   :  { %v1857_v52 = vpop.f32.mrf.mxu1 }
 0x652   :  { %v1870_v27 = vadd.f32 %v1857_v52, %v1797_v18  ;;  %1886 = vadd.xlane.f32.xlu0 %v1880_v51  ;;  %v1883_v59 = vadd.f32 %v4825_v12, %v1872_v56  ;;  %5219 = vmatpush3.bf16.msra.mxu1 %v5797_v47 }
 0x653   :  { %5220 = vmatprep.subr.bf16.mxu1 %v5798_v48 }
 0x654   :  { %v1881_v57 = vadd.f32 %v4825_v12, %v1870_v27 }
 0x656   :  { %1888 = vadd.xlane.f32.xlu1 %v1881_v57  ;;  %1890 = vadd.xlane.f32.xlu0 %v1882_v58 }
 0x657   :  { %5221 = vmatpush3.bf16.msra.mxu1 %v5799_v0 }
 0x658   :  { %5222 = vmatprep.subr.bf16.mxu1 %v5800_v60 }
 0x65a   :  { %1892 = vadd.xlane.f32.xlu0 %v1883_v59 }
 0x65b   :  { %5223 = vmatpush3.bf16.msra.mxu1 %v5801_v62 }
 0x6db   :  { %v1887_v19 = vpop.xlane.xlu0 %1886 }
 0x6dc   :  { %v1895_v39 = vmul.f32 0.0078125, %v1887_v19  ;;  %v4826_v19 = vld [vmem:[%s7626_s8] ss:$0 sm:$0xff] }
 0x6de   :  { %v6747_v49 = vsub.f32 %v1880_v51, %v1895_v39 }
 0x6df   :  { %v1889_v32 = vpop.xlane.xlu1 %1888  ;;  %v1891_v35 = vpop.xlane.xlu0 %1890 }
 0x6e0   :  { %v1896_v7 = vmul.f32 0.0078125, %v1889_v32  ;;  %v1897_v43 = vmul.f32 0.0078125, %v1891_v35  ;;  %v1903_v11 = vmul.f32 %v6747_v49, %v6747_v49  ;;  %v4827_v32 = vld [vmem:[%s7627_s9] ss:$0 sm:$0xff] }
 0x6e2   :  { %v6751_v20 = vsub.f32 %v1881_v57, %v1896_v7  ;;  %v6753_v22 = vsub.f32 %v1882_v58, %v1897_v43  ;;  %1907 = vadd.xlane.f32.xlu1 %v1903_v11 }
 0x6e3   :  { %v1893_v42 = vpop.xlane.xlu0 %1892 }
 0x6e4   :  { %v1898_v25 = vmul.f32 0.0078125, %v1893_v42  ;;  %v1904_v28 = vmul.f32 %v6751_v20, %v6751_v20  ;;  %v1905_v63 = vmul.f32 %v6753_v22, %v6753_v22 }
 0x6e6   :  { %v6759_v23 = vsub.f32 %v1883_v59, %v1898_v25  ;;  %1909 = vadd.xlane.f32.xlu0 %v1904_v28  ;;  %1911 = vadd.xlane.f32.xlu1 %v1905_v63 }
 0x6e8   :  { %v1906_v30 = vmul.f32 %v6759_v23, %v6759_v23 }
 0x6ea   :  { %1913 = vadd.xlane.f32.xlu0 %v1906_v30 }
 0x76b   :  { %v1908_v3 = vpop.xlane.xlu1 %1907 }
 0x76c   :  { %v1915_v12 = vmul.f32 0.0078125, %v1908_v3 }
 0x76e   :  { %v1919_v13 = vadd.f32 1e-05, %v1915_v12 }
 0x76f   :  { %v1912_v18 = vpop.xlane.xlu1 %1911  ;;  %v1910_v50 = vpop.xlane.xlu0 %1909 }
 0x770   :  { %5968 = vrsqrt.f32 %v1919_v13  ;;  %v1917_v51 = vmul.f32 0.0078125, %v1912_v18  ;;  %v1916_v52 = vmul.f32 0.0078125, %v1910_v50 }
 0x772   :  { %v1921_v54 = vadd.f32 1e-05, %v1917_v51  ;;  %v1920_v27 = vadd.f32 1e-05, %v1916_v52 }
 0x773   :  { %v1914_v56 = vpop.xlane.xlu0 %1913 }
 0x774   :  { %5970 = vrsqrt.f32 %v1921_v54  ;;  %v1918_v57 = vmul.f32 0.0078125, %v1914_v56 }
 0x775   :  { %5972 = vrsqrt.f32 %v1920_v27 }
 0x776   :  { %v1922_v58 = vadd.f32 1e-05, %v1918_v57 }
 0x778   :  { %5974 = vrsqrt.f32 %v1922_v58 }
 0x77d   :  { %v5969_v59 = vpop.eup %5968 }
 0x77e   :  { %v1927_v39 = vmul.f32 %v5969_v59, %v6747_v49 }
 0x780   :  { %v1937_v35 = vmul.f32 %v4826_v19, %v1927_v39 }
 0x781   :  { %v5971_v7 = vpop.eup %5970 }
 0x782   :  { %v5973_v43 = vpop.eup %5972  ;;  %v1947_v42 = vadd.f32 %v4827_v32, %v1937_v35  ;;  %v1929_v25 = vmul.f32 %v5971_v7, %v6753_v22 }
 0x783   :  { %v1928_v11 = vmul.f32 %v5973_v43, %v6751_v20 }
 0x784   :  { %v6852_v33 = vadd.f32 %v1947_v42, %v6366_v8  ;;  %v1939_v49 = vmul.f32 %v4826_v19, %v1929_v25  ;;  %v4844_v25 = vld [vmem:[%s7631_s13] ss:$0 sm:$0xff] }
 0x785   :  { %v5975_v28 = vpop.eup %5974  ;;  %v1938_v63 = vmul.f32 %v4826_v19, %v1928_v11 }
 0x786   :  { %v1930_v30 = vmul.f32 %v5975_v28, %v6759_v23  ;;  %v1955_v37 = vmax.f32 %v6852_v33, 0.0  ;;  %v1949_v44 = vadd.f32 %v4827_v32, %v1939_v49 }
 0x787   :  { %v1948_v31 = vadd.f32 %v4827_v32, %v1938_v63 }
 0x788   :  { %v1940_v55 = vmul.f32 %v4826_v19, %v1930_v30  ;;  %v6867_v8 = vadd.f32 %v1949_v44, %v6372_v16  ;;  %v5803_v16 = vld [vmem:[%s7630_s12 + $0x10] sm:$0xff]  }
 0x789   :  { %v6855_v10 = vadd.f32 %v1948_v31, %v6368_v9 }
 0x78a   :  { %v1950_v36 = vadd.f32 %v4827_v32, %v1940_v55  ;;  %v1957_v29 = vmax.f32 %v6867_v8, 0.0  ;;  %v5827_v8 = vld [vmem:[%s7623_s5 + $0x60] sm:$0xff]  }
 0x78b   :  { %v1956_v20 = vmax.f32 %v6855_v10, 0.0 }
 0x78c   :  { %v6864_v23 = vadd.f32 %v1950_v36, %v6374_v17  ;;  %v5802_v17 = vld [vmem:[%s7630_s12 + $0x50] sm:$0xff]  }
 0x78d   :  { %v1959_v22 = vpack.c.bf16 %v1956_v20, %v1955_v37  ;;  %5224 = vmatprep.subr.bf16.mxu1 %v5802_v17 }
 0x78e   :  { %v1958_v9 = vmax.f32 %v6864_v23, 0.0  ;;  %5225 = vmatpush3.bf16.msra.mxu1 %v5803_v16  ;;  %v5826_v23 = vld [vmem:[%s7623_s5 + $0x68] sm:$0xff]  }
 0x78f   :  { %2102 = vmatmul.mubr.bf16.vlgmr.msra.gmra.mxu0 %v1959_v22  ;;  %5226 = vmatprep.subr.bf16.mxu1 %v5804_v34 }
 0x790   :  { %2111 = vmatprep.mubr.bf16.mxu0 %v6086_v2  ;;  %v1960_v14 = vpack.c.bf16 %v1958_v9, %v1957_v29 }
 0x792   :  { %5227 = vmatpush3.bf16.msra.mxu1 %v5805_v45 }
 0x793   :  { %5228 = vmatprep.subr.bf16.mxu1 %v5806_v38 }
 0x796   :  { %5229 = vmatpush3.bf16.msra.mxu1 %v5807_v5 }
 0x797   :  { %2112 = vmatmul.mubr.bf16.gmra.mxu0 %v1960_v14 }
 0x84f   :  { %v2103_v15 = vpop.f32.mrf.mxu0 }
 0x850   :  { %v2104_v0 = vadd.f32 %v2103_v15, %v1982_v40 }
 0x851   :  { %v2105_v61 = vpop.f32.mrf.mxu0 }
 0x852   :  { %v2106_v47 = vadd.f32 %v2105_v61, %v1986_v24  ;;  %v2122_v18 = vmax.f32 %v2104_v0, 0.0 }
 0x853   :  { %v2107_v46 = vpop.f32.mrf.mxu0 }
 0x854   :  { %v2108_v48 = vadd.f32 %v2107_v46, %v1982_v40  ;;  %v2123_v4 = vmax.f32 %v2106_v47, 0.0 }
 0x855   :  { %v2109_v60 = vpop.f32.mrf.mxu0 }
 0x856   :  { %v2110_v62 = vadd.f32 %v2109_v60, %v1986_v24  ;;  %v2124_v3 = vmax.f32 %v2108_v48, 0.0 }
 0x857   :  { %v2113_v12 = vpop.f32.mrf.mxu0 }
 0x858   :  { %v2125_v13 = vmax.f32 %v2110_v62, 0.0  ;;  %v2130_v52 = vpack.c.bf16 %v2124_v3, %v2122_v18  ;;  %v2114_v57 = vadd.f32 %v2113_v12, %v1982_v40  ;;  %v5809_v18 = vld [vmem:[%s7622_s4 + $0x78] sm:$0xff]  }
 0x859   :  { %v2115_v50 = vpop.f32.mrf.mxu0  ;;  %5556 = vmatprep.subr.bf16.mxu1 %v5809_v18 }
 0x85a   :  { %v2131_v51 = vpack.c.bf16 %v2125_v13, %v2123_v4  ;;  %v2116_v27 = vadd.f32 %v2115_v50, %v1986_v24  ;;  %v2126_v35 = vmax.f32 %v2114_v57, 0.0  ;;  %v5808_v13 = vld [vmem:[%s7621_s3 + $0x78] sm:$0xff]   ;;  %v5810_v50 = vld [vmem:[%s7621_s3 + $0x70] sm:$0xff]  }
 0x85b   :  { %v2117_v54 = vpop.f32.mrf.mxu0  ;;  %5536 = vmatprep.subr.bf16.mxu0 %v5808_v13  ;;  %v5816_v57 = vld [vmem:[%s7621_s3 + $0x58] sm:$0xff]  }
 0x85c   :  { %v2118_v56 = vadd.f32 %v2117_v54, %v1982_v40  ;;  %2301 = vmatprep.mubr.bf16.mxu1 %v2131_v51  ;;  %v2127_v39 = vmax.f32 %v2116_v27, 0.0  ;;  %5537 = vmatpush3.bf16.msra.mxu0 %v5808_v13  ;;  %v5811_v51 = vld [vmem:[%s7622_s4 + $0x70] sm:$0xff]   ;;  %v5813_v54 = vld [vmem:[%s7622_s4 + $0x68] sm:$0xff]   ;;  %v5814_v27 = vld [vmem:[%s7621_s3 + $0x60] sm:$0xff]  }
 0x85d   :  { %v2119_v58 = vpop.f32.mrf.mxu0  ;;  %2302 = vmatmul.mubr.bf16.vlgmr.msra.gmra.mxu1 %v2130_v52  ;;  %5538 = vmatprep.subr.bf16.mxu0 %v5810_v50  ;;  %v5812_v52 = vld [vmem:[%s7621_s3 + $0x68] sm:$0xff]  }
 0x85e   :  { %v2120_v59 = vadd.f32 %v2119_v58, %v1986_v24  ;;  %v2128_v19 = vmax.f32 %v2118_v56, 0.0  ;;  %5557 = vmatpush3.bf16.msra.mxu1 %v5809_v18  ;;  %v5815_v56 = vld [vmem:[%s7622_s4 + $0x60] sm:$0xff]   ;;  %v5817_v58 = vld [vmem:[%s7622_s4 + $0x58] sm:$0xff]  }
 0x85f   :  { %5558 = vmatprep.subr.bf16.mxu1 %v5811_v51 }
 0x860   :  { %v2129_v32 = vmax.f32 %v2120_v59, 0.0  ;;  %v2132_v43 = vpack.c.bf16 %v2128_v19, %v2126_v35  ;;  %5539 = vmatpush3.bf16.msra.mxu0 %v5810_v50  ;;  %v5818_v59 = vld [vmem:[%s7621_s3 + $0x50] sm:$0xff]   ;;  %v5822_v35 = vld [vmem:[%s7621_s3 + $0x40] sm:$0xff]  }
 0x861   :  { %5540 = vmatprep.subr.bf16.mxu0 %v5812_v52  ;;  %v5819_v19 = vld [vmem:[%s7622_s4 + $0x50] sm:$0xff]  }
 0x862   :  { %v2133_v7 = vpack.c.bf16 %v2129_v32, %v2127_v39  ;;  %5559 = vmatpush3.bf16.msra.mxu1 %v5811_v51  ;;  %v5820_v39 = vld [vmem:[%s7621_s3 + $0x48] sm:$0xff]   ;;  %v5825_v51 = vld [vmem:[%s7623_s5 + $0x70] sm:$0xff]  }
 0x863   :  { %5560 = vmatprep.subr.bf16.mxu1 %v5813_v54  ;;  %v5821_v32 = vld [vmem:[%s7622_s4 + $0x48] sm:$0xff]  }
 0x864   :  { %2309 = vmatprep.mubr.bf16.mxu1 %v2133_v7  ;;  %5541 = vmatpush3.bf16.msra.mxu0 %v5812_v52  ;;  %v5823_v7 = vld [vmem:[%s7622_s4 + $0x40] sm:$0xff]   ;;  %v5830_v52 = vld [vmem:[%s7623_s5 + $0x48] sm:$0xff]  }
 0x865   :  { %2310 = vmatmul.mubr.bf16.gmra.mxu1 %v2132_v43  ;;  %5542 = vmatprep.subr.bf16.mxu0 %v5814_v27  ;;  %v5824_v43 = vld [vmem:[%s7623_s5 + $0x78] sm:$0xff]  }
 0x866   :  { %5561 = vmatpush3.bf16.msra.mxu1 %v5813_v54  ;;  %v5831_v54 = vld [vmem:[%s7623_s5 + $0x40] sm:$0xff]  }
 0x867   :  { %5562 = vmatprep.subr.bf16.mxu1 %v5815_v56 }
 0x868   :  { %5543 = vmatpush3.bf16.msra.mxu0 %v5814_v27 }
 0x869   :  { %5544 = vmatprep.subr.bf16.mxu0 %v5816_v57 }
 0x86a   :  { %5563 = vmatpush3.bf16.msra.mxu1 %v5815_v56 }
 0x86b   :  { %5564 = vmatprep.subr.bf16.mxu1 %v5817_v58 }
 0x86c   :  { %5545 = vmatpush3.bf16.msra.mxu0 %v5816_v57 }
 0x86d   :  { %5546 = vmatprep.subr.bf16.mxu0 %v5818_v59 }
 0x86e   :  { %5565 = vmatpush3.bf16.msra.mxu1 %v5817_v58 }
 0x86f   :  { %5566 = vmatprep.subr.bf16.mxu1 %v5819_v19 }
 0x870   :  { %5547 = vmatpush3.bf16.msra.mxu0 %v5818_v59 }
 0x871   :  { %5548 = vmatprep.subr.bf16.mxu0 %v5820_v39 }
 0x872   :  { %5567 = vmatpush3.bf16.msra.mxu1 %v5819_v19 }
 0x873   :  { %5568 = vmatprep.subr.bf16.mxu1 %v5821_v32 }
 0x874   :  { %5549 = vmatpush3.bf16.msra.mxu0 %v5820_v39 }
 0x875   :  { %5550 = vmatprep.subr.bf16.mxu0 %v5822_v35 }
 0x876   :  { %5569 = vmatpush3.bf16.msra.mxu1 %v5821_v32 }
 0x877   :  { %5570 = vmatprep.subr.bf16.mxu1 %v5823_v7 }
 0x878   :  { %5551 = vmatpush3.bf16.msra.mxu0 %v5822_v35 }
 0x879   :  { %5576 = vmatprep.subr.bf16.mxu0 %v5824_v43 }
 0x87a   :  { %5571 = vmatpush3.bf16.msra.mxu1 %v5823_v7 }
 0x87b   :  { %5596 = vmatprep.subr.bf16.mxu1 %v6088_v26 }
 0x91d   :  { %v5230_v11 = vpop.f32.mrf.mxu1 }
 0x91f   :  { %v5231_v42 = vpop.f32.mrf.mxu1 }
 0x920   :  { %v5232_v28 = vadd.f32 %v5231_v42, %v5230_v11 }
 0x921   :  { %v5233_v63 = vpop.f32.mrf.mxu1 }
 0x922   :  { %v2304_v30 = vadd.f32 %v5232_v28, %v4844_v25 }
 0x923   :  { %v5234_v31 = vpop.f32.mrf.mxu1 }
 0x924   :  { %v5235_v49 = vadd.f32 %v5234_v31, %v5233_v63  ;;  %2320 = vadd.xlane.f32.xlu1 %v2304_v30 }
 0x925   :  { %v5236_v55 = vpop.f32.mrf.mxu1 }
 0x926   :  { %v2307_v36 = vadd.f32 %v5235_v49, %v4844_v25 }
 0x927   :  { %v5237_v44 = vpop.f32.mrf.mxu1 }
 0x928   :  { %v5238_v22 = vadd.f32 %v5237_v44, %v5236_v55  ;;  %2322 = vadd.xlane.f32.xlu0 %v2307_v36 }
 0x929   :  { %v5239_v14 = vpop.f32.mrf.mxu1 }
 0x92a   :  { %v2312_v17 = vadd.f32 %v5238_v22, %v4844_v25 }
 0x92b   :  { %v5240_v16 = vpop.f32.mrf.mxu1 }
 0x92c   :  { %v5241_v34 = vadd.f32 %v5240_v16, %v5239_v14  ;;  %2324 = vadd.xlane.f32.xlu1 %v2312_v17 }
 0x92e   :  { %v2315_v45 = vadd.f32 %v5241_v34, %v4844_v25  ;;  %v4862_v34 = vld [vmem:[%s7633_s15] ss:$0 sm:$0xff] }
 0x930   :  { %2326 = vadd.xlane.f32.xlu0 %v2315_v45 }
 0x9ad   :  { %v2321_v38 = vpop.xlane.xlu1 %2320 }
 0x9ae   :  { %v2328_v5 = vmul.f32 0.0078125, %v2321_v38 }
 0x9b0   :  { %v6908_v53 = vsub.f32 %v2304_v30, %v2328_v5 }
 0x9b1   :  { %v2323_v15 = vpop.xlane.xlu0 %2322 }
 0x9b2   :  { %v2329_v24 = vmul.f32 0.0078125, %v2323_v15  ;;  %v2336_v40 = vmul.f32 %v6908_v53, %v6908_v53 }
 0x9b4   :  { %v6912_v61 = vsub.f32 %v2307_v36, %v2329_v24  ;;  %2340 = vadd.xlane.f32.xlu1 %v2336_v40 }
 0x9b5   :  { %v2325_v46 = vpop.xlane.xlu1 %2324 }
 0x9b6   :  { %v2330_v47 = vmul.f32 0.0078125, %v2325_v46  ;;  %v2337_v48 = vmul.f32 %v6912_v61, %v6912_v61 }
 0x9b8   :  { %v6916_v0 = vsub.f32 %v2312_v17, %v2330_v47  ;;  %2342 = vadd.xlane.f32.xlu0 %v2337_v48  ;;  %v4861_v17 = vld [vmem:[%s7632_s14] ss:$0 sm:$0xff] }
 0x9b9   :  { %v2327_v60 = vpop.xlane.xlu0 %2326 }
 0x9ba   :  { %v2331_v62 = vmul.f32 0.0078125, %v2327_v60  ;;  %v2338_v3 = vmul.f32 %v6916_v0, %v6916_v0 }
 0x9bc   :  { %v6920_v12 = vsub.f32 %v2315_v45, %v2331_v62  ;;  %2344 = vadd.xlane.f32.xlu1 %v2338_v3 }
 0x9be   :  { %v2339_v4 = vmul.f32 %v6920_v12, %v6920_v12 }
 0x9c0   :  { %2346 = vadd.xlane.f32.xlu0 %v2339_v4 }
 0xa3d   :  { %v2341_v11 = vpop.xlane.xlu1 %2340 }
 0xa3e   :  { %v2348_v42 = vmul.f32 0.0078125, %v2341_v11 }
 0xa40   :  { %v2352_v25 = vadd.f32 1e-05, %v2348_v42 }
 0xa41   :  { %v2343_v28 = vpop.xlane.xlu0 %2342 }
 0xa42   :  { %5976 = vrsqrt.f32 %v2352_v25  ;;  %v2349_v63 = vmul.f32 0.0078125, %v2343_v28 }
 0xa44   :  { %v2353_v30 = vadd.f32 1e-05, %v2349_v63 }
 0xa45   :  { %v2345_v31 = vpop.xlane.xlu1 %2344 }
 0xa46   :  { %5978 = vrsqrt.f32 %v2353_v30  ;;  %v2350_v49 = vmul.f32 0.0078125, %v2345_v31 }
 0xa48   :  { %v2354_v55 = vadd.f32 1e-05, %v2350_v49 }
 0xa49   :  { %v2347_v36 = vpop.xlane.xlu0 %2346 }
 0xa4a   :  { %5980 = vrsqrt.f32 %v2354_v55  ;;  %v2351_v44 = vmul.f32 0.0078125, %v2347_v36 }
 0xa4c   :  { %v2355_v22 = vadd.f32 1e-05, %v2351_v44 }
 0xa4e   :  { %5982 = vrsqrt.f32 %v2355_v22 }
 0xa4f   :  { %v5977_v14 = vpop.eup %5976 }
 0xa50   :  { %v2360_v16 = vmul.f32 %v5977_v14, %v6908_v53 }
 0xa52   :  { %v2370_v45 = vmul.f32 %v4861_v17, %v2360_v16 }
 0xa53   :  { %v5979_v38 = vpop.eup %5978 }
 0xa54   :  { %v2361_v5 = vmul.f32 %v5979_v38, %v6912_v61  ;;  %v2380_v15 = vadd.f32 %v4862_v34, %v2370_v45 }
 0xa56   :  { %v2371_v24 = vmul.f32 %v4861_v17, %v2361_v5  ;;  %v6987_v48 = vadd.f32 %v2380_v15, %v1955_v37 }
 0xa57   :  { %v5981_v40 = vpop.eup %5980 }
 0xa58   :  { %v2362_v46 = vmul.f32 %v5981_v40, %v6916_v0  ;;  %v2381_v47 = vadd.f32 %v4862_v34, %v2371_v24  ;;  %v2388_v61 = vmax.f32 %v6987_v48, 0.0 }
 0xa5a   :  { %v6991_v53 = vadd.f32 %v2381_v47, %v1956_v20  ;;  %v2372_v60 = vmul.f32 %v4861_v17, %v2362_v46 }
 0xa5b   :  { %v5983_v62 = vpop.eup %5982 }
 0xa5c   :  { %v2363_v3 = vmul.f32 %v5983_v62, %v6920_v12  ;;  %v2389_v4 = vmax.f32 %v6991_v53, 0.0  ;;  %v2382_v13 = vadd.f32 %v4862_v34, %v2372_v60 }
 0xa5e   :  { %v2392_v33 = vpack.c.bf16 %v2389_v4, %v2388_v61  ;;  %v2373_v37 = vmul.f32 %v4861_v17, %v2363_v3  ;;  %v7002_v20 = vadd.f32 %v2382_v13, %v1957_v29  ;;  %v5829_v29 = vld [vmem:[%s7623_s5 + $0x50] sm:$0xff]  }
 0xa60   :  { %5552 = vmatprep.mubr.bf16.mxu0 %v2392_v33  ;;  %5572 = vmatprep.mubr.bf16.mxu1 %v2392_v33  ;;  %v2383_v10 = vadd.f32 %v4862_v34, %v2373_v37  ;;  %v2390_v12 = vmax.f32 %v7002_v20, 0.0  ;;  %v5874_v20 = vld [vmem:[%s7630_s12 + $0xd0] sm:$0xff]  }
 0xa62   :  { %v7006_v0 = vadd.f32 %v2383_v10, %v1958_v9  ;;  %v5828_v9 = vld [vmem:[%s7623_s5 + $0x58] sm:$0xff]  }
 0xa64   :  { %v2391_v18 = vmax.f32 %v7006_v0, 0.0  ;;  %v5875_v0 = vld [vmem:[%s7630_s12 + $0x90] sm:$0xff]  }
 0xa66   :  { %v2393_v50 = vpack.c.bf16 %v2391_v18, %v2390_v12 }
 0xa68   :  { %5553 = vmatmul.mubr.bf16.vlgmr.msra.gmra.mxu0 %v2393_v50  ;;  %5573 = vmatmul.mubr.bf16.vlgmr.msra.gmra.mxu1 %v2393_v50 }
 0xa69   :  { %5577 = vmatpush3.bf16.msra.mxu0 %v5824_v43  ;;  %5592 = vmatprep.mubr.bf16.mxu0 %v2392_v33 }
 0xa6a   :  { %5578 = vmatprep.subr.bf16.mxu0 %v5825_v51  ;;  %5598 = vmatprep.mubr.msk.bf16.mxu1 %vm6089_vm8, %v6088_v26 }
 0xa6d   :  { %5579 = vmatpush3.bf16.msra.mxu0 %v5825_v51 }
 0xa6e   :  { %5580 = vmatprep.subr.bf16.mxu0 %v5826_v23 }
 0xa71   :  { %5581 = vmatpush3.bf16.msra.mxu0 %v5826_v23 }
 0xa72   :  { %5582 = vmatprep.subr.bf16.mxu0 %v5827_v8 }
 0xa75   :  { %5583 = vmatpush3.bf16.msra.mxu0 %v5827_v8 }
 0xa76   :  { %5584 = vmatprep.subr.bf16.mxu0 %v5828_v9 }
 0xa79   :  { %5585 = vmatpush3.bf16.msra.mxu0 %v5828_v9 }
 0xa7a   :  { %5586 = vmatprep.subr.bf16.mxu0 %v5829_v29 }
 0xa7d   :  { %5587 = vmatpush3.bf16.msra.mxu0 %v5829_v29 }
 0xa7e   :  { %5588 = vmatprep.subr.bf16.mxu0 %v5830_v52 }
 0xa81   :  { %5589 = vmatpush3.bf16.msra.mxu0 %v5830_v52 }
 0xa82   :  { %5590 = vmatprep.subr.bf16.mxu0 %v5831_v54 }
 0xa85   :  { %5591 = vmatpush3.bf16.msra.mxu0 %v5831_v54 }
 0xa86   :  { %5620 = vmatprep.subr.bf16.mxu0 %v6088_v26 }
 0xa88   :  { %5593 = vmatmul.mubr.bf16.vlgmr.msra.gmra.mxu0 %v2393_v50 }
 0xa89   :  { %5622 = vmatprep.mubr.msk.bf16.mxu0 %vm6089_vm8, %v6088_v26 }
 0xb28   :  { %v5554_v27 = vpop.f32.mrf.mxu0  ;;  %v5574_v56 = vpop.f32.mrf.mxu1 }
 0xb2a   :  { %v2493_v57 = vpop.f32.mrf.mxu0  ;;  %v2609_v58 = vpop.f32.mrf.mxu1 }
 0xb2c   :  { %v5555_v59 = vpop.f32.mrf.mxu0  ;;  %v5575_v19 = vpop.f32.mrf.mxu1 }
 0xb2d   :  { %v2509_v11 = vpack.c.bf16 %v5555_v59, %v5554_v27  ;;  %v2625_v42 = vpack.c.bf16 %v5575_v19, %v5574_v56 }
 0xb2e   :  { %v2496_v39 = vpop.f32.mrf.mxu0  ;;  %v2612_v32 = vpop.f32.mrf.mxu1 }
 0xb2f   :  { %v2508_v35 = vpack.c.bf16 %v2496_v39, %v2493_v57  ;;  %v2624_v7 = vpack.c.bf16 %v2612_v32, %v2609_v58  ;;  %v2841_v25 = vsel %vm623_vm9, %v2625_v42, 0 }
 0xb31   :  { %2758 = vrot.lane.b32.xlu1 %v2624_v7, %s6090_s20  ;;  %2744 = vrot.lane.b32.xlu0 %v2508_v35, %s6090_s20  ;;  %v2794_v43 = vsel %vm623_vm9, %v2624_v7, 0 }
 0xb32   :  { %5597 = vmatpush3.bf16.xpose.msra.mxu1 %v2794_v43 }
 0xb33   :  { %5602 = vmatprep.subr.bf16.mxu1 %v6088_v26 }
 0xb35   :  { %2760 = vrot.lane.b32.xlu1 %v2625_v42, %s6090_s20  ;;  %2746 = vrot.lane.b32.xlu0 %v2509_v11, %s6090_s20 }
 0xb39   :  { %2762 = vrot.lane.b32.xlu1 %v2624_v7, %s6091_s24  ;;  %2748 = vrot.lane.b32.xlu0 %v2508_v35, %s6091_s24 }
 0xb3a   :  { %5599 = vmatmul.mubr.msk.bf16.vlgmr.msra.gmra.mxu1 %vm623_vm9, %v2508_v35 }
 0xb3b   :  { %5603 = vmatpush3.bf16.xpose.msra.mxu1 %v2841_v25  ;;  %5604 = vmatprep.mubr.msk.bf16.mxu1 %vm6089_vm8, %v6088_v26 }
 0xb3c   :  { %5608 = vmatprep.subr.bf16.mxu1 %v6088_v26 }
 0xb3d   :  { %2764 = vrot.lane.b32.xlu1 %v2625_v42, %s6091_s24  ;;  %2750 = vrot.lane.b32.xlu0 %v2509_v11, %s6091_s24 }
 0xb41   :  { %2766 = vrot.lane.b32.xlu1 %v2624_v7, %s6092_s25  ;;  %2752 = vrot.lane.b32.xlu0 %v2508_v35, %s6092_s25 }
 0xb42   :  { %5605 = vmatmul.mubr.msk.bf16.vlgmr.msra.gmra.mxu1 %vm623_vm9, %v2509_v11 }
 0xb43   :  { %5610 = vmatprep.mubr.msk.bf16.mxu1 %vm6089_vm8, %v6088_v26 }
 0xb45   :  { %2768 = vrot.lane.b32.xlu1 %v2625_v42, %s6092_s25 }
 0xb48   :  { %v5594_v36 = vpop.f32.mrf.mxu0 }
 0xb49   :  { %2754 = vrot.lane.b32.xlu1 %v2509_v11, %s6092_s25 }
 0xb4a   :  { %v2725_v16 = vpop.f32.mrf.mxu0 }
 0xb4c   :  { %v5595_v45 = vpop.f32.mrf.mxu0 }
 0xb4d   :  { %v7093_v62 = vpack.c.bf16 %v5595_v45, %v5594_v36 }
 0xb4e   :  { %v2728_v24 = vpop.f32.mrf.mxu0 }
 0xb4f   :  { %v7081_v46 = vpack.c.bf16 %v2728_v24, %v2725_v16 }
 0xba3   :  { %v2759_v28 = vpop.permute.xlu1 %2758  ;;  %v2745_v63 = vpop.permute.xlu0 %2744 }
 0xba4   :  { %v2888_v30 = vsel %vm623_vm9, %v2759_v28, 0 }
 0xba5   :  { %5609 = vmatpush3.bf16.xpose.msra.mxu1 %v2888_v30 }
 0xba6   :  { %5614 = vmatprep.subr.bf16.mxu1 %v6088_v26 }
 0xba7   :  { %v2761_v31 = vpop.permute.xlu1 %2760  ;;  %v2747_v49 = vpop.permute.xlu0 %2746 }
 0xba8   :  { %v2935_v44 = vsel %vm623_vm9, %v2761_v31, 0 }
 0xbab   :  { %v2763_v55 = vpop.permute.xlu1 %2762  ;;  %v2749_v14 = vpop.permute.xlu0 %2748 }
 0xbac   :  { %v2982_v22 = vsel %vm623_vm9, %v2763_v55, 0  ;;  %5611 = vmatmul.mubr.msk.bf16.vlgmr.msra.gmra.mxu1 %vm623_vm9, %v2745_v63 }
 0xbad   :  { %5615 = vmatpush3.bf16.xpose.msra.mxu1 %v2935_v44  ;;  %5621 = vmatpush3.bf16.xpose.msra.mxu0 %v2982_v22 }
 0xbae   :  { %5616 = vmatprep.mubr.msk.bf16.mxu1 %vm6089_vm8, %v6088_v26  ;;  %5626 = vmatprep.subr.bf16.mxu1 %v6088_v26 }
 0xbaf   :  { %v2765_v17 = vpop.permute.xlu1 %2764  ;;  %5632 = vmatprep.subr.bf16.mxu0 %v6088_v26  ;;  %v2751_v15 = vpop.permute.xlu0 %2750 }
 0xbb0   :  { %v3029_v38 = vsel %vm623_vm9, %v2765_v17, 0 }
 0xbb3   :  { %v2767_v34 = vpop.permute.xlu1 %2766  ;;  %v2753_v47 = vpop.permute.xlu0 %2752 }
 0xbb4   :  { %v3076_v5 = vsel %vm623_vm9, %v2767_v34, 0  ;;  %5617 = vmatmul.mubr.msk.bf16.vlgmr.msra.gmra.mxu1 %vm623_vm9, %v2747_v49  ;;  %5623 = vmatmul.mubr.msk.bf16.vlgmr.msra.gmra.mxu0 %vm623_vm9, %v2749_v14 }
 0xbb5   :  { %5627 = vmatpush3.bf16.xpose.msra.mxu1 %v3029_v38  ;;  %5633 = vmatpush3.bf16.xpose.msra.mxu0 %v3076_v5 }
 0xbb6   :  { %5628 = vmatprep.mubr.msk.bf16.mxu1 %vm6089_vm8, %v6088_v26  ;;  %5634 = vmatprep.mubr.msk.bf16.mxu0 %vm6089_vm8, %v6088_v26 }
 0xbb7   :  { %5638 = vmatprep.subr.bf16.mxu1 %v6088_v26  ;;  %5644 = vmatprep.subr.bf16.mxu0 %v6088_v26  ;;  %v2769_v40 = vpop.permute.xlu1 %2768 }
 0xbb8   :  { %v3123_v60 = vsel %vm623_vm9, %v2769_v40, 0 }
 0xbbb   :  { %v2755_v3 = vpop.permute.xlu1 %2754 }
 0xbbc   :  { %5629 = vmatmul.mubr.msk.bf16.vlgmr.msra.gmra.mxu1 %vm623_vm9, %v2751_v15  ;;  %5635 = vmatmul.mubr.msk.bf16.vlgmr.msra.gmra.mxu0 %vm623_vm9, %v2753_v47 }
 0xbbd   :  { %5639 = vmatpush3.bf16.xpose.msra.mxu1 %v3123_v60  ;;  %5645 = vmatpush3.bf16.msra.mxu0 %v7081_v46 }
 0xbbe   :  { %5640 = vmatprep.mubr.msk.bf16.mxu1 %vm6089_vm8, %v6088_v26  ;;  %5650 = vmatprep.subr.bf16.mxu1 %v6088_v26 }
 0xbbf   :  { %5646 = vmatprep.mubr.msk.bf16.mxu0 %vm6089_vm8, %v6088_v26  ;;  %5656 = vmatprep.subr.bf16.mxu0 %v6088_v26 }
 0xbc4   :  { %5641 = vmatmul.mubr.msk.bf16.vlgmr.msra.gmra.mxu1 %vm623_vm9, %v2755_v3 }
 0xbc5   :  { %5651 = vmatpush3.bf16.msra.mxu1 %v7093_v62  ;;  %5652 = vmatprep.mubr.msk.bf16.mxu1 %vm6089_vm8, %v6088_v26 }
 0xbc6   :  { %5662 = vmatprep.subr.bf16.mxu1 %v6088_v26 }
 0xbfa   :  { %v2830_v13 = vpop.f32.mrf.mxu1 }
 0xbfb   :  { %v3166_v33 = vmul.f32 0.17677669, %v2830_v13 }
 0xbfc   :  { %v5600_v37 = vpop.f32.mrf.mxu1 }
 0xbfd   :  { %v7102_v10 = vsel %vm6471_vm10, %v3166_v33, -1e+30 }
 0xbfe   :  { %v2833_v50 = vpop.f32.mrf.mxu1  ;;  %v3198_v51 = vsel %vm1036_vm11, %v7102_v10, -inf }
 0xbff   :  { %v3167_v23 = vmul.f32 0.17677669, %v2833_v50  ;;  %3199 = vmax.xlane.f32.xlu0 %v3198_v51 }
 0xc00   :  { %v5601_v8 = vpop.f32.mrf.mxu1 }
 0xc01   :  { %v7108_v9 = vsel %vm6480_vm12, %v3167_v23, -1e+30 }
 0xc02   :  { %v2877_v29 = vpop.f32.mrf.mxu1  ;;  %v3201_v52 = vsel %vm1036_vm11, %v7108_v9, -inf }
 0xc03   :  { %v3168_v54 = vmul.f32 0.17677669, %v2877_v29  ;;  %3202 = vmax.xlane.f32.xlu1 %v3201_v52 }
 0xc04   :  { %v5606_v27 = vpop.f32.mrf.mxu1 }
 0xc05   :  { %v7114_v56 = vsel %vm6471_vm10, %v3168_v54, -1e+30 }
 0xc06   :  { %v2880_v57 = vpop.f32.mrf.mxu1  ;;  %v3204_v58 = vsel %vm1036_vm11, %v7114_v56, -inf }
 0xc07   :  { %v3169_v59 = vmul.f32 0.17677669, %v2880_v57  ;;  %3205 = vmax.xlane.f32.xlu0 %v3204_v58 }
 0xc08   :  { %v5607_v19 = vpop.f32.mrf.mxu1 }
 0xc09   :  { %v7120_v39 = vsel %vm6480_vm12, %v3169_v59, -1e+30 }
 0xc0a   :  { %v3207_v32 = vsel %vm1036_vm11, %v7120_v39, -inf }
 0xc0b   :  { %3208 = vmax.xlane.f32.xlu0 %v3207_v32 }
 0xc6c   :  { %v2924_v35 = vpop.f32.mrf.mxu1 }
 0xc6d   :  { %v3170_v7 = vmul.f32 0.17677669, %v2924_v35 }
 0xc6e   :  { %v5612_v43 = vpop.f32.mrf.mxu1 }
 0xc6f   :  { %v7126_v11 = vsel %vm6471_vm10, %v3170_v7, -1e+30 }
 0xc70   :  { %v2927_v42 = vpop.f32.mrf.mxu1  ;;  %v3210_v25 = vsel %vm1036_vm11, %v7126_v11, -inf }
 0xc71   :  { %v3171_v28 = vmul.f32 0.17677669, %v2927_v42  ;;  %3211 = vmax.xlane.f32.xlu1 %v3210_v25 }
 0xc72   :  { %v5613_v63 = vpop.f32.mrf.mxu1 }
 0xc73   :  { %v7132_v30 = vsel %vm6480_vm12, %v3171_v28, -1e+30 }
 0xc74   :  { %v2971_v31 = vpop.f32.mrf.mxu1  ;;  %v3018_v49 = vpop.f32.mrf.mxu0  ;;  %v3213_v55 = vsel %vm1036_vm11, %v7132_v30, -inf }
 0xc75   :  { %v3172_v36 = vmul.f32 0.17677669, %v2971_v31  ;;  %v3174_v44 = vmul.f32 0.17677669, %v3018_v49  ;;  %3214 = vmax.xlane.f32.xlu0 %v3213_v55 }
 0xc76   :  { %v5618_v22 = vpop.f32.mrf.mxu1  ;;  %v5624_v14 = vpop.f32.mrf.mxu0 }
 0xc77   :  { %v7138_v17 = vsel %vm6471_vm10, %v3174_v44, -1e+30  ;;  %v7144_v15 = vsel %vm6471_vm10, %v3172_v36, -1e+30 }
 0xc78   :  { %v2974_v16 = vpop.f32.mrf.mxu1  ;;  %v3021_v34 = vpop.f32.mrf.mxu0  ;;  %v3222_v45 = vsel %vm1036_vm11, %v7138_v17, -inf  ;;  %v3216_v13 = vsel %vm1036_vm11, %v7144_v15, -inf }
 0xc79   :  { %v3173_v38 = vmul.f32 0.17677669, %v2974_v16  ;;  %v3175_v5 = vmul.f32 0.17677669, %v3021_v34  ;;  %3223 = vmax.xlane.f32.xlu1 %v3222_v45 }
 0xc7a   :  { %v5619_v24 = vpop.f32.mrf.mxu1  ;;  %v5625_v40 = vpop.f32.mrf.mxu0 }
 0xc7b   :  { %v7148_v47 = vsel %vm6480_vm12, %v3173_v38, -1e+30  ;;  %v7156_v51 = vsel %vm6480_vm12, %v3175_v5, -1e+30 }
 0xc7c   :  { %v3065_v60 = vpop.f32.mrf.mxu1  ;;  %v3112_v3 = vpop.f32.mrf.mxu0  ;;  %v3219_v33 = vsel %vm1036_vm11, %v7148_v47, -inf  ;;  %v3225_v57 = vsel %vm1036_vm11, %v7156_v51, -inf }
 0xc7d   :  { %v3176_v37 = vmul.f32 0.17677669, %v3065_v60  ;;  %v3178_v50 = vmul.f32 0.17677669, %v3112_v3  ;;  %3217 = vmax.xlane.f32.xlu1 %v3216_v13  ;;  %3220 = vmax.xlane.f32.xlu0 %v3219_v33 }
 0xc7e   :  { %v5630_v23 = vpop.f32.mrf.mxu1  ;;  %v5636_v8 = vpop.f32.mrf.mxu0 }
 0xc7f   :  { %v7160_v29 = vsel %vm6471_vm10, %v3178_v50, -1e+30  ;;  %v7168_v19 = vsel %vm6471_vm10, %v3176_v37, -1e+30 }
 0xc80   :  { %v3068_v52 = vpop.f32.mrf.mxu1  ;;  %v3115_v54 = vpop.f32.mrf.mxu0  ;;  %v3234_v27 = vsel %vm1036_vm11, %v7160_v29, -inf  ;;  %v3228_v42 = vsel %vm1036_vm11, %v7168_v19, -inf }
 0xc81   :  { %v3177_v58 = vmul.f32 0.17677669, %v3068_v52  ;;  %v3179_v59 = vmul.f32 0.17677669, %v3115_v54  ;;  %3235 = vmax.xlane.f32.xlu1 %v3234_v27  ;;  %3226 = vmax.xlane.f32.xlu0 %v3225_v57 }
 0xc82   :  { %v5631_v32 = vpop.f32.mrf.mxu1  ;;  %v5637_v35 = vpop.f32.mrf.mxu0 }
 0xc83   :  { %v7172_v7 = vsel %vm6480_vm12, %v3177_v58, -1e+30  ;;  %v7180_v63 = vsel %vm6480_vm12, %v3179_v59, -1e+30 }
 0xc84   :  { %v3159_v43 = vpop.f32.mrf.mxu1  ;;  %v3231_v25 = vsel %vm1036_vm11, %v7172_v7, -inf  ;;  %v3237_v36 = vsel %vm1036_vm11, %v7180_v63, -inf }
 0xc85   :  { %v3180_v28 = vmul.f32 0.17677669, %v3159_v43  ;;  %3229 = vmax.xlane.f32.xlu1 %v3228_v42  ;;  %3232 = vmax.xlane.f32.xlu0 %v3231_v25 }
 0xc86   :  { %v5642_v31 = vpop.f32.mrf.mxu1 }
 0xc87   :  { %v7184_v49 = vsel %vm6471_vm10, %v3180_v28, -1e+30 }
 0xc88   :  { %v3162_v55 = vpop.f32.mrf.mxu1  ;;  %v3240_v44 = vsel %vm1036_vm11, %v7184_v49, -inf  ;;  %v3200_v34 = vpop.xlane.xlu0 %3199 }
 0xc89   :  { %v3181_v22 = vmul.f32 0.17677669, %v3162_v55  ;;  %3238 = vmax.xlane.f32.xlu0 %v3237_v36  ;;  %3241 = vmax.xlane.f32.xlu1 %v3240_v44  ;;  %v3246_v24 = vsub.f32 %v7102_v10, %v3200_v34 }
 0xc8a   :  { %v5643_v14 = vpop.f32.mrf.mxu1 }
 0xc8b   :  { %v7192_v16 = vsel %vm6480_vm12, %v3181_v22, -1e+30  ;;  %v3262_v3 = vmul.f32 1.442695, %v3246_v24 }
 0xc8c   :  { %v3243_v6 = vsel %vm1036_vm11, %v7192_v16, -inf  ;;  %v3203_v45 = vpop.xlane.xlu1 %3202 }
 0xc8d   :  { %3244 = vmax.xlane.f32.xlu0 %v3243_v6  ;;  %v3247_v38 = vsub.f32 %v7108_v9, %v3203_v45 }
 0xc8f   :  { %v3264_v40 = vmul.f32 1.442695, %v3247_v38 }
 0xc90   :  { %v3206_v41 = vpop.xlane.xlu0 %3205 }
 0xc91   :  { %5984 = vpow2.f32 %v3264_v40  ;;  %v3248_v13 = vsub.f32 %v7114_v56, %v3206_v41 }
 0xc92   :  { %5986 = vpow2.f32 %v3262_v3 }
 0xc93   :  { %v3266_v37 = vmul.f32 1.442695, %v3248_v13 }
 0xc94   :  { %v3209_v5 = vpop.xlane.xlu0 %3208 }
 0xc95   :  { %v3249_v60 = vsub.f32 %v7120_v39, %v3209_v5 }
 0xc97   :  { %v3268_v33 = vmul.f32 1.442695, %v3249_v60 }
 0xc99   :  { %5988 = vpow2.f32 %v3268_v33 }
 0xc9a   :  { %2772 = vrot.lane.b32.xlu1 %v7081_v46, %s6090_s20  ;;  %5990 = vpow2.f32 %v3266_v37 }
 0xc9e   :  { %2778 = vrot.lane.b32.xlu1 %v7081_v46, %s6091_s24  ;;  %v7208_v50 = vpop.eup %5984 }
 0xc9f   :  { %v7210_v23 = vpop.eup %5986  ;;  %v3297_v9 = vsel %vm1036_vm11, %v7208_v50, 0.0 }
 0xca0   :  { %v3294_v39 = vsel %vm1036_vm11, %v7210_v23, 0.0 }
 0xca2   :  { %2780 = vrot.lane.b32.xlu1 %v7093_v62, %s6091_s24 }
 0xca3   :  { %2774 = vrot.lane.b32.xlu0 %v7093_v62, %s6090_s20 }
 0xca6   :  { %v7214_v10 = vpop.eup %5988 }
 0xca7   :  { %v3303_v56 = vsel %vm1036_vm11, %v7214_v10, 0.0  ;;  %v7220_v8 = vpop.eup %5990 }
 0xca8   :  { %v3300_v52 = vsel %vm1036_vm11, %v7220_v8, 0.0 }
 0xcc2   :  { %3298 = vadd.xlane.f32.xlu0 %v3297_v9 }
 0xcc6   :  { %3295 = vadd.xlane.f32.xlu1 %v3294_v39  ;;  %3304 = vadd.xlane.f32.xlu0 %v3303_v56 }
 0xcca   :  { %3301 = vadd.xlane.f32.xlu1 %v3300_v52 }
 0xcfa   :  { %v3212_v54 = vpop.xlane.xlu1 %3211 }
 0xcfb   :  { %v3250_v27 = vsub.f32 %v7126_v11, %v3212_v54 }
 0xcfd   :  { %v3270_v57 = vmul.f32 1.442695, %v3250_v27 }
 0xcfe   :  { %v3215_v58 = vpop.xlane.xlu0 %3214 }
 0xcff   :  { %5992 = vpow2.f32 %v3270_v57  ;;  %v3251_v59 = vsub.f32 %v7132_v30, %v3215_v58 }
 0xd01   :  { %v3272_v32 = vmul.f32 1.442695, %v3251_v59 }
 0xd02   :  { %v3224_v35 = vpop.xlane.xlu1 %3223 }
 0xd03   :  { %5994 = vpow2.f32 %v3272_v32  ;;  %v3254_v43 = vsub.f32 %v7138_v17, %v3224_v35 }
 0xd05   :  { %v3278_v42 = vmul.f32 1.442695, %v3254_v43 }
 0xd06   :  { %v3218_v25 = vpop.xlane.xlu1 %3217  ;;  %v3221_v28 = vpop.xlane.xlu0 %3220 }
 0xd07   :  { %5996 = vpow2.f32 %v3278_v42  ;;  %v3252_v31 = vsub.f32 %v7144_v15, %v3218_v25  ;;  %v3253_v36 = vsub.f32 %v7148_v47, %v3221_v28 }
 0xd09   :  { %v3274_v55 = vmul.f32 1.442695, %v3252_v31  ;;  %v3276_v41 = vmul.f32 1.442695, %v3253_v36 }
 0xd0a   :  { %v3236_v11 = vpop.xlane.xlu1 %3235  ;;  %v3227_v44 = vpop.xlane.xlu0 %3226 }
 0xd0b   :  { %5998 = vpow2.f32 %v3274_v55  ;;  %v3258_v22 = vsub.f32 %v7160_v29, %v3236_v11  ;;  %v3255_v30 = vsub.f32 %v7156_v51, %v3227_v44 }
 0xd0c   :  { %v7231_v14 = vpop.eup %5992 }
 0xd0d   :  { %v3286_v6 = vmul.f32 1.442695, %v3258_v22  ;;  %v3280_v17 = vmul.f32 1.442695, %v3255_v30  ;;  %v3306_v34 = vsel %vm1036_vm11, %v7231_v14, 0.0 }
 0xd0e   :  { %v3230_v45 = vpop.xlane.xlu1 %3229  ;;  %v3233_v15 = vpop.xlane.xlu0 %3232  ;;  %3307 = vadd.xlane.f32.xlu1 %v3306_v34 }
 0xd0f   :  { %6000 = vpow2.f32 %v3286_v6  ;;  %v3256_v47 = vsub.f32 %v7168_v19, %v3230_v45  ;;  %v3257_v5 = vsub.f32 %v7172_v7, %v3233_v15 }
 0xd10   :  { %v7236_v38 = vpop.eup %5994  ;;  %6002 = vpow2.f32 %v3280_v17 }
 0xd11   :  { %v3282_v29 = vmul.f32 1.442695, %v3256_v47  ;;  %v3309_v51 = vsel %vm1036_vm11, %v7236_v38, 0.0  ;;  %6004 = vpow2.f32 %v3276_v41  ;;  %v3284_v9 = vmul.f32 1.442695, %v3257_v5 }
 0xd12   :  { %v3239_v24 = vpop.xlane.xlu0 %3238  ;;  %v3242_v40 = vpop.xlane.xlu1 %3241  ;;  %3310 = vadd.xlane.f32.xlu0 %v3309_v51 }
 0xd13   :  { %6006 = vpow2.f32 %v3282_v29  ;;  %v3259_v60 = vsub.f32 %v7180_v63, %v3239_v24  ;;  %v3260_v3 = vsub.f32 %v7184_v49, %v3242_v40 }
 0xd14   :  { %v7243_v13 = vpop.eup %5996 }
 0xd15   :  { %v3288_v19 = vmul.f32 1.442695, %v3259_v60  ;;  %v3290_v33 = vmul.f32 1.442695, %v3260_v3  ;;  %v3318_v37 = vsel %vm1036_vm11, %v7243_v13, 0.0 }
 0xd16   :  { %3319 = vadd.xlane.f32.xlu1 %v3318_v37  ;;  %v3245_v39 = vpop.xlane.xlu0 %3244  ;;  %v2773_v11 = vpop.permute.xlu1 %2772 }
 0xd17   :  { %6008 = vpow2.f32 %v3288_v19  ;;  %v3261_v7 = vsub.f32 %v7192_v16, %v3245_v39 }
 0xd18   :  { %v7248_v56 = vpop.eup %5998  ;;  %6010 = vpow2.f32 %v3290_v33 }
 0xd19   :  { %v3312_v63 = vsel %vm1036_vm11, %v7248_v56, 0.0  ;;  %6012 = vpow2.f32 %v3284_v9  ;;  %v3292_v49 = vmul.f32 1.442695, %v3261_v7 }
 0xd1a   :  { %3313 = vadd.xlane.f32.xlu1 %v3312_v63  ;;  %v2779_v44 = vpop.permute.xlu1 %2778  ;;  %v2775_v22 = vpop.permute.xlu0 %2774 }
 0xd1b   :  { %6014 = vpow2.f32 %v3292_v49 }
 0xd1c   :  { %v7252_v52 = vpop.eup %6000 }
 0xd1d   :  { %v7254_v54 = vpop.eup %6002  ;;  %v3330_v27 = vsel %vm1036_vm11, %v7252_v52, 0.0 }
 0xd1e   :  { %3331 = vadd.xlane.f32.xlu1 %v3330_v27  ;;  %v3321_v16 = vsel %vm1036_vm11, %v7254_v54, 0.0  ;;  %v7260_v57 = vpop.eup %6004  ;;  %v7288_v30 = vpop.permute.xlu1 %2780 }
 0xd1f   :  { %3322 = vadd.xlane.f32.xlu0 %v3321_v16  ;;  %v3315_v32 = vsel %vm1036_vm11, %v7260_v57, 0.0 }
 0xd20   :  { %v7262_v58 = vpop.eup %6006 }
 0xd21   :  { %v3324_v59 = vsel %vm1036_vm11, %v7262_v58, 0.0 }
 0xd22   :  { %3325 = vadd.xlane.f32.xlu1 %v3324_v59 }
 0xd23   :  { %3316 = vadd.xlane.f32.xlu0 %v3315_v32 }
 0xd24   :  { %v7268_v35 = vpop.eup %6008 }
 0xd25   :  { %v7270_v43 = vpop.eup %6010  ;;  %v3333_v42 = vsel %vm1036_vm11, %v7268_v35, 0.0 }
 0xd26   :  { %v3336_v25 = vsel %vm1036_vm11, %v7270_v43, 0.0  ;;  %v7276_v28 = vpop.eup %6012 }
 0xd27   :  { %3337 = vadd.xlane.f32.xlu1 %v3336_v25  ;;  %3334 = vadd.xlane.f32.xlu0 %v3333_v42  ;;  %v3327_v31 = vsel %vm1036_vm11, %v7276_v28, 0.0 }
 0xd28   :  { %v7280_v55 = vpop.eup %6014 }
 0xd29   :  { %v3339_v36 = vsel %vm1036_vm11, %v7280_v55, 0.0 }
 0xd2b   :  { %3328 = vadd.xlane.f32.xlu0 %v3327_v31 }
 0xd2f   :  { %3340 = vadd.xlane.f32.xlu0 %v3339_v36 }
 0xd38   :  { %2786 = vrot.lane.b32.xlu1 %v7093_v62, %s6092_s25 }
 0xd45   :  { %2784 = vrot.lane.b32.xlu0 %v7081_v46, %s6092_s25 }
 0xd4b   :  { %v3299_v6 = vpop.xlane.xlu0 %3298 }
 0xd4c   :  { %6016 = vrcp.f32 %v3299_v6 }
 0xd4f   :  { %v3296_v17 = vpop.xlane.xlu1 %3295  ;;  %v3305_v34 = vpop.xlane.xlu0 %3304 }
 0xd50   :  { %6018 = vrcp.f32 %v3296_v17 }
 0xd51   :  { %6020 = vrcp.f32 %v3305_v34 }
 0xd53   :  { %v3302_v41 = vpop.xlane.xlu1 %3301 }
 0xd54   :  { %6022 = vrcp.f32 %v3302_v41 }
 0xd59   :  { %v6017_v45 = vpop.eup %6016 }
 0xd5a   :  { %v3345_v47 = vmul.f32 %v6017_v45, %v7208_v50 }
 0xd5d   :  { %v6019_v15 = vpop.eup %6018 }
 0xd5e   :  { %v3343_v62 = vmul.f32 %v6019_v15, %v7210_v23  ;;  %v6021_v29 = vpop.eup %6020 }
 0xd5f   :  { %v3349_v24 = vmul.f32 %v6021_v29, %v7214_v10 }
 0xd60   :  { %v3374_v51 = vpack.c.bf16 %v3345_v47, %v3343_v62 }
 0xd61   :  { %v6023_v46 = vpop.eup %6022 }
 0xd62   :  { %5647 = vmatmul.mubr.msk.bf16.vlgmr.msra.gmra.mxu0 %vm1036_vm11, %v3374_v51  ;;  %v3347_v5 = vmul.f32 %v6023_v46, %v7220_v8  ;;  %v5833_v51 = vld [vmem:[%s7624_s6 + $0x40] sm:$0xff]   ;;  %v5834_v46 = vld [vmem:[%s7624_s6 + $0x58] sm:$0xff]  }
 0xd63   :  { %5657 = vmatpush3.bf16.msra.mxu0 %v2773_v11  ;;  %5658 = vmatprep.mubr.msk.bf16.mxu0 %vm6089_vm8, %v6088_v26 }
 0xd64   :  { %v3375_v40 = vpack.c.bf16 %v3349_v24, %v3347_v5  ;;  %5668 = vmatprep.subr.bf16.mxu0 %v6088_v26 }
 0xd66   :  { %5653 = vmatmul.mubr.msk.bf16.vlgmr.msra.gmra.mxu1 %vm1036_vm11, %v3375_v40 }
 0xd67   :  { %5663 = vmatpush3.bf16.msra.mxu1 %v2775_v22  ;;  %5664 = vmatprep.mubr.msk.bf16.mxu1 %vm6089_vm8, %v6088_v26 }
 0xd68   :  { %5674 = vmatprep.subr.bf16.mxu1 %v6088_v26 }
 0xd97   :  { %v3308_v50 = vpop.xlane.xlu1 %3307 }
 0xd98   :  { %6024 = vrcp.f32 %v3308_v50 }
 0xd9b   :  { %v3311_v23 = vpop.xlane.xlu0 %3310 }
 0xd9c   :  { %6026 = vrcp.f32 %v3311_v23 }
 0xd9f   :  { %v3320_v10 = vpop.xlane.xlu1 %3319 }
 0xda0   :  { %6028 = vrcp.f32 %v3320_v10 }
 0xda3   :  { %v3314_v8 = vpop.xlane.xlu1 %3313 }
 0xda5   :  { %v6025_v60 = vpop.eup %6024 }
 0xda6   :  { %v3351_v37 = vmul.f32 %v6025_v60, %v7231_v14 }
 0xda7   :  { %v3332_v33 = vpop.xlane.xlu1 %3331 }
 0xda8   :  { %v3323_v3 = vpop.xlane.xlu0 %3322 }
 0xda9   :  { %v6027_v19 = vpop.eup %6026  ;;  %6030 = vrcp.f32 %v3323_v3 }
 0xdaa   :  { %v3353_v9 = vmul.f32 %v6027_v19, %v7236_v38  ;;  %6032 = vrcp.f32 %v3314_v8  ;;  %v5839_v19 = vld [vmem:[%s7624_s6 + $0x70] sm:$0xff]  }
 0xdab   :  { %v3326_v63 = vpop.xlane.xlu1 %3325 }
 0xdac   :  { %v3317_v39 = vpop.xlane.xlu0 %3316  ;;  %v3376_v7 = vpack.c.bf16 %v3353_v9, %v3351_v37 }
 0xdad   :  { %6034 = vrcp.f32 %v3317_v39  ;;  %v6029_v14 = vpop.eup %6028 }
 0xdae   :  { %5659 = vmatmul.mubr.msk.bf16.vlgmr.msra.gmra.mxu0 %vm1036_vm11, %v3376_v7  ;;  %6036 = vrcp.f32 %v3332_v33  ;;  %v3359_v16 = vmul.f32 %v6029_v14, %v7243_v13 }
 0xdaf   :  { %5669 = vmatpush3.bf16.msra.mxu0 %v2779_v44  ;;  %5670 = vmatprep.mubr.msk.bf16.mxu0 %vm6089_vm8, %v6088_v26 }
 0xdb0   :  { %v3335_v49 = vpop.xlane.xlu0 %3334  ;;  %5680 = vmatprep.subr.bf16.mxu0 %v6088_v26  ;;  %v3338_v42 = vpop.xlane.xlu1 %3337 }
 0xdb1   :  { %6038 = vrcp.f32 %v3335_v49 }
 0xdb2   :  { %6040 = vrcp.f32 %v3326_v63 }
 0xdb4   :  { %v3329_v27 = vpop.xlane.xlu0 %3328 }
 0xdb5   :  { %6042 = vrcp.f32 %v3329_v27 }
 0xdb6   :  { %v6031_v38 = vpop.eup %6030 }
 0xdb7   :  { %v3361_v59 = vmul.f32 %v6031_v38, %v7254_v54  ;;  %v6033_v32 = vpop.eup %6032 }
 0xdb8   :  { %v3341_v25 = vpop.xlane.xlu0 %3340  ;;  %v3355_v11 = vmul.f32 %v6033_v32, %v7248_v56 }
 0xdb9   :  { %6044 = vrcp.f32 %v3341_v25  ;;  %v3378_v31 = vpack.c.bf16 %v3361_v59, %v3359_v16 }
 0xdba   :  { %v6035_v36 = vpop.eup %6034  ;;  %6046 = vrcp.f32 %v3338_v42 }
 0xdbb   :  { %5671 = vmatmul.mubr.msk.bf16.vlgmr.msra.gmra.mxu0 %vm1036_vm11, %v3378_v31  ;;  %v3357_v44 = vmul.f32 %v6035_v36, %v7260_v57  ;;  %v6037_v13 = vpop.eup %6036  ;;  %v5837_v31 = vld [vmem:[%s7624_s6 + $0x60] sm:$0xff]  }
 0xdbc   :  { %v2785_v22 = vpop.permute.xlu0 %2784  ;;  %5682 = vmatprep.mubr.msk.bf16.mxu0 %vm6089_vm8, %v6088_v26  ;;  %v3367_v34 = vmul.f32 %v6037_v13, %v7252_v52  ;;  %v5832_v52 = vld [vmem:[%s7624_s6 + $0x48] sm:$0xff]  }
 0xdbd   :  { %5681 = vmatpush3.bf16.msra.mxu0 %v2785_v22  ;;  %v3377_v54 = vpack.c.bf16 %v3357_v44, %v3355_v11 }
 0xdbe   :  { %v6039_v6 = vpop.eup %6038  ;;  %5692 = vmatprep.subr.bf16.mxu0 %v5834_v46 }
 0xdbf   :  { %5665 = vmatmul.mubr.msk.bf16.vlgmr.msra.gmra.mxu1 %vm1036_vm11, %v3377_v54  ;;  %v6041_v17 = vpop.eup %6040  ;;  %v3369_v41 = vmul.f32 %v6039_v6, %v7268_v35  ;;  %v2787_v35 = vpop.permute.xlu1 %2786 }
 0xdc0   :  { %5675 = vmatpush3.bf16.msra.mxu1 %v7288_v30  ;;  %5676 = vmatprep.mubr.msk.bf16.mxu1 %vm6089_vm8, %v6088_v26  ;;  %v3363_v45 = vmul.f32 %v6041_v17, %v7262_v58 }
 0xdc1   :  { %5686 = vmatprep.subr.bf16.mxu1 %v6088_v26  ;;  %v3380_v57 = vpack.c.bf16 %v3369_v41, %v3367_v34 }
 0xdc2   :  { %v6043_v56 = vpop.eup %6042 }
 0xdc3   :  { %v3365_v15 = vmul.f32 %v6043_v56, %v7276_v28  ;;  %5683 = vmatmul.mubr.msk.bf16.vlgmr.msra.gmra.mxu0 %vm1036_vm11, %v3380_v57 }
 0xdc4   :  { %5693 = vmatpush3.bf16.msra.mxu0 %v5834_v46 }
 0xdc5   :  { %v3379_v62 = vpack.c.bf16 %v3365_v15, %v3363_v45 }
 0xdc6   :  { %v6045_v30 = vpop.eup %6044 }
 0xdc7   :  { %5677 = vmatmul.mubr.msk.bf16.vlgmr.msra.gmra.mxu1 %vm1036_vm11, %v3379_v62  ;;  %v6047_v47 = vpop.eup %6046  ;;  %v3373_v58 = vmul.f32 %v6045_v30, %v7280_v55  ;;  %v5838_v55 = vld [vmem:[%s7624_s6 + $0x78] sm:$0xff]  }
 0xdc8   :  { %5687 = vmatpush3.bf16.msra.mxu1 %v2787_v35  ;;  %5688 = vmatprep.mubr.msk.bf16.mxu1 %vm6089_vm8, %v6088_v26  ;;  %v3371_v28 = vmul.f32 %v6047_v47, %v7270_v43  ;;  %v5835_v26 = vld [vmem:[%s7624_s6 + $0x50] sm:$0xff]   ;;  %v5836_v43 = vld [vmem:[%s7624_s6 + $0x68] sm:$0xff]  }
 0xdc9   :  { %5700 = vmatprep.subr.bf16.mxu1 %v5832_v52  ;;  %5694 = vmatprep.subr.bf16.mxu0 %v5835_v26 }
 0xdca   :  { %v3381_v29 = vpack.c.bf16 %v3373_v58, %v3371_v28  ;;  %5695 = vmatpush3.bf16.msra.mxu0 %v5835_v26 }
 0xdcb   :  { %5708 = vmatprep.subr.bf16.mxu0 %v5836_v43 }
 0xdcf   :  { %5689 = vmatmul.mubr.msk.bf16.vlgmr.msra.gmra.mxu1 %vm1036_vm11, %v3381_v29 }
 0xdd0   :  { %5701 = vmatpush3.bf16.msra.mxu1 %v5832_v52 }
 0xdd1   :  { %5702 = vmatprep.subr.bf16.mxu1 %v5833_v51 }
 0xdd4   :  { %5703 = vmatpush3.bf16.msra.mxu1 %v5833_v51 }
 0xdd5   :  { %5716 = vmatprep.subr.bf16.mxu1 %v5838_v55 }
 0xe22   :  { %v3419_v5 = vpop.f32.mrf.mxu0 }
 0xe24   :  { %v5648_v24 = vpop.f32.mrf.mxu0 }
 0xe26   :  { %v3422_v40 = vpop.f32.mrf.mxu0  ;;  %v3463_v50 = vpop.f32.mrf.mxu1 }
 0xe27   :  { %v3751_v23 = vpack.c.bf16 %v3422_v40, %v3419_v5 }
 0xe28   :  { %v5649_v10 = vpop.f32.mrf.mxu0  ;;  %v5654_v8 = vpop.f32.mrf.mxu1 }
 0xe29   :  { %5704 = vmatprep.mubr.msk.bf16.mxu1 %vm623_vm9, %v3751_v23 }
 0xe2a   :  { %v3466_v60 = vpop.f32.mrf.mxu1 }
 0xe2b   :  { %v3752_v3 = vpack.c.bf16 %v3466_v60, %v3463_v50 }
 0xe2c   :  { %v5655_v33 = vpop.f32.mrf.mxu1 }
 0xe2d   :  { %5705 = vmatmul.mubr.msk.bf16.vlgmr.msra.gmra.mxu1 %vm623_vm9, %v3752_v3 }
 0xe2e   :  { %5717 = vmatpush3.bf16.msra.mxu1 %v5838_v55 }
 0xe2f   :  { %5718 = vmatprep.subr.bf16.mxu1 %v5839_v19 }
 0xe32   :  { %5719 = vmatpush3.bf16.msra.mxu1 %v5839_v19  ;;  %v4984_v19 = vld [vmem:[%s7625_s7 + $0x1] ss:$0 sm:$0xff] }
 0xe6e   :  { %v3507_v37 = vpop.f32.mrf.mxu0 }
 0xe70   :  { %v5660_v9 = vpop.f32.mrf.mxu0 }
 0xe72   :  { %v3510_v39 = vpop.f32.mrf.mxu0 }
 0xe73   :  { %v3753_v7 = vpack.c.bf16 %v3510_v39, %v3507_v37 }
 0xe74   :  { %v5661_v63 = vpop.f32.mrf.mxu0 }
 0xe75   :  { %5696 = vmatprep.mubr.msk.bf16.mxu0 %vm623_vm9, %v3753_v7 }
 0xe7b   :  { %v3595_v49 = vpop.f32.mrf.mxu0 }
 0xe7d   :  { %v5672_v14 = vpop.f32.mrf.mxu0 }
 0xe7f   :  { %v3551_v27 = vpop.f32.mrf.mxu1  ;;  %v3598_v38 = vpop.f32.mrf.mxu0 }
 0xe80   :  { %v3889_v36 = vpack.c.bf16 %v3598_v38, %v3595_v49 }
 0xe81   :  { %v5666_v16 = vpop.f32.mrf.mxu1  ;;  %v5673_v59 = vpop.f32.mrf.mxu0 }
 0xe83   :  { %v3554_v32 = vpop.f32.mrf.mxu1  ;;  %v3683_v25 = vpop.f32.mrf.mxu0 }
 0xe84   :  { %v3754_v42 = vpack.c.bf16 %v3554_v32, %v3551_v27 }
 0xe85   :  { %v5667_v11 = vpop.f32.mrf.mxu1  ;;  %v5684_v44 = vpop.f32.mrf.mxu0 }
 0xe86   :  { %5697 = vmatmul.mubr.msk.bf16.vlgmr.msra.gmra.mxu0 %vm623_vm9, %v3754_v42 }
 0xe87   :  { %v3639_v22 = vpop.f32.mrf.mxu1  ;;  %5709 = vmatpush3.bf16.msra.mxu0 %v5836_v43  ;;  %5712 = vmatprep.mubr.msk.bf16.mxu0 %vm623_vm9, %v3889_v36  ;;  %v3686_v13 = vpop.f32.mrf.mxu0 }
 0xe88   :  { %5710 = vmatprep.subr.bf16.mxu0 %v5837_v31  ;;  %v3962_v54 = vpack.c.bf16 %v3686_v13, %v3683_v25 }
 0xe89   :  { %v5678_v6 = vpop.f32.mrf.mxu1  ;;  %v5685_v17 = vpop.f32.mrf.mxu0 }
 0xe8a   :  { %5720 = vmatprep.mubr.msk.bf16.mxu1 %vm623_vm9, %v3962_v54 }
 0xe8b   :  { %v3642_v34 = vpop.f32.mrf.mxu1  ;;  %5711 = vmatpush3.bf16.msra.mxu0 %v5837_v31 }
 0xe8c   :  { %v3890_v41 = vpack.c.bf16 %v3642_v34, %v3639_v22 }
 0xe8d   :  { %v5679_v56 = vpop.f32.mrf.mxu1 }
 0xe8e   :  { %5713 = vmatmul.mubr.msk.bf16.vlgmr.msra.gmra.mxu0 %vm623_vm9, %v3890_v41 }
 0xe8f   :  { %v3727_v57 = vpop.f32.mrf.mxu1  ;;  %4267 = vmatprep.mubr.bf16.mxu0 %v6086_v2 }
 0xe91   :  { %v5690_v45 = vpop.f32.mrf.mxu1 }
 0xe92   :  { %v5842_v45 = vld [vmem:[%s7628_s10 + $0xf4] ss:$8 sps:$4 sm:$0xff]  }
 0xe93   :  { %v3730_v15 = vpop.f32.mrf.mxu1  ;;  %4235 = vmatprep.subr.bf16.mxu0 %v5842_v45 }
 0xe94   :  { %v3963_v62 = vpack.c.bf16 %v3730_v15, %v3727_v57  ;;  %v5840_v15 = vld [vmem:[%s7628_s10 + $0xf0] ss:$8 sps:$4 sm:$0xff]  }
 0xe95   :  { %v5691_v52 = vpop.f32.mrf.mxu1  ;;  %4236 = vmatpush1.bf16.msra.mxu0 %v5840_v15 }
 0xe96   :  { %5721 = vmatmul.mubr.msk.bf16.vlgmr.msra.gmra.mxu1 %vm623_vm9, %v3963_v62  ;;  %v5845_v62 = vld [vmem:[%s7628_s10 + $0xe4] ss:$8 sps:$4 sm:$0xff]   ;;  %v5843_v52 = vld [vmem:[%s7628_s10 + $0xe0] ss:$8 sps:$4 sm:$0xff]  }
 0xe97   :  { %4237 = vmatprep.subr.bf16.mxu0 %v5845_v62 }
 0xe99   :  { %4238 = vmatpush1.bf16.msra.mxu0 %v5843_v52 }
 0xeed   :  { %v5706_v35 = vpop.f32.mrf.mxu1 }
 0xeef   :  { %v3874_v28 = vpop.f32.mrf.mxu1 }
 0xef1   :  { %v5707_v46 = vpop.f32.mrf.mxu1 }
 0xef3   :  { %v3877_v43 = vpop.f32.mrf.mxu1 }
 0xf46   :  { %v5698_v30 = vpop.f32.mrf.mxu0 }
 0xf47   :  { %v3883_v40 = vadd.f32 %v5706_v35, %v5698_v30  ;;  %v5848_v30 = vld [vmem:[%s7628_s10 + $0xd4] ss:$8 sps:$4 sm:$0xff]   ;;  %v5846_v35 = vld [vmem:[%s7628_s10 + $0xd0] ss:$8 sps:$4 sm:$0xff]  }
 0xf48   :  { %v3807_v47 = vpop.f32.mrf.mxu0  ;;  %4239 = vmatprep.subr.bf16.mxu0 %v5848_v30 }
 0xf49   :  { %v3875_v5 = vadd.f32 %v3874_v28, %v3807_v47  ;;  %4240 = vmatpush1.bf16.msra.mxu0 %v5846_v35  ;;  %v5851_v47 = vld [vmem:[%s7628_s10 + $0xc4] ss:$8 sps:$4 sm:$0xff]   ;;  %v5854_v28 = vld [vmem:[%s7628_s10 + $0xb4] ss:$8 sps:$4 sm:$0xff]  }
 0xf4a   :  { %v5699_v58 = vpop.f32.mrf.mxu0  ;;  %4241 = vmatprep.subr.bf16.mxu0 %v5851_v47 }
 0xf4b   :  { %v3886_v37 = vadd.f32 %v5707_v46, %v5699_v58  ;;  %v5849_v58 = vld [vmem:[%s7628_s10 + $0xc0] ss:$8 sps:$4 sm:$0xff]  }
 0xf4c   :  { %v3810_v29 = vpop.f32.mrf.mxu0  ;;  %v5855_v46 = vld [vmem:[%s7628_s10 + $0xa0] ss:$8 sps:$4 sm:$0xff]  }
 0xf4d   :  { %v3878_v8 = vadd.f32 %v3877_v43, %v3810_v29  ;;  %4242 = vmatpush1.bf16.msra.mxu0 %v5849_v58  ;;  %v5852_v29 = vld [vmem:[%s7628_s10 + $0xb0] ss:$8 sps:$4 sm:$0xff]  }
 0xf4e   :  { %v5714_v51 = vpop.f32.mrf.mxu0  ;;  %4243 = vmatprep.subr.bf16.mxu0 %v5854_v28  ;;  %v5858_v43 = vld [vmem:[%s7628_s10 + $0x90] ss:$8 sps:$4 sm:$0xff]  }
 0xf4f   :  { %v3960_v60 = vadd.f32 %v5714_v51, %v3883_v40  ;;  %v5857_v51 = vld [vmem:[%s7628_s10 + $0xa4] ss:$8 sps:$4 sm:$0xff]   ;;  %v5865_v40 = vld [vmem:[%s7630_s12 + $0xb8] sm:$0xff]  }
 0xf50   :  { %v3943_v26 = vpop.f32.mrf.mxu0 }
 0xf51   :  { %v3958_v50 = vadd.f32 %v3943_v26, %v3875_v5  ;;  %4244 = vmatpush1.bf16.msra.mxu0 %v5852_v29  ;;  %v5860_v26 = vld [vmem:[%s7628_s10 + $0x94] ss:$8 sps:$4 sm:$0xff]   ;;  %v5861_v5 = vld [vmem:[%s7628_s10 + $0x80] ss:$8 sps:$4 sm:$0xff]  }
 0xf52   :  { %v5715_v55 = vpop.f32.mrf.mxu0  ;;  %4245 = vmatprep.subr.bf16.mxu0 %v5857_v51  ;;  %v5878_v29 = vld [vmem:[%s7630_s12 + $0xc0] sm:$0xff]  }
 0xf53   :  { %v3961_v49 = vadd.f32 %v5715_v55, %v3886_v37  ;;  %v5863_v55 = vld [vmem:[%s7628_s10 + $0x84] ss:$8 sps:$4 sm:$0xff]  }
 0xf54   :  { %v3946_v23 = vpop.f32.mrf.mxu0  ;;  %v5879_v51 = vld [vmem:[%s7630_s12 + $0x80] sm:$0xff]  }
 0xf55   :  { %v3959_v9 = vadd.f32 %v3946_v23, %v3878_v8  ;;  %4246 = vmatpush1.bf16.msra.mxu0 %v5855_v46  ;;  %v5867_v23 = vld [vmem:[%s7630_s12 + $0xb0] sm:$0xff]   ;;  %v5869_v8 = vld [vmem:[%s7630_s12 + $0xa8] sm:$0xff]   ;;  %v5005_v46 = vld [vmem:[%s7629_s11 + $0x2] sm:$0x3] }
 0xf56   :  { %v5722_v24 = vpop.f32.mrf.mxu1  ;;  %4247 = vmatprep.subr.bf16.mxu0 %v5860_v26 }
 0xf57   :  { %v4033_v39 = vadd.f32 %v5722_v24, %v3960_v60  ;;  %v5864_v24 = vld [vmem:[%s7630_s12 + $0xf8] sm:$0xff]   ;;  %v5870_v60 = vld [vmem:[%s7630_s12 + $0xe0] sm:$0xff]  }
 0xf58   :  { %v4016_v10 = vpop.f32.mrf.mxu1  ;;  %5320 = vmatprep.subr.bf16.mxu1 %v5864_v24 }
 0xf59   :  { %v4031_v3 = vadd.f32 %v4016_v10, %v3958_v50  ;;  %v4045_v27 = vadd.f32 %v4984_v19, %v4033_v39  ;;  %4248 = vmatpush1.bf16.msra.mxu0 %v5858_v43  ;;  %v5866_v50 = vld [vmem:[%s7630_s12 + $0xf0] sm:$0xff]   ;;  %5321 = vmatpush3.bf16.msra.mxu1 %v5865_v40  ;;  %v5868_v10 = vld [vmem:[%s7630_s12 + $0xe8] sm:$0xff]   ;;  %v4152_v43 = vrot.slane %v5005_v46, %v6895_v21 }
 0xf5a   :  { %v5723_v33 = vpop.f32.mrf.mxu1  ;;  %4249 = vmatprep.subr.bf16.mxu0 %v5863_v55  ;;  %5322 = vmatprep.subr.bf16.mxu1 %v5866_v50  ;;  %v4148_v55 = vrot.slane %v5005_v46, %v6898_v1 }
 0xf5b   :  { %v4043_v7 = vadd.f32 %v4984_v19, %v4031_v3  ;;  %v4034_v38 = vadd.f32 %v5723_v33, %v3961_v49  ;;  %v5871_v3 = vld [vmem:[%s7630_s12 + $0xa0] sm:$0xff]   ;;  %v5873_v33 = vld [vmem:[%s7630_s12 + $0x98] sm:$0xff]  }
 0xf5c   :  { %v4019_v63 = vpop.f32.mrf.mxu1 }
 0xf5d   :  { %v4032_v14 = vadd.f32 %v4019_v63, %v3959_v9  ;;  %4051 = vadd.xlane.f32.xlu0 %v4043_v7  ;;  %v4046_v59 = vadd.f32 %v4984_v19, %v4034_v38  ;;  %4250 = vmatpush1.bf16.msra.mxu0 %v5861_v5 }
 0xf5e   :  { %5323 = vmatpush3.bf16.msra.mxu1 %v5867_v23 }
 0xf5f   :  { %v4044_v16 = vadd.f32 %v4984_v19, %v4032_v14  ;;  %5324 = vmatprep.subr.bf16.mxu1 %v5868_v10  ;;  %v5872_v19 = vld [vmem:[%s7630_s12 + $0xd8] sm:$0xff]  }
 0xf61   :  { %4053 = vadd.xlane.f32.xlu1 %v4044_v16  ;;  %4055 = vadd.xlane.f32.xlu0 %v4045_v27 }
 0xf62   :  { %5325 = vmatpush3.bf16.msra.mxu1 %v5869_v8 }
 0xf63   :  { %5326 = vmatprep.subr.bf16.mxu1 %v5870_v60 }
 0xf65   :  { %4057 = vadd.xlane.f32.xlu0 %v4046_v59 }
 0xf66   :  { %5327 = vmatpush3.bf16.msra.mxu1 %v5871_v3 }
 0xf67   :  { %5328 = vmatprep.subr.bf16.mxu1 %v5872_v19 }
 0xf6a   :  { %5329 = vmatpush3.bf16.msra.mxu1 %v5873_v33 }
 0xf6b   :  { %5330 = vmatprep.subr.bf16.mxu1 %v5874_v20 }
 0xf6e   :  { %5331 = vmatpush3.bf16.msra.mxu1 %v5875_v0 }
 0xfe6   :  { %v4052_v32 = vpop.xlane.xlu0 %4051 }
 0xfe7   :  { %v4059_v42 = vmul.f32 0.0078125, %v4052_v32 }
 0xfe9   :  { %v7367_v25 = vsub.f32 %v4043_v7, %v4059_v42 }
 0xfea   :  { %v4054_v31 = vpop.xlane.xlu1 %4053  ;;  %v4056_v36 = vpop.xlane.xlu0 %4055 }
 0xfeb   :  { %v4060_v11 = vmul.f32 0.0078125, %v4054_v31  ;;  %v4061_v44 = vmul.f32 0.0078125, %v4056_v36  ;;  %v4067_v22 = vmul.f32 %v7367_v25, %v7367_v25  ;;  %v4987_v31 = vld [vmem:[%s7626_s8 + $0x1] ss:$0 sm:$0xff] }
 0xfed   :  { %v7371_v13 = vsub.f32 %v4044_v16, %v4060_v11  ;;  %v7373_v54 = vsub.f32 %v4045_v27, %v4061_v44  ;;  %4071 = vadd.xlane.f32.xlu1 %v4067_v22  ;;  %v4988_v11 = vld [vmem:[%s7627_s9 + $0x1] ss:$0 sm:$0xff] }
 0xfee   :  { %v4058_v6 = vpop.xlane.xlu0 %4057 }
 0xfef   :  { %v4062_v17 = vmul.f32 0.0078125, %v4058_v6  ;;  %v4068_v34 = vmul.f32 %v7371_v13, %v7371_v13  ;;  %v4069_v41 = vmul.f32 %v7373_v54, %v7373_v54 }
 0xff1   :  { %v7379_v56 = vsub.f32 %v4046_v59, %v4062_v17  ;;  %4073 = vadd.xlane.f32.xlu0 %v4068_v34  ;;  %4075 = vadd.xlane.f32.xlu1 %v4069_v41 }
 0xff3   :  { %v4070_v57 = vmul.f32 %v7379_v56, %v7379_v56 }
 0xff5   :  { %4077 = vadd.xlane.f32.xlu0 %v4070_v57 }
0x1076   :  { %v4072_v37 = vpop.xlane.xlu1 %4071 }
0x1077   :  { %v4079_v9 = vmul.f32 0.0078125, %v4072_v37 }
0x1079   :  { %v4083_v39 = vadd.f32 1e-05, %v4079_v9 }
0x107a   :  { %v4076_v7 = vpop.xlane.xlu1 %4075  ;;  %v4074_v63 = vpop.xlane.xlu0 %4073 }
0x107b   :  { %6048 = vrsqrt.f32 %v4083_v39  ;;  %v4081_v49 = vmul.f32 0.0078125, %v4076_v7  ;;  %v4080_v14 = vmul.f32 0.0078125, %v4074_v63 }
0x107d   :  { %v4085_v27 = vadd.f32 1e-05, %v4081_v49  ;;  %v4084_v38 = vadd.f32 1e-05, %v4080_v14 }
0x107e   :  { %v4078_v16 = vpop.xlane.xlu0 %4077 }
0x107f   :  { %6050 = vrsqrt.f32 %v4085_v27  ;;  %v4082_v59 = vmul.f32 0.0078125, %v4078_v16 }
0x1080   :  { %6052 = vrsqrt.f32 %v4084_v38 }
0x1081   :  { %v4086_v32 = vadd.f32 1e-05, %v4082_v59 }
0x1083   :  { %6054 = vrsqrt.f32 %v4086_v32 }
0x1088   :  { %v6049_v42 = vpop.eup %6048 }
0x1089   :  { %v4091_v36 = vmul.f32 %v6049_v42, %v7367_v25 }
0x108b   :  { %v4101_v44 = vmul.f32 %v4987_v31, %v4091_v36 }
0x108c   :  { %v6051_v22 = vpop.eup %6050 }
0x108d   :  { %v6053_v6 = vpop.eup %6052  ;;  %v4111_v34 = vadd.f32 %v4988_v11, %v4101_v44  ;;  %v4093_v41 = vmul.f32 %v6051_v22, %v7373_v54  ;;  %v5055_v22 = vld [vmem:[%s7631_s13 + $0x1] ss:$0 sm:$0xff] }
0x108e   :  { %v4092_v17 = vmul.f32 %v6053_v6, %v7371_v13 }
0x108f   :  { %v7473_v25 = vadd.f32 %v4111_v34, %v2388_v61  ;;  %v4103_v52 = vmul.f32 %v4987_v31, %v4093_v41 }
0x1090   :  { %v6055_v57 = vpop.eup %6054  ;;  %v4102_v45 = vmul.f32 %v4987_v31, %v4092_v17 }
0x1091   :  { %v4094_v15 = vmul.f32 %v6055_v57, %v7379_v56  ;;  %v4119_v13 = vmax.f32 %v7473_v25, 0.0  ;;  %v4113_v58 = vadd.f32 %v4988_v11, %v4103_v52 }
0x1092   :  { %v4112_v62 = vadd.f32 %v4988_v11, %v4102_v45 }
0x1093   :  { %v4104_v30 = vmul.f32 %v4987_v31, %v4094_v15  ;;  %v7491_v53 = vadd.f32 %v4113_v58, %v2390_v12  ;;  %v5876_v12 = vld [vmem:[%s7630_s12 + $0xc8] sm:$0xff]  }
0x1094   :  { %v7477_v35 = vadd.f32 %v4112_v62, %v2389_v4  ;;  %5332 = vmatprep.subr.bf16.mxu1 %v5876_v12 }
0x1095   :  { %v4114_v47 = vadd.f32 %v4988_v11, %v4104_v30  ;;  %v4121_v4 = vmax.f32 %v7491_v53, 0.0 }
0x1096   :  { %v4120_v54 = vmax.f32 %v7477_v35, 0.0 }
0x1097   :  { %v7487_v48 = vadd.f32 %v4114_v47, %v2391_v18  ;;  %v5877_v18 = vld [vmem:[%s7630_s12 + $0x88] sm:$0xff]  }
0x1098   :  { %v4123_v56 = vpack.c.bf16 %v4120_v54, %v4119_v13  ;;  %5333 = vmatpush3.bf16.msra.mxu1 %v5877_v18 }
0x1099   :  { %v4122_v61 = vmax.f32 %v7487_v48, 0.0  ;;  %5334 = vmatprep.subr.bf16.mxu1 %v5878_v29 }
0x109a   :  { %4268 = vmatmul.mubr.bf16.vlgmr.msra.gmra.mxu0 %v4123_v56 }
0x109b   :  { %4277 = vmatprep.mubr.bf16.mxu0 %v6086_v2  ;;  %v4124_v28 = vpack.c.bf16 %v4122_v61, %v4121_v4 }
0x109c   :  { %5335 = vmatpush3.bf16.msra.mxu1 %v5879_v51 }
0x10a2   :  { %4278 = vmatmul.mubr.bf16.gmra.mxu0 %v4124_v28 }
0x10a3   :  { %4708 = vmatprep.mubr.bf16.mxu0 %v6086_v2 }
0x115a   :  { %v4269_v26 = vpop.f32.mrf.mxu0 }
0x115b   :  { %v4270_v23 = vadd.f32 %v4269_v26, %v4148_v55 }
0x115c   :  { %v4271_v5 = vpop.f32.mrf.mxu0 }
0x115d   :  { %v4272_v40 = vadd.f32 %v4271_v5, %v4152_v43  ;;  %v4288_v37 = vmax.f32 %v4270_v23, 0.0 }
0x115e   :  { %v4273_v24 = vpop.f32.mrf.mxu0 }
0x115f   :  { %v4274_v50 = vadd.f32 %v4273_v24, %v4148_v55  ;;  %v4289_v19 = vmax.f32 %v4272_v40, 0.0 }
0x1160   :  { %v4275_v10 = vpop.f32.mrf.mxu0 }
0x1161   :  { %v4276_v8 = vadd.f32 %v4275_v10, %v4152_v43  ;;  %v4290_v60 = vmax.f32 %v4274_v50, 0.0 }
0x1162   :  { %v4279_v3 = vpop.f32.mrf.mxu0 }
0x1163   :  { %v4291_v33 = vmax.f32 %v4276_v8, 0.0  ;;  %v4296_v7 = vpack.c.bf16 %v4290_v60, %v4288_v37  ;;  %v4280_v27 = vadd.f32 %v4279_v3, %v4148_v55  ;;  %v5882_v60 = vld [vmem:[%s7634_s16 + $0x74] ss:$8 sps:$4 sm:$0xff]   ;;  %v5880_v3 = vld [vmem:[%s7634_s16 + $0x70] ss:$8 sps:$4 sm:$0xff]  }
0x1164   :  { %v4281_v9 = vpop.f32.mrf.mxu0  ;;  %4676 = vmatprep.subr.bf16.mxu0 %v5882_v60  ;;  %v5888_v37 = vld [vmem:[%s7634_s16 + $0x54] ss:$8 sps:$4 sm:$0xff]  }
0x1165   :  { %v4297_v39 = vpack.c.bf16 %v4291_v33, %v4289_v19  ;;  %v4282_v49 = vadd.f32 %v4281_v9, %v4152_v43  ;;  %v4292_v31 = vmax.f32 %v4280_v27, 0.0  ;;  %4677 = vmatpush1.bf16.msra.mxu0 %v5880_v3  ;;  %v5885_v19 = vld [vmem:[%s7634_s16 + $0x64] ss:$8 sps:$4 sm:$0xff]   ;;  %v5883_v33 = vld [vmem:[%s7634_s16 + $0x60] ss:$8 sps:$4 sm:$0xff]  }
0x1166   :  { %v4283_v63 = vpop.f32.mrf.mxu0  ;;  %4678 = vmatprep.subr.bf16.mxu0 %v5885_v19  ;;  %v5886_v9 = vld [vmem:[%s7634_s16 + $0x50] ss:$8 sps:$4 sm:$0xff]   ;;  %v5895_v27 = vld [vmem:[%s7634_s16 + $0x20] ss:$8 sps:$4 sm:$0xff]  }
0x1167   :  { %v4284_v14 = vadd.f32 %v4283_v63, %v4148_v55  ;;  %4469 = vmatprep.mubr.bf16.mxu1 %v4297_v39  ;;  %v4293_v32 = vmax.f32 %v4282_v49, 0.0  ;;  %v5891_v39 = vld [vmem:[%s7634_s16 + $0x44] ss:$8 sps:$4 sm:$0xff]   ;;  %v5894_v63 = vld [vmem:[%s7634_s16 + $0x34] ss:$8 sps:$4 sm:$0xff]  }
0x1168   :  { %v4285_v38 = vpop.f32.mrf.mxu0  ;;  %4470 = vmatmul.mubr.bf16.vlgmr.msra.gmra.mxu1 %v4296_v7  ;;  %v5889_v7 = vld [vmem:[%s7634_s16 + $0x40] ss:$8 sps:$4 sm:$0xff]   ;;  %v5892_v49 = vld [vmem:[%s7634_s16 + $0x30] ss:$8 sps:$4 sm:$0xff]  }
0x1169   :  { %v4286_v16 = vadd.f32 %v4285_v38, %v4152_v43  ;;  %v4294_v59 = vmax.f32 %v4284_v14, 0.0  ;;  %4679 = vmatpush1.bf16.msra.mxu0 %v5883_v33  ;;  %v5897_v14 = vld [vmem:[%s7634_s16 + $0x24] ss:$8 sps:$4 sm:$0xff]   ;;  %v5900_v38 = vld [vmem:[%s7634_s16 + $0x14] ss:$8 sps:$4 sm:$0xff]  }
0x116a   :  { %4680 = vmatprep.subr.bf16.mxu0 %v5888_v37  ;;  %v4584_v33 = vld [vmem:[%s7635_s17] sm:$0x3]  ;;  %s6093_s17 = smov [#allocation2]  }
0x116b   :  { %v4295_v42 = vmax.f32 %v4286_v16, 0.0  ;;  %v4298_v11 = vpack.c.bf16 %v4294_v59, %v4292_v31  ;;  %v5898_v16 = vld [vmem:[%s7634_s16 + $0x10] ss:$8 sps:$4 sm:$0xff]   ;;  %v5903_v59 = vld [vmem:[%s7634_s16 + $0x4] ss:$8 sps:$4 sm:$0xff]   ;;  %v4589_v53 = vrot.slane %v4584_v33, %v6898_v1  ;;  %s4742_s28 = sshll.u32 %s6093_s17, 4  ;;  %s4743_s28 = int_to_ptr.vmem [resolvable:$true] %s4742_s28 }
0x116c   :  { %s6064_s8 = scalar_lea.vmem %s4743_s28, 1024  ;;  %p6069_p1 = scmp.lt.s32.totalorder %s4743_s28, %s4743_s28 }
0x116d   :  { %v4299_v36 = vpack.c.bf16 %v4295_v42, %v4293_v32  ;;  %4681 = vmatpush1.bf16.msra.mxu0 %v5886_v9  ;;  %v5901_v32 = vld [vmem:[%s7634_s16] ss:$8 sps:$4 sm:$0xff]   ;;  %p6065_p0 = scmp.ne.s32.totalorder %s4743_s28, %s6064_s8  ;;  %p6070_p2 = scmp.lt.s32.totalorder %s6064_s8, %s6064_s8 }
0x116e   :  { %4682 = vmatprep.subr.bf16.mxu0 %v5891_v39 }
0x116f   :  { %4477 = vmatprep.mubr.bf16.mxu1 %v4299_v36  ;;  %p6071_p3 = por %p6070_p2, %p6069_p1 }
0x1170   :  { %4478 = vmatmul.mubr.bf16.gmra.mxu1 %v4298_v11 }
0x1171   :  { %4683 = vmatpush1.bf16.msra.mxu0 %v5889_v7  ;;  %p6072_p4 = pnand %p6071_p3, %p6065_p0 }
0x1172   :  { %4684 = vmatprep.subr.bf16.mxu0 %v5894_v63 }
0x1175   :  { %4685 = vmatpush1.bf16.msra.mxu0 %v5892_v49 }
0x1176   :  { %4686 = vmatprep.subr.bf16.mxu0 %v5897_v14 }
0x1179   :  { %4687 = vmatpush1.bf16.msra.mxu0 %v5895_v27 }
0x117a   :  { %4688 = vmatprep.subr.bf16.mxu0 %v5900_v38 }
0x117d   :  { %4689 = vmatpush1.bf16.msra.mxu0 %v5898_v16 }
0x117e   :  { %4690 = vmatprep.subr.bf16.mxu0 %v5903_v59 }
0x1181   :  { %4691 = vmatpush1.bf16.msra.mxu0 %v5901_v32 }
0x1228   :  { %v5336_v44 = vpop.f32.mrf.mxu1 }
0x122a   :  { %v5337_v6 = vpop.f32.mrf.mxu1 }
0x122b   :  { %v5338_v17 = vadd.f32 %v5337_v6, %v5336_v44 }
0x122c   :  { %v5339_v34 = vpop.f32.mrf.mxu1 }
0x122d   :  { %v4472_v41 = vadd.f32 %v5338_v17, %v5055_v22 }
0x122e   :  { %v5340_v57 = vpop.f32.mrf.mxu1 }
0x122f   :  { %v5341_v45 = vadd.f32 %v5340_v57, %v5339_v34  ;;  %4490 = vadd.xlane.f32.xlu1 %v4472_v41 }
0x1230   :  { %v5342_v15 = vpop.f32.mrf.mxu1 }
0x1231   :  { %v4475_v62 = vadd.f32 %v5341_v45, %v5055_v22 }
0x1232   :  { %v5343_v52 = vpop.f32.mrf.mxu1 }
0x1233   :  { %v5344_v30 = vadd.f32 %v5343_v52, %v5342_v15  ;;  %4492 = vadd.xlane.f32.xlu0 %v4475_v62 }
0x1234   :  { %v5345_v47 = vpop.f32.mrf.mxu1 }
0x1235   :  { %v4480_v58 = vadd.f32 %v5344_v30, %v5055_v22  ;;  %v5075_v30 = vld [vmem:[%s7633_s15 + $0x1] ss:$0 sm:$0xff] }
0x1236   :  { %v5346_v56 = vpop.f32.mrf.mxu1 }
0x1237   :  { %v5347_v28 = vadd.f32 %v5346_v56, %v5345_v47  ;;  %4494 = vadd.xlane.f32.xlu1 %v4480_v58 }
0x1239   :  { %v4483_v20 = vadd.f32 %v5347_v28, %v5055_v22 }
0x123b   :  { %4496 = vadd.xlane.f32.xlu0 %v4483_v20 }
0x12b8   :  { %v4491_v0 = vpop.xlane.xlu1 %4490 }
0x12b9   :  { %v4498_v12 = vmul.f32 0.0078125, %v4491_v0 }
0x12bb   :  { %v7527_v18 = vsub.f32 %v4472_v41, %v4498_v12 }
0x12bc   :  { %v4493_v29 = vpop.xlane.xlu0 %4492 }
0x12bd   :  { %v4499_v51 = vmul.f32 0.0078125, %v4493_v29  ;;  %v4506_v46 = vmul.f32 %v7527_v18, %v7527_v18 }
0x12bf   :  { %v7531_v26 = vsub.f32 %v4475_v62, %v4499_v51  ;;  %4510 = vadd.xlane.f32.xlu1 %v4506_v46  ;;  %v5074_v62 = vld [vmem:[%s7632_s14 + $0x1] ss:$0 sm:$0xff] }
0x12c0   :  { %v4495_v43 = vpop.xlane.xlu1 %4494 }
0x12c1   :  { %v4500_v55 = vmul.f32 0.0078125, %v4495_v43  ;;  %v4507_v5 = vmul.f32 %v7531_v26, %v7531_v26 }
0x12c3   :  { %v7535_v24 = vsub.f32 %v4480_v58, %v4500_v55  ;;  %4512 = vadd.xlane.f32.xlu0 %v4507_v5 }
0x12c4   :  { %v4497_v40 = vpop.xlane.xlu0 %4496 }
0x12c5   :  { %v4501_v50 = vmul.f32 0.0078125, %v4497_v40  ;;  %v4508_v23 = vmul.f32 %v7535_v24, %v7535_v24 }
0x12c7   :  { %v7539_v10 = vsub.f32 %v4483_v20, %v4501_v50  ;;  %4514 = vadd.xlane.f32.xlu1 %v4508_v23 }
0x12c9   :  { %v4509_v8 = vmul.f32 %v7539_v10, %v7539_v10 }
0x12cb   :  { %4516 = vadd.xlane.f32.xlu0 %v4509_v8 }
0x1348   :  { %v4511_v42 = vpop.xlane.xlu1 %4510 }
0x1349   :  { %v4518_v31 = vmul.f32 0.0078125, %v4511_v42 }
0x134b   :  { %v4522_v36 = vadd.f32 1e-05, %v4518_v31 }
0x134c   :  { %v4513_v11 = vpop.xlane.xlu0 %4512 }
0x134d   :  { %6056 = vrsqrt.f32 %v4522_v36  ;;  %v4519_v44 = vmul.f32 0.0078125, %v4513_v11 }
0x134f   :  { %v4523_v22 = vadd.f32 1e-05, %v4519_v44 }
0x1350   :  { %v4515_v6 = vpop.xlane.xlu1 %4514 }
0x1351   :  { %6058 = vrsqrt.f32 %v4523_v22  ;;  %v4520_v17 = vmul.f32 0.0078125, %v4515_v6 }
0x1353   :  { %v4524_v34 = vadd.f32 1e-05, %v4520_v17 }
0x1354   :  { %v4517_v41 = vpop.xlane.xlu0 %4516 }
0x1355   :  { %6060 = vrsqrt.f32 %v4524_v34  ;;  %v4521_v57 = vmul.f32 0.0078125, %v4517_v41 }
0x1357   :  { %v4525_v45 = vadd.f32 1e-05, %v4521_v57 }
0x1359   :  { %6062 = vrsqrt.f32 %v4525_v45 }
0x135a   :  { %v6057_v15 = vpop.eup %6056 }
0x135b   :  { %v4530_v52 = vmul.f32 %v6057_v15, %v7527_v18 }
0x135d   :  { %v4540_v47 = vmul.f32 %v5074_v62, %v4530_v52 }
0x135e   :  { %v6059_v58 = vpop.eup %6058 }
0x135f   :  { %v4531_v56 = vmul.f32 %v6059_v58, %v7531_v26  ;;  %v4550_v28 = vadd.f32 %v5075_v30, %v4540_v47 }
0x1361   :  { %v4541_v20 = vmul.f32 %v5074_v62, %v4531_v56  ;;  %v4554_v0 = vadd.f32 %v4550_v28, %v4119_v13 }
0x1362   :  { %v6061_v12 = vpop.eup %6060 }
0x1363   :  { %v4551_v29 = vadd.f32 %v5075_v30, %v4541_v20  ;;  %v4532_v51 = vmul.f32 %v6061_v12, %v7535_v24  ;;  %v4558_v46 = vmax.f32 %v4554_v0, 0.0 }
0x1365   :  { %v4555_v18 = vadd.f32 %v4551_v29, %v4120_v54  ;;  %v4542_v43 = vmul.f32 %v5074_v62, %v4532_v51  ;;  %v4562_v26 = vmax.f32 %v4558_v46, 0.0 }
0x1366   :  { %v6063_v55 = vpop.eup %6062 }
0x1367   :  { %v4559_v5 = vmax.f32 %v4555_v18, 0.0  ;;  %v4533_v40 = vmul.f32 %v6063_v55, %v7539_v10  ;;  %v4552_v50 = vadd.f32 %v5075_v30, %v4542_v43 }
0x1369   :  { %v4563_v23 = vmax.f32 %v4559_v5, 0.0  ;;  %v4543_v8 = vmul.f32 %v5074_v62, %v4533_v40  ;;  %v4556_v25 = vadd.f32 %v4552_v50, %v4121_v4  ;;  %v4593_v4 = vrot.slane %v4584_v33, %v6895_v21 }
0x136b   :  { %v4566_v13 = vpack.c.bf16 %v4563_v23, %v4562_v26  ;;  %v4553_v60 = vadd.f32 %v5075_v30, %v4543_v8  ;;  %v4560_v54 = vmax.f32 %v4556_v25, 0.0 }
0x136d   :  { %4709 = vmatmul.mubr.bf16.vlgmr.msra.gmra.mxu0 %v4566_v13  ;;  %v4557_v35 = vadd.f32 %v4553_v60, %v4122_v61  ;;  %v4564_v3 = vmax.f32 %v4560_v54, 0.0 }
0x136e   :  { %4718 = vmatprep.mubr.bf16.mxu0 %v6086_v2 }
0x136f   :  { %v4561_v24 = vmax.f32 %v4557_v35, 0.0 }
0x1371   :  { %v4565_v19 = vmax.f32 %v4561_v24, 0.0 }
0x1373   :  { %v4567_v10 = vpack.c.bf16 %v4565_v19, %v4564_v3 }
0x1375   :  { %4719 = vmatmul.mubr.bf16.gmra.mxu0 %v4567_v10 }
0x142d   :  { %v4710_v37 = vpop.f32.mrf.mxu0 }
0x142e   :  { %v4711_v9 = vadd.f32 %v4710_v37, %v4589_v53 }
0x142f   :  { %v4712_v48 = vpop.f32.mrf.mxu0 }
0x1430   :  { %4729 = vst [vmem:[#allocation2] sm:$0xff] %v4711_v9  ;;  %v4713_v61 = vadd.f32 %v4712_v48, %v4593_v4 }
0x1431   :  { %v4714_v39 = vpop.f32.mrf.mxu0 }
0x1432   :  { %4730 = vst [vmem:[#allocation2 + $0x8] sm:$0xff] %v4713_v61  ;;  %v4715_v2 = vadd.f32 %v4714_v39, %v4589_v53 }
0x1433   :  { %v4716_v7 = vpop.f32.mrf.mxu0 }
0x1434   :  { %4731 = vst [vmem:[#allocation2 + $0x10] sm:$0xff] %v4715_v2  ;;  %v4717_v63 = vadd.f32 %v4716_v7, %v4593_v4 }
0x1435   :  { %v4720_v49 = vpop.f32.mrf.mxu0 }
0x1436   :  { %4732 = vst [vmem:[#allocation2 + $0x18] sm:$0xff] %v4717_v63  ;;  %v4721_v14 = vadd.f32 %v4720_v49, %v4589_v53 }
0x1437   :  { %v4722_v27 = vpop.f32.mrf.mxu0 }
0x1438   :  { %4733 = vst [vmem:[#allocation2 + $0x20] sm:$0xff] %v4721_v14  ;;  %v4723_v38 = vadd.f32 %v4722_v27, %v4593_v4 }
0x1439   :  { %v4724_v21 = vpop.f32.mrf.mxu0 }
0x143a   :  { %4734 = vst [vmem:[#allocation2 + $0x28] sm:$0xff] %v4723_v38  ;;  %v4725_v1 = vadd.f32 %v4724_v21, %v4589_v53 }
0x143b   :  { %v4726_v16 = vpop.f32.mrf.mxu0 }
0x143c   :  { %4735 = vst [vmem:[#allocation2 + $0x30] sm:$0xff] %v4725_v1  ;;  %v4727_v59 = vadd.f32 %v4726_v16, %v4593_v4 }
0x143e   :  { %4736 = vst [vmem:[#allocation2 + $0x38] sm:$0xff] %v4727_v59 }
0x143f   :  { %6075 = shalt.err (!%p6072_p4)
}
0x1440   :  { %s6094_s9 = smov 256   ;;  %s6095_s30 = smov 16  }
0x1441   :  { %4748 = dma.vmem_to_hbm [thread:$0]  %s4743_s28, 1024, %s7636_s18, [#allocation3], %s6094_s9, %s6094_s9, %s6095_s30  }
0x1442   :  { %6084 = dma.done.wait [#allocation3], 1024  }
0x1443   :  { %6085 = vsyncadd [#allocation3], 4294966272 }
0x1444   :  { %4752 = vsyncpa [#allocation3], 1 }

</bundles_post_ra>
